<compile_context>
chip_gen: v5e
topology: v5e:2x2
jax: 0.10.0
libtpu: 0.0.40
codegen_flags: <defaults>
</compile_context>

<pallas_src>
import numpy as np
import jax
import jax.numpy as jnp
from jax.experimental import pallas as pl
from jax.experimental.pallas import tpu as pltpu

SELU_ALPHA = 1.6732632423543772848170429916717
SELU_SCALE = 1.0507009873554804934193349852946
BN_EPS = 1e-5
N_LANDCOVER = 4
INTEG_DIM = 256      # width of `integrated` (input to the entropy layer)
OUT_LANES = 128      # lane-dense output block width (column 0 is the real output)


# ---------------------------------------------------------------------------
# elementwise helpers (built only from ops with guaranteed Mosaic lowerings)
# ---------------------------------------------------------------------------
def _erf(x):
    # float32-accurate erf (Abramowitz & Stegun 7.1.26, max abs err ~1.5e-7).
    # The 1/(1+p*z) is done on the EUP via pl.reciprocal, not as a VALU divide.
    a1, a2, a3, a4, a5 = (0.254829592, -0.284496736, 1.421413741,
                          -1.453152027, 1.061405429)
    p = 0.3275911
    s = jnp.where(x >= 0.0, 1.0, -1.0)
    z = jnp.abs(x)
    t = pl.reciprocal(1.0 + p * z, approx=True)
    poly = ((((a5 * t + a4) * t + a3) * t + a2) * t + a1) * t
    return s * (1.0 - poly * jnp.exp(-z * z))


def _gelu(x):
    # erf-based GELU matching torch.nn.functional.gelu default
    return 0.5 * x * (1.0 + _erf(x * np.float32(1.0 / np.sqrt(2.0))))


def _selu(x):
    # exp input clamped to <= 0 (that branch is only selected for x <= 0 anyway)
    return SELU_SCALE * jnp.where(
        x > 0.0, x, SELU_ALPHA * (jnp.exp(jnp.minimum(x, 0.0)) - 1.0))


def _sigmoid(x):
    # sigmoid(x) == 0.5*(tanh(x/2)+1): single EUP tanh, no VALU divide sequence
    return 0.5 * (jnp.tanh(0.5 * x) + 1.0)


def _round_up(a, m):
    return (a + m - 1) // m * m


# ---------------------------------------------------------------------------
# kernel: the whole forward pass for one batch tile
# ---------------------------------------------------------------------------
def _model_kernel(
    x_ref,
    w1_ref, b1_ref,            # fused first layer: [ffn1 | pm(pad 256) | conv]
    w_ffn2_ref, w_cnnd_ref, w_pmd_ref,
    w_i1_ref, w_i2_ref,
    w_sig_f_ref,
    aux_ref,
    o_ref,
):
    f32 = jnp.float32
    bf16 = jnp.bfloat16
    x_bf = x_ref[...].astype(bf16)
    aux = aux_ref[...]          # (16, 512) f32: packed biases / BN / entropy / output

    def mm(h_bf, w_ref):
        return jnp.dot(h_bf, w_ref[...], preferred_element_type=f32)

    # --- fused first layer (single shared-LHS matmul), slices at 128-lane bounds
    h1 = mm(x_bf, w1_ref) + b1_ref[...]
    ffn1 = _gelu(h1[:, 0:256])          # ffn_branch1
    pm1 = _selu(h1[:, 256:512])         # pmffnn_branch1/2/3 (cols 448:512 are zero)
    cnn1 = _selu(h1[:, 512:])           # Conv1d(1,32,k=3,p=1) + flatten, SELU

    # --- second layer of each branch (BN of the previous layer already folded in)
    ffn_out = _gelu(mm(ffn1.astype(bf16), w_ffn2_ref) + aux[0:1, 0:128])
    ffn_out_bf = ffn_out.astype(bf16)
    cnn_out = _selu(mm(cnn1.astype(bf16), w_cnnd_ref) + aux[1:2, 0:128])
    pm_out = _selu(mm(pm1.astype(bf16), w_pmd_ref) + aux[2:3, 0:128])

    # --- integrated trunk: one K=384 matmul on the bf16 concat
    concat = jnp.concatenate(
        [ffn_out_bf, cnn_out.astype(bf16), pm_out.astype(bf16)], axis=-1)
    i1 = _gelu(mm(concat, w_i1_ref) + aux[3:4, 0:512])
    integ = _gelu(mm(i1.astype(bf16), w_i2_ref) + aux[4:5, 0:256])
    # integrated_bn2 stays explicit (feeds the nonlinear entropy layer)
    integ = integ * aux[5:6, 0:256] + aux[6:7, 0:256]

    # --- EntropyLayer in log-Z form on the first N_LANDCOVER cols
    lc = integ[:, 0:128]
    col = jax.lax.broadcasted_iota(jnp.int32, lc.shape, 1)
    mask = col < N_LANDCOVER
    logits = jnp.where(mask, lc, jnp.float32(-1e30))
    m = jnp.max(logits, axis=-1, keepdims=True)
    shifted = jnp.where(mask, lc - m, 0.0)          # mask BEFORE exp (no overflow)
    e = jnp.where(mask, jnp.exp(shifted), 0.0)
    z = jnp.sum(e, axis=-1, keepdims=True)          # (BM, 1)
    s_num = jnp.sum(e * shifted, axis=-1, keepdims=True)
    k = aux[8:9, 0:1]                               # (1, 1)
    # -sum(p*log p) = logZ - (1/Z)*sum(e*(lc-m))
    entropy_term = k * (jnp.log(z) - s_num * pl.reciprocal(z, approx=True))
    env_term = jnp.sum(aux[7:8, 0:256] * integ, axis=-1, keepdims=True)
    entropy_out = entropy_term + env_term           # (BM, 1)

    # --- sigmoid branches on [entropy_out, ffn_out]: entropy column as a rank-1
    #     outer product, ffn columns as one packed (128, 384) matmul
    sig_pre = (entropy_out * aux[10:11, 0:384]
               + mm(ffn_out_bf, w_sig_f_ref)
               + aux[9:10, 0:384])
    sig = _sigmoid(sig_pre)                         # (BM, 384)

    # --- output layer: VPU multiply + lane reduction, lane-dense store
    out_col = (jnp.sum(sig * aux[11:12, 0:384], axis=-1, keepdims=True)
               + aux[12:13, 0:1])                   # (BM, 1)
    o_ref[...] = jnp.broadcast_to(out_col, o_ref.shape).astype(o_ref.dtype)


# ---------------------------------------------------------------------------
# wrapper
# ---------------------------------------------------------------------------
def physics_entropy_forward(x, params, *, block_b=256):
    B, F = x.shape
    bb = max(8, min(block_b, _round_up(B, 8)))
    n_tiles = pl.cdiv(B, bb)
    # v7x: prefer an even number of tiles so both TensorCores get balanced work.
    if n_tiles > 1 and n_tiles % 2 == 1:
        bb_alt = max(8, _round_up(pl.cdiv(B, n_tiles + 1), 8))
        if pl.cdiv(B, bb_alt) % 2 == 0:
            bb = bb_alt
            n_tiles = pl.cdiv(B, bb)
    grid = (n_tiles,)

    def full_spec(shape):
        nd = len(shape)
        return pl.BlockSpec(shape, lambda i, _nd=nd: (0,) * _nd)

    in_specs = [pl.BlockSpec((bb, F), lambda i: (i, 0))]
    in_specs += [full_spec(tuple(p.shape)) for p in params]
    out_specs = pl.BlockSpec((bb, OUT_LANES), lambda i: (i, 0))

    out_wide = pl.pallas_call(
        _model_kernel,
        out_shape=jax.ShapeDtypeStruct((B, OUT_LANES), jnp.float32),
        grid=grid,
        in_specs=in_specs,
        out_specs=out_specs,
        compiler_params=pltpu.CompilerParams(
            dimension_semantics=("parallel",),
            vmem_limit_bytes=32 * 1024 * 1024),
    )(x, *params)
    return out_wide[:, :1]


# ---------------------------------------------------------------------------
# deterministic parameter init (shapes follow the torch module __init__),
# with eval-mode BatchNorm folded into the adjacent (following) Linear weights.
# ---------------------------------------------------------------------------
def init_params(key, n_features, n_landcover=N_LANDCOVER, m_env_factors=300):
    F = n_features
    ss = F // 3
    n_ch = 32
    cdim = n_ch * F
    keys = iter(jax.random.split(key, 16))

    def linear(k, fan_in, fan_out):
        kw, kb = jax.random.split(k)
        bound = 1.0 / np.sqrt(fan_in)
        w = np.asarray(jax.random.uniform(kw, (fan_in, fan_out), jnp.float32,
                                          -bound, bound))
        b = np.asarray(jax.random.uniform(kb, (fan_out,), jnp.float32,
                                          -bound, bound))
        return w, b

    def bn_fold(n):
        # eval-mode BatchNorm1d with default params / running stats -> scale, shift
        gamma = np.ones(n, np.float32)
        beta = np.zeros(n, np.float32)
        mean = np.zeros(n, np.float32)
        var = np.ones(n, np.float32)
        s = gamma / np.sqrt(var + BN_EPS)
        t = beta - mean * s
        return s.astype(np.float32), t.astype(np.float32)

    # --- FFN branch
    w_ffn1, b_ffn1 = linear(next(keys), F, 256)
    w_ffn2, b_ffn2 = linear(next(keys), 256, 128)
    s1, t1 = bn_fold(256)                       # ffn_bn1 -> folded into ffn_branch2
    b_ffn2 = b_ffn2 + t1 @ w_ffn2
    w_ffn2 = s1[:, None] * w_ffn2
    s2, t2 = bn_fold(128)                       # ffn_bn2 -> folded downstream

    # --- CNN branch: Conv1d(1, 32, k=3, pad=1) as a banded (F, 32*F) matrix
    kcw, kcb = jax.random.split(next(keys))
    cbound = 1.0 / np.sqrt(1 * 3)
    conv_w = np.asarray(jax.random.uniform(kcw, (n_ch, 1, 3), jnp.float32,
                                           -cbound, cbound))
    conv_b = np.asarray(jax.random.uniform(kcb, (n_ch,), jnp.float32,
                                           -cbound, cbound))
    Wconv = np.zeros((F, cdim), np.float32)
    for c in range(n_ch):
        for kk in range(3):
            for t in range(F):
                src = t + kk - 1                # out[t] = sum_k w[k] * in[t+k-1]
                if 0 <= src < F:
                    Wconv[src, c * F + t] = conv_w[c, 0, kk]

    w_cnnd, b_cnnd = linear(next(keys), cdim, 128)
    s_c, t_c = bn_fold(n_ch)                    # cnn_bn (per-channel) -> cnn_dense
    s_cf = np.repeat(s_c, F)
    t_cf = np.repeat(t_c, F)
    b_cnnd = b_cnnd + t_cf @ w_cnnd
    w_cnnd = s_cf[:, None] * w_cnnd
    s3, t3 = bn_fold(128)                       # cnn_bn2 -> folded downstream

    # --- PMFFNN branch: block-diagonal packing of the three split Linears
    w_b1, b_b1 = linear(next(keys), ss, 64)
    w_b2, b_b2 = linear(next(keys), ss, 64)
    w_b3, b_b3 = linear(next(keys), F - 2 * ss, 64)
    Wpm = np.zeros((F, 192), np.float32)
    Wpm[:ss, 0:64] = w_b1
    Wpm[ss:2 * ss, 64:128] = w_b2
    Wpm[2 * ss:, 128:192] = w_b3
    b_pm = np.concatenate([b_b1, b_b2, b_b3])
    sa, ta = bn_fold(64)
    sb, tb = bn_fold(64)
    sc_, tc_ = bn_fold(64)
    s_pm = np.concatenate([sa, sb, sc_])
    t_pm = np.concatenate([ta, tb, tc_])
    w_pmd, b_pmd = linear(next(keys), 192, 128)
    b_pmd = b_pmd + t_pm @ w_pmd                # pmffnn_bn1/2/3 -> pmffnn_dense
    w_pmd = s_pm[:, None] * w_pmd
    w_pmd_pad = np.zeros((256, 128), np.float32)  # pad rows 192:256 with zeros
    w_pmd_pad[:192] = w_pmd
    s4, t4 = bn_fold(128)                       # pmffnn_bn4 -> folded downstream

    # --- fused first layer: [ffn_branch1 (256) | pmffnn packed (192, pad to 256) |
    #     conv banded (32F)], with the conv bias folded into the fused bias row
    first_w = np.zeros((F, 512 + cdim), np.float32)
    first_w[:, 0:256] = w_ffn1
    first_w[:, 256:448] = Wpm
    first_w[:, 512:] = Wconv
    first_b = np.zeros((1, 512 + cdim), np.float32)
    first_b[0, 0:256] = b_ffn1
    first_b[0, 256:448] = b_pm                  # cols 448:512 stay 0 -> SELU(0)=0
    first_b[0, 512:] = np.repeat(conv_b, F)

    # --- integrated trunk (fold ffn_bn2 / cnn_bn2 / pmffnn_bn4 into dense1 blocks)
    w_i1, b_i1 = linear(next(keys), 384, 512)
    b_i1 = (b_i1 + t2 @ w_i1[0:128] + t3 @ w_i1[128:256] + t4 @ w_i1[256:384])
    w_i1 = np.concatenate([s2[:, None] * w_i1[0:128],
                           s3[:, None] * w_i1[128:256],
                           s4[:, None] * w_i1[256:384]], axis=0)
    s5, t5 = bn_fold(512)                       # integrated_bn1 -> integrated_dense2
    w_i2, b_i2 = linear(next(keys), 512, 256)
    b_i2 = b_i2 + t5 @ w_i2
    w_i2 = s5[:, None] * w_i2
    s6, t6 = bn_fold(256)                       # integrated_bn2 -> applied in kernel

    # --- EntropyLayer params: k = ones(1), alpha = ones(m_env_factors).
    # Note: m_env_factors must be >= INTEG_DIM - n_landcover (=252) for torch's
    # broadcast alpha[:f_j_size] * f_j to be valid; we pass m_env_factors=300.
    n_env = INTEG_DIM - n_landcover
    alpha = np.ones((m_env_factors,), np.float32)
    alpha_row = np.zeros((INTEG_DIM,), np.float32)
    alpha_row[n_landcover:] = alpha[:n_env]
    k_val = 1.0

    # --- sigmoid branches (3 x Linear(129, 128)) packed along the output axis
    w_s1, b_s1 = linear(next(keys), 129, 128)
    w_s2, b_s2 = linear(next(keys), 129, 128)
    w_s3, b_s3 = linear(next(keys), 129, 128)
    W_sig = np.concatenate([w_s1, w_s2, w_s3], axis=1)        # (129, 384)
    b_sig = np.concatenate([b_s1, b_s2, b_s3])
    w_sig_e = W_sig[0, :]                                     # entropy column weights
    w_sig_ff = W_sig[1:, :]                                   # ffn_out columns
    b_sig = b_sig + t2 @ w_sig_ff                             # fold ffn_bn2 here too
    w_sig_ff = s2[:, None] * w_sig_ff

    # --- output layer
    w_out, b_out = linear(next(keys), 384, 1)

    # --- pack all small vectors into one padded aux array (single DMA descriptor)
    aux = np.zeros((16, 512), np.float32)
    aux[0, :128] = b_ffn2
    aux[1, :128] = b_cnnd
    aux[2, :128] = b_pmd
    aux[3, :512] = b_i1
    aux[4, :256] = b_i2
    aux[5, :256] = s6
    aux[6, :256] = t6
    aux[7, :256] = alpha_row
    aux[8, 0] = k_val
    aux[9, :384] = b_sig
    aux[10, :384] = w_sig_e
    aux[11, :384] = w_out[:, 0]
    aux[12, 0] = b_out[0]

    bf = lambda a: jnp.asarray(a, jnp.bfloat16)
    f32a = lambda a: jnp.asarray(a, jnp.float32)

    return (
        bf(first_w), f32a(first_b),
        bf(w_ffn2), bf(w_cnnd), bf(w_pmd_pad),
        bf(w_i1), bf(w_i2),
        bf(w_sig_ff),
        f32a(aux),
    )


if __name__ == "__main__":
    n_features = 36          # divisible by 3 -> PMFFNN splits of 12 / 12 / 12
    batch = 16
    key = jax.random.PRNGKey(0)
    kx, kp = jax.random.split(key)
    x = jax.random.normal(kx, (batch, n_features), dtype=jnp.float32)
    params = init_params(kp, n_features)

    out = physics_entropy_forward(x, params, block_b=256)
    out = jax.block_until_ready(out)

    assert out.shape == (batch, 1), out.shape
    assert bool(jnp.all(jnp.isfinite(out)))
    print("KERNEL_OK")
</pallas_src>

<mosaic_0001>
module attributes {stable_mosaic.version = 11 : i64} {
  func.func @_model_kernel(%arg0: i32, %arg1: memref<16x36xf32, #tpu.memory_space<vmem>>, %arg2: memref<36x1664xbf16, #tpu.memory_space<vmem>>, %arg3: memref<1x1664xf32, #tpu.memory_space<vmem>>, %arg4: memref<256x128xbf16, #tpu.memory_space<vmem>>, %arg5: memref<1152x128xbf16, #tpu.memory_space<vmem>>, %arg6: memref<256x128xbf16, #tpu.memory_space<vmem>>, %arg7: memref<384x512xbf16, #tpu.memory_space<vmem>>, %arg8: memref<512x256xbf16, #tpu.memory_space<vmem>>, %arg9: memref<128x384xbf16, #tpu.memory_space<vmem>>, %arg10: memref<16x512xf32, #tpu.memory_space<vmem>>, %arg11: memref<16x128xf32, #tpu.memory_space<vmem>>) attributes {dimension_semantics = [#tpu.dimension_semantics<parallel>], iteration_bounds = array<i64: 1>, scalar_prefetch = 0 : i64, scratch_operands = 0 : i64, tpu.core_type = #tpu.core_type<tc>, window_params = [{transform_indices = @transform_0, window_bounds = array<i64: 16, 36>}, {pipeline_mode = #tpu.pipeline_mode<synchronous>, transform_indices = @transform_1, window_bounds = array<i64: 36, 1664>}, {pipeline_mode = #tpu.pipeline_mode<synchronous>, transform_indices = @transform_2, window_bounds = array<i64: 1, 1664>}, {pipeline_mode = #tpu.pipeline_mode<synchronous>, transform_indices = @transform_3, window_bounds = array<i64: 256, 128>}, {pipeline_mode = #tpu.pipeline_mode<synchronous>, transform_indices = @transform_4, window_bounds = array<i64: 1152, 128>}, {pipeline_mode = #tpu.pipeline_mode<synchronous>, transform_indices = @transform_5, window_bounds = array<i64: 256, 128>}, {pipeline_mode = #tpu.pipeline_mode<synchronous>, transform_indices = @transform_6, window_bounds = array<i64: 384, 512>}, {pipeline_mode = #tpu.pipeline_mode<synchronous>, transform_indices = @transform_7, window_bounds = array<i64: 512, 256>}, {pipeline_mode = #tpu.pipeline_mode<synchronous>, transform_indices = @transform_8, window_bounds = array<i64: 128, 384>}, {pipeline_mode = #tpu.pipeline_mode<synchronous>, transform_indices = @transform_9, window_bounds = array<i64: 16, 512>}, {transform_indices = @transform_10, window_bounds = array<i64: 16, 128>}]} {
    %c0 = arith.constant 0 : index
    %c0_0 = arith.constant 0 : index
    %0 = vector.load %arg1[%c0, %c0_0] : memref<16x36xf32, #tpu.memory_space<vmem>>, vector<16x36xf32>
    %1 = arith.truncf %0 : vector<16x36xf32> to vector<16x36xbf16>
    %c0_1 = arith.constant 0 : index
    %c0_2 = arith.constant 0 : index
    %2 = vector.load %arg10[%c0_1, %c0_2] : memref<16x512xf32, #tpu.memory_space<vmem>>, vector<16x512xf32>
    %c0_3 = arith.constant 0 : index
    %c0_4 = arith.constant 0 : index
    %3 = vector.load %arg2[%c0_3, %c0_4] : memref<36x1664xbf16, #tpu.memory_space<vmem>>, vector<36x1664xbf16>
    %cst = arith.constant dense<0.000000e+00> : vector<16x1664xf32>
    %4 = tpu.matmul %1, %3, %cst {dimension_numbers = #tpu.dot_dimension_numbers<[1], [0], [0], [1], [0, 0, 1, 1], [], []>} : vector<16x36xbf16>, vector<36x1664xbf16>, vector<16x1664xf32> -> vector<16x1664xf32>
    %c0_5 = arith.constant 0 : index
    %c0_6 = arith.constant 0 : index
    %5 = vector.load %arg3[%c0_5, %c0_6] : memref<1x1664xf32, #tpu.memory_space<vmem>>, vector<1x1664xf32>
    %6 = vector.broadcast %5 : vector<1x1664xf32> to vector<16x1664xf32>
    %7 = arith.addf %4, %6 : vector<16x1664xf32>
    %8 = vector.extract_strided_slice %7 {offsets = [0, 0], sizes = [16, 256], strides = [1, 1]} : vector<16x1664xf32> to vector<16x256xf32>
    %cst_7 = arith.constant 5.000000e-01 : f32
    %9 = vector.broadcast %cst_7 : f32 to vector<16x256xf32>
    %10 = arith.mulf %9, %8 : vector<16x256xf32>
    %cst_8 = arith.constant 0.707106769 : f32
    %11 = vector.broadcast %cst_8 : f32 to vector<16x256xf32>
    %12 = arith.mulf %8, %11 : vector<16x256xf32>
    %cst_9 = arith.constant 0.000000e+00 : f32
    %13 = vector.broadcast %cst_9 : f32 to vector<16x256xf32>
    %14 = arith.cmpf oge, %12, %13 : vector<16x256xf32>
    %cst_10 = arith.constant 1.000000e+00 : f32
    %cst_11 = arith.constant -1.000000e+00 : f32
    %15 = vector.broadcast %cst_10 : f32 to vector<16x256xf32>
    %16 = vector.broadcast %cst_11 : f32 to vector<16x256xf32>
    %17 = arith.select %14, %15, %16 : vector<16x256xi1>, vector<16x256xf32>
    %18 = math.absf %12 : vector<16x256xf32>
    %cst_12 = arith.constant 0.327591091 : f32
    %19 = vector.broadcast %cst_12 : f32 to vector<16x256xf32>
    %20 = arith.mulf %19, %18 : vector<16x256xf32>
    %cst_13 = arith.constant 1.000000e+00 : f32
    %21 = vector.broadcast %cst_13 : f32 to vector<16x256xf32>
    %22 = arith.addf %21, %20 : vector<16x256xf32>
    %23 = tpu.reciprocal %22 {approx = true} : vector<16x256xf32> -> vector<16x256xf32>
    %cst_14 = arith.constant 1.06140542 : f32
    %24 = vector.broadcast %cst_14 : f32 to vector<16x256xf32>
    %25 = arith.mulf %24, %23 : vector<16x256xf32>
    %cst_15 = arith.constant -1.45315206 : f32
    %26 = vector.broadcast %cst_15 : f32 to vector<16x256xf32>
    %27 = arith.addf %25, %26 : vector<16x256xf32>
    %28 = arith.mulf %27, %23 : vector<16x256xf32>
    %cst_16 = arith.constant 1.42141378 : f32
    %29 = vector.broadcast %cst_16 : f32 to vector<16x256xf32>
    %30 = arith.addf %28, %29 : vector<16x256xf32>
    %31 = arith.mulf %30, %23 : vector<16x256xf32>
    %cst_17 = arith.constant -0.284496725 : f32
    %32 = vector.broadcast %cst_17 : f32 to vector<16x256xf32>
    %33 = arith.addf %31, %32 : vector<16x256xf32>
    %34 = arith.mulf %33, %23 : vector<16x256xf32>
    %cst_18 = arith.constant 0.254829586 : f32
    %35 = vector.broadcast %cst_18 : f32 to vector<16x256xf32>
    %36 = arith.addf %34, %35 : vector<16x256xf32>
    %37 = arith.mulf %36, %23 : vector<16x256xf32>
    %cst_19 = arith.constant 0.000000e+00 : f32
    %38 = vector.broadcast %cst_19 : f32 to vector<16x256xf32>
    %39 = arith.subf %38, %18 : vector<16x256xf32>
    %40 = arith.mulf %39, %18 : vector<16x256xf32>
    %41 = math.exp %40 : vector<16x256xf32>
    %42 = arith.mulf %37, %41 : vector<16x256xf32>
    %cst_20 = arith.constant 1.000000e+00 : f32
    %43 = vector.broadcast %cst_20 : f32 to vector<16x256xf32>
    %44 = arith.subf %43, %42 : vector<16x256xf32>
    %45 = arith.mulf %17, %44 : vector<16x256xf32>
    %cst_21 = arith.constant 1.000000e+00 : f32
    %46 = vector.broadcast %cst_21 : f32 to vector<16x256xf32>
    %47 = arith.addf %46, %45 : vector<16x256xf32>
    %48 = arith.mulf %10, %47 : vector<16x256xf32>
    %49 = vector.extract_strided_slice %7 {offsets = [0, 256], sizes = [16, 256], strides = [1, 1]} : vector<16x1664xf32> to vector<16x256xf32>
    %cst_22 = arith.constant 0.000000e+00 : f32
    %50 = vector.broadcast %cst_22 : f32 to vector<16x256xf32>
    %51 = arith.cmpf ogt, %49, %50 : vector<16x256xf32>
    %cst_23 = arith.constant 0.000000e+00 : f32
    %52 = vector.broadcast %cst_23 : f32 to vector<16x256xf32>
    %53 = arith.minimumf %49, %52 : vector<16x256xf32>
    %54 = math.exp %53 : vector<16x256xf32>
    %cst_24 = arith.constant 1.000000e+00 : f32
    %55 = vector.broadcast %cst_24 : f32 to vector<16x256xf32>
    %56 = arith.subf %54, %55 : vector<16x256xf32>
    %cst_25 = arith.constant 1.67326319 : f32
    %57 = vector.broadcast %cst_25 : f32 to vector<16x256xf32>
    %58 = arith.mulf %57, %56 : vector<16x256xf32>
    %59 = arith.select %51, %49, %58 : vector<16x256xi1>, vector<16x256xf32>
    %cst_26 = arith.constant 1.05070102 : f32
    %60 = vector.broadcast %cst_26 : f32 to vector<16x256xf32>
    %61 = arith.mulf %60, %59 : vector<16x256xf32>
    %62 = vector.extract_strided_slice %7 {offsets = [0, 512], sizes = [16, 1152], strides = [1, 1]} : vector<16x1664xf32> to vector<16x1152xf32>
    %cst_27 = arith.constant 0.000000e+00 : f32
    %63 = vector.broadcast %cst_27 : f32 to vector<16x1152xf32>
    %64 = arith.cmpf ogt, %62, %63 : vector<16x1152xf32>
    %cst_28 = arith.constant 0.000000e+00 : f32
    %65 = vector.broadcast %cst_28 : f32 to vector<16x1152xf32>
    %66 = arith.minimumf %62, %65 : vector<16x1152xf32>
    %67 = math.exp %66 : vector<16x1152xf32>
    %cst_29 = arith.constant 1.000000e+00 : f32
    %68 = vector.broadcast %cst_29 : f32 to vector<16x1152xf32>
    %69 = arith.subf %67, %68 : vector<16x1152xf32>
    %cst_30 = arith.constant 1.67326319 : f32
    %70 = vector.broadcast %cst_30 : f32 to vector<16x1152xf32>
    %71 = arith.mulf %70, %69 : vector<16x1152xf32>
    %72 = arith.select %64, %62, %71 : vector<16x1152xi1>, vector<16x1152xf32>
    %cst_31 = arith.constant 1.05070102 : f32
    %73 = vector.broadcast %cst_31 : f32 to vector<16x1152xf32>
    %74 = arith.mulf %73, %72 : vector<16x1152xf32>
    %75 = arith.truncf %48 : vector<16x256xf32> to vector<16x256xbf16>
    %c0_32 = arith.constant 0 : index
    %c0_33 = arith.constant 0 : index
    %76 = vector.load %arg4[%c0_32, %c0_33] : memref<256x128xbf16, #tpu.memory_space<vmem>>, vector<256x128xbf16>
    %cst_34 = arith.constant dense<0.000000e+00> : vector<16x128xf32>
    %77 = tpu.matmul %75, %76, %cst_34 {dimension_numbers = #tpu.dot_dimension_numbers<[1], [0], [0], [1], [0, 0, 1, 1], [], []>} : vector<16x256xbf16>, vector<256x128xbf16>, vector<16x128xf32> -> vector<16x128xf32>
    %78 = vector.extract_strided_slice %2 {offsets = [0, 0], sizes = [1, 128], strides = [1, 1]} : vector<16x512xf32> to vector<1x128xf32>
    %79 = vector.broadcast %78 : vector<1x128xf32> to vector<16x128xf32>
    %80 = arith.addf %77, %79 : vector<16x128xf32>
    %cst_35 = arith.constant 5.000000e-01 : f32
    %81 = vector.broadcast %cst_35 : f32 to vector<16x128xf32>
    %82 = arith.mulf %81, %80 : vector<16x128xf32>
    %cst_36 = arith.constant 0.707106769 : f32
    %83 = vector.broadcast %cst_36 : f32 to vector<16x128xf32>
    %84 = arith.mulf %80, %83 : vector<16x128xf32>
    %cst_37 = arith.constant 0.000000e+00 : f32
    %85 = vector.broadcast %cst_37 : f32 to vector<16x128xf32>
    %86 = arith.cmpf oge, %84, %85 : vector<16x128xf32>
    %cst_38 = arith.constant 1.000000e+00 : f32
    %cst_39 = arith.constant -1.000000e+00 : f32
    %87 = vector.broadcast %cst_38 : f32 to vector<16x128xf32>
    %88 = vector.broadcast %cst_39 : f32 to vector<16x128xf32>
    %89 = arith.select %86, %87, %88 : vector<16x128xi1>, vector<16x128xf32>
    %90 = math.absf %84 : vector<16x128xf32>
    %cst_40 = arith.constant 0.327591091 : f32
    %91 = vector.broadcast %cst_40 : f32 to vector<16x128xf32>
    %92 = arith.mulf %91, %90 : vector<16x128xf32>
    %cst_41 = arith.constant 1.000000e+00 : f32
    %93 = vector.broadcast %cst_41 : f32 to vector<16x128xf32>
    %94 = arith.addf %93, %92 : vector<16x128xf32>
    %95 = tpu.reciprocal %94 {approx = true} : vector<16x128xf32> -> vector<16x128xf32>
    %cst_42 = arith.constant 1.06140542 : f32
    %96 = vector.broadcast %cst_42 : f32 to vector<16x128xf32>
    %97 = arith.mulf %96, %95 : vector<16x128xf32>
    %cst_43 = arith.constant -1.45315206 : f32
    %98 = vector.broadcast %cst_43 : f32 to vector<16x128xf32>
    %99 = arith.addf %97, %98 : vector<16x128xf32>
    %100 = arith.mulf %99, %95 : vector<16x128xf32>
    %cst_44 = arith.constant 1.42141378 : f32
    %101 = vector.broadcast %cst_44 : f32 to vector<16x128xf32>
    %102 = arith.addf %100, %101 : vector<16x128xf32>
    %103 = arith.mulf %102, %95 : vector<16x128xf32>
    %cst_45 = arith.constant -0.284496725 : f32
    %104 = vector.broadcast %cst_45 : f32 to vector<16x128xf32>
    %105 = arith.addf %103, %104 : vector<16x128xf32>
    %106 = arith.mulf %105, %95 : vector<16x128xf32>
    %cst_46 = arith.constant 0.254829586 : f32
    %107 = vector.broadcast %cst_46 : f32 to vector<16x128xf32>
    %108 = arith.addf %106, %107 : vector<16x128xf32>
    %109 = arith.mulf %108, %95 : vector<16x128xf32>
    %cst_47 = arith.constant 0.000000e+00 : f32
    %110 = vector.broadcast %cst_47 : f32 to vector<16x128xf32>
    %111 = arith.subf %110, %90 : vector<16x128xf32>
    %112 = arith.mulf %111, %90 : vector<16x128xf32>
    %113 = math.exp %112 : vector<16x128xf32>
    %114 = arith.mulf %109, %113 : vector<16x128xf32>
    %cst_48 = arith.constant 1.000000e+00 : f32
    %115 = vector.broadcast %cst_48 : f32 to vector<16x128xf32>
    %116 = arith.subf %115, %114 : vector<16x128xf32>
    %117 = arith.mulf %89, %116 : vector<16x128xf32>
    %cst_49 = arith.constant 1.000000e+00 : f32
    %118 = vector.broadcast %cst_49 : f32 to vector<16x128xf32>
    %119 = arith.addf %118, %117 : vector<16x128xf32>
    %120 = arith.mulf %82, %119 : vector<16x128xf32>
    %121 = arith.truncf %120 : vector<16x128xf32> to vector<16x128xbf16>
    %122 = arith.truncf %74 : vector<16x1152xf32> to vector<16x1152xbf16>
    %c0_50 = arith.constant 0 : index
    %c0_51 = arith.constant 0 : index
    %123 = vector.load %arg5[%c0_50, %c0_51] : memref<1152x128xbf16, #tpu.memory_space<vmem>>, vector<1152x128xbf16>
    %cst_52 = arith.constant dense<0.000000e+00> : vector<16x128xf32>
    %124 = tpu.matmul %122, %123, %cst_52 {dimension_numbers = #tpu.dot_dimension_numbers<[1], [0], [0], [1], [0, 0, 1, 1], [], []>} : vector<16x1152xbf16>, vector<1152x128xbf16>, vector<16x128xf32> -> vector<16x128xf32>
    %125 = vector.extract_strided_slice %2 {offsets = [1, 0], sizes = [1, 128], strides = [1, 1]} : vector<16x512xf32> to vector<1x128xf32>
    %126 = vector.broadcast %125 : vector<1x128xf32> to vector<16x128xf32>
    %127 = arith.addf %124, %126 : vector<16x128xf32>
    %cst_53 = arith.constant 0.000000e+00 : f32
    %128 = vector.broadcast %cst_53 : f32 to vector<16x128xf32>
    %129 = arith.cmpf ogt, %127, %128 : vector<16x128xf32>
    %cst_54 = arith.constant 0.000000e+00 : f32
    %130 = vector.broadcast %cst_54 : f32 to vector<16x128xf32>
    %131 = arith.minimumf %127, %130 : vector<16x128xf32>
    %132 = math.exp %131 : vector<16x128xf32>
    %cst_55 = arith.constant 1.000000e+00 : f32
    %133 = vector.broadcast %cst_55 : f32 to vector<16x128xf32>
    %134 = arith.subf %132, %133 : vector<16x128xf32>
    %cst_56 = arith.constant 1.67326319 : f32
    %135 = vector.broadcast %cst_56 : f32 to vector<16x128xf32>
    %136 = arith.mulf %135, %134 : vector<16x128xf32>
    %137 = arith.select %129, %127, %136 : vector<16x128xi1>, vector<16x128xf32>
    %cst_57 = arith.constant 1.05070102 : f32
    %138 = vector.broadcast %cst_57 : f32 to vector<16x128xf32>
    %139 = arith.mulf %138, %137 : vector<16x128xf32>
    %140 = arith.truncf %61 : vector<16x256xf32> to vector<16x256xbf16>
    %c0_58 = arith.constant 0 : index
    %c0_59 = arith.constant 0 : index
    %141 = vector.load %arg6[%c0_58, %c0_59] : memref<256x128xbf16, #tpu.memory_space<vmem>>, vector<256x128xbf16>
    %cst_60 = arith.constant dense<0.000000e+00> : vector<16x128xf32>
    %142 = tpu.matmul %140, %141, %cst_60 {dimension_numbers = #tpu.dot_dimension_numbers<[1], [0], [0], [1], [0, 0, 1, 1], [], []>} : vector<16x256xbf16>, vector<256x128xbf16>, vector<16x128xf32> -> vector<16x128xf32>
    %143 = vector.extract_strided_slice %2 {offsets = [2, 0], sizes = [1, 128], strides = [1, 1]} : vector<16x512xf32> to vector<1x128xf32>
    %144 = vector.broadcast %143 : vector<1x128xf32> to vector<16x128xf32>
    %145 = arith.addf %142, %144 : vector<16x128xf32>
    %cst_61 = arith.constant 0.000000e+00 : f32
    %146 = vector.broadcast %cst_61 : f32 to vector<16x128xf32>
    %147 = arith.cmpf ogt, %145, %146 : vector<16x128xf32>
    %cst_62 = arith.constant 0.000000e+00 : f32
    %148 = vector.broadcast %cst_62 : f32 to vector<16x128xf32>
    %149 = arith.minimumf %145, %148 : vector<16x128xf32>
    %150 = math.exp %149 : vector<16x128xf32>
    %cst_63 = arith.constant 1.000000e+00 : f32
    %151 = vector.broadcast %cst_63 : f32 to vector<16x128xf32>
    %152 = arith.subf %150, %151 : vector<16x128xf32>
    %cst_64 = arith.constant 1.67326319 : f32
    %153 = vector.broadcast %cst_64 : f32 to vector<16x128xf32>
    %154 = arith.mulf %153, %152 : vector<16x128xf32>
    %155 = arith.select %147, %145, %154 : vector<16x128xi1>, vector<16x128xf32>
    %cst_65 = arith.constant 1.05070102 : f32
    %156 = vector.broadcast %cst_65 : f32 to vector<16x128xf32>
    %157 = arith.mulf %156, %155 : vector<16x128xf32>
    %158 = arith.truncf %139 : vector<16x128xf32> to vector<16x128xbf16>
    %159 = arith.truncf %157 : vector<16x128xf32> to vector<16x128xbf16>
    %160 = tpu.concatenate %121, %158, %159 in 1 : vector<16x128xbf16>, vector<16x128xbf16>, vector<16x128xbf16> -> vector<16x384xbf16>
    %c0_66 = arith.constant 0 : index
    %c0_67 = arith.constant 0 : index
    %161 = vector.load %arg7[%c0_66, %c0_67] : memref<384x512xbf16, #tpu.memory_space<vmem>>, vector<384x512xbf16>
    %cst_68 = arith.constant dense<0.000000e+00> : vector<16x512xf32>
    %162 = tpu.matmul %160, %161, %cst_68 {dimension_numbers = #tpu.dot_dimension_numbers<[1], [0], [0], [1], [0, 0, 1, 1], [], []>} : vector<16x384xbf16>, vector<384x512xbf16>, vector<16x512xf32> -> vector<16x512xf32>
    %163 = vector.extract_strided_slice %2 {offsets = [3, 0], sizes = [1, 512], strides = [1, 1]} : vector<16x512xf32> to vector<1x512xf32>
    %164 = vector.broadcast %163 : vector<1x512xf32> to vector<16x512xf32>
    %165 = arith.addf %162, %164 : vector<16x512xf32>
    %cst_69 = arith.constant 5.000000e-01 : f32
    %166 = vector.broadcast %cst_69 : f32 to vector<16x512xf32>
    %167 = arith.mulf %166, %165 : vector<16x512xf32>
    %cst_70 = arith.constant 0.707106769 : f32
    %168 = vector.broadcast %cst_70 : f32 to vector<16x512xf32>
    %169 = arith.mulf %165, %168 : vector<16x512xf32>
    %cst_71 = arith.constant 0.000000e+00 : f32
    %170 = vector.broadcast %cst_71 : f32 to vector<16x512xf32>
    %171 = arith.cmpf oge, %169, %170 : vector<16x512xf32>
    %cst_72 = arith.constant 1.000000e+00 : f32
    %cst_73 = arith.constant -1.000000e+00 : f32
    %172 = vector.broadcast %cst_72 : f32 to vector<16x512xf32>
    %173 = vector.broadcast %cst_73 : f32 to vector<16x512xf32>
    %174 = arith.select %171, %172, %173 : vector<16x512xi1>, vector<16x512xf32>
    %175 = math.absf %169 : vector<16x512xf32>
    %cst_74 = arith.constant 0.327591091 : f32
    %176 = vector.broadcast %cst_74 : f32 to vector<16x512xf32>
    %177 = arith.mulf %176, %175 : vector<16x512xf32>
    %cst_75 = arith.constant 1.000000e+00 : f32
    %178 = vector.broadcast %cst_75 : f32 to vector<16x512xf32>
    %179 = arith.addf %178, %177 : vector<16x512xf32>
    %180 = tpu.reciprocal %179 {approx = true} : vector<16x512xf32> -> vector<16x512xf32>
    %cst_76 = arith.constant 1.06140542 : f32
    %181 = vector.broadcast %cst_76 : f32 to vector<16x512xf32>
    %182 = arith.mulf %181, %180 : vector<16x512xf32>
    %cst_77 = arith.constant -1.45315206 : f32
    %183 = vector.broadcast %cst_77 : f32 to vector<16x512xf32>
    %184 = arith.addf %182, %183 : vector<16x512xf32>
    %185 = arith.mulf %184, %180 : vector<16x512xf32>
    %cst_78 = arith.constant 1.42141378 : f32
    %186 = vector.broadcast %cst_78 : f32 to vector<16x512xf32>
    %187 = arith.addf %185, %186 : vector<16x512xf32>
    %188 = arith.mulf %187, %180 : vector<16x512xf32>
    %cst_79 = arith.constant -0.284496725 : f32
    %189 = vector.broadcast %cst_79 : f32 to vector<16x512xf32>
    %190 = arith.addf %188, %189 : vector<16x512xf32>
    %191 = arith.mulf %190, %180 : vector<16x512xf32>
    %cst_80 = arith.constant 0.254829586 : f32
    %192 = vector.broadcast %cst_80 : f32 to vector<16x512xf32>
    %193 = arith.addf %191, %192 : vector<16x512xf32>
    %194 = arith.mulf %193, %180 : vector<16x512xf32>
    %cst_81 = arith.constant 0.000000e+00 : f32
    %195 = vector.broadcast %cst_81 : f32 to vector<16x512xf32>
    %196 = arith.subf %195, %175 : vector<16x512xf32>
    %197 = arith.mulf %196, %175 : vector<16x512xf32>
    %198 = math.exp %197 : vector<16x512xf32>
    %199 = arith.mulf %194, %198 : vector<16x512xf32>
    %cst_82 = arith.constant 1.000000e+00 : f32
    %200 = vector.broadcast %cst_82 : f32 to vector<16x512xf32>
    %201 = arith.subf %200, %199 : vector<16x512xf32>
    %202 = arith.mulf %174, %201 : vector<16x512xf32>
    %cst_83 = arith.constant 1.000000e+00 : f32
    %203 = vector.broadcast %cst_83 : f32 to vector<16x512xf32>
    %204 = arith.addf %203, %202 : vector<16x512xf32>
    %205 = arith.mulf %167, %204 : vector<16x512xf32>
    %206 = arith.truncf %205 : vector<16x512xf32> to vector<16x512xbf16>
    %c0_84 = arith.constant 0 : index
    %c0_85 = arith.constant 0 : index
    %207 = vector.load %arg8[%c0_84, %c0_85] : memref<512x256xbf16, #tpu.memory_space<vmem>>, vector<512x256xbf16>
    %cst_86 = arith.constant dense<0.000000e+00> : vector<16x256xf32>
    %208 = tpu.matmul %206, %207, %cst_86 {dimension_numbers = #tpu.dot_dimension_numbers<[1], [0], [0], [1], [0, 0, 1, 1], [], []>} : vector<16x512xbf16>, vector<512x256xbf16>, vector<16x256xf32> -> vector<16x256xf32>
    %209 = vector.extract_strided_slice %2 {offsets = [4, 0], sizes = [1, 256], strides = [1, 1]} : vector<16x512xf32> to vector<1x256xf32>
    %210 = vector.broadcast %209 : vector<1x256xf32> to vector<16x256xf32>
    %211 = arith.addf %208, %210 : vector<16x256xf32>
    %cst_87 = arith.constant 5.000000e-01 : f32
    %212 = vector.broadcast %cst_87 : f32 to vector<16x256xf32>
    %213 = arith.mulf %212, %211 : vector<16x256xf32>
    %cst_88 = arith.constant 0.707106769 : f32
    %214 = vector.broadcast %cst_88 : f32 to vector<16x256xf32>
    %215 = arith.mulf %211, %214 : vector<16x256xf32>
    %cst_89 = arith.constant 0.000000e+00 : f32
    %216 = vector.broadcast %cst_89 : f32 to vector<16x256xf32>
    %217 = arith.cmpf oge, %215, %216 : vector<16x256xf32>
    %cst_90 = arith.constant 1.000000e+00 : f32
    %cst_91 = arith.constant -1.000000e+00 : f32
    %218 = vector.broadcast %cst_90 : f32 to vector<16x256xf32>
    %219 = vector.broadcast %cst_91 : f32 to vector<16x256xf32>
    %220 = arith.select %217, %218, %219 : vector<16x256xi1>, vector<16x256xf32>
    %221 = math.absf %215 : vector<16x256xf32>
    %cst_92 = arith.constant 0.327591091 : f32
    %222 = vector.broadcast %cst_92 : f32 to vector<16x256xf32>
    %223 = arith.mulf %222, %221 : vector<16x256xf32>
    %cst_93 = arith.constant 1.000000e+00 : f32
    %224 = vector.broadcast %cst_93 : f32 to vector<16x256xf32>
    %225 = arith.addf %224, %223 : vector<16x256xf32>
    %226 = tpu.reciprocal %225 {approx = true} : vector<16x256xf32> -> vector<16x256xf32>
    %cst_94 = arith.constant 1.06140542 : f32
    %227 = vector.broadcast %cst_94 : f32 to vector<16x256xf32>
    %228 = arith.mulf %227, %226 : vector<16x256xf32>
    %cst_95 = arith.constant -1.45315206 : f32
    %229 = vector.broadcast %cst_95 : f32 to vector<16x256xf32>
    %230 = arith.addf %228, %229 : vector<16x256xf32>
    %231 = arith.mulf %230, %226 : vector<16x256xf32>
    %cst_96 = arith.constant 1.42141378 : f32
    %232 = vector.broadcast %cst_96 : f32 to vector<16x256xf32>
    %233 = arith.addf %231, %232 : vector<16x256xf32>
    %234 = arith.mulf %233, %226 : vector<16x256xf32>
    %cst_97 = arith.constant -0.284496725 : f32
    %235 = vector.broadcast %cst_97 : f32 to vector<16x256xf32>
    %236 = arith.addf %234, %235 : vector<16x256xf32>
    %237 = arith.mulf %236, %226 : vector<16x256xf32>
    %cst_98 = arith.constant 0.254829586 : f32
    %238 = vector.broadcast %cst_98 : f32 to vector<16x256xf32>
    %239 = arith.addf %237, %238 : vector<16x256xf32>
    %240 = arith.mulf %239, %226 : vector<16x256xf32>
    %cst_99 = arith.constant 0.000000e+00 : f32
    %241 = vector.broadcast %cst_99 : f32 to vector<16x256xf32>
    %242 = arith.subf %241, %221 : vector<16x256xf32>
    %243 = arith.mulf %242, %221 : vector<16x256xf32>
    %244 = math.exp %243 : vector<16x256xf32>
    %245 = arith.mulf %240, %244 : vector<16x256xf32>
    %cst_100 = arith.constant 1.000000e+00 : f32
    %246 = vector.broadcast %cst_100 : f32 to vector<16x256xf32>
    %247 = arith.subf %246, %245 : vector<16x256xf32>
    %248 = arith.mulf %220, %247 : vector<16x256xf32>
    %cst_101 = arith.constant 1.000000e+00 : f32
    %249 = vector.broadcast %cst_101 : f32 to vector<16x256xf32>
    %250 = arith.addf %249, %248 : vector<16x256xf32>
    %251 = arith.mulf %213, %250 : vector<16x256xf32>
    %252 = vector.extract_strided_slice %2 {offsets = [5, 0], sizes = [1, 256], strides = [1, 1]} : vector<16x512xf32> to vector<1x256xf32>
    %253 = vector.broadcast %252 : vector<1x256xf32> to vector<16x256xf32>
    %254 = arith.mulf %251, %253 : vector<16x256xf32>
    %255 = vector.extract_strided_slice %2 {offsets = [6, 0], sizes = [1, 256], strides = [1, 1]} : vector<16x512xf32> to vector<1x256xf32>
    %256 = vector.broadcast %255 : vector<1x256xf32> to vector<16x256xf32>
    %257 = arith.addf %254, %256 : vector<16x256xf32>
    %258 = vector.extract_strided_slice %257 {offsets = [0, 0], sizes = [16, 128], strides = [1, 1]} : vector<16x256xf32> to vector<16x128xf32>
    %259 = tpu.iota {dimensions = array<i32: 1>} : vector<16x128xi32>
    %c4_i32 = arith.constant 4 : i32
    %260 = vector.broadcast %c4_i32 : i32 to vector<16x128xi32>
    %261 = arith.cmpi slt, %259, %260 : vector<16x128xi32>
    %cst_102 = arith.constant -1.000000e+30 : f32
    %262 = vector.broadcast %cst_102 : f32 to vector<16x128xf32>
    %263 = arith.select %261, %258, %262 : vector<16x128xi1>, vector<16x128xf32>
    %cst_103 = arith.constant dense<0xFF800000> : vector<16xf32>
    %264 = vector.multi_reduction <maximumf>, %263, %cst_103 [1] : vector<16x128xf32> to vector<16xf32>
    %265 = vector.shape_cast %264 : vector<16xf32> to vector<16x1xf32>
    %266 = vector.broadcast %265 : vector<16x1xf32> to vector<16x128xf32>
    %267 = arith.subf %258, %266 : vector<16x128xf32>
    %cst_104 = arith.constant 0.000000e+00 : f32
    %268 = vector.broadcast %cst_104 : f32 to vector<16x128xf32>
    %269 = arith.select %261, %267, %268 : vector<16x128xi1>, vector<16x128xf32>
    %270 = math.exp %269 : vector<16x128xf32>
    %cst_105 = arith.constant 0.000000e+00 : f32
    %271 = vector.broadcast %cst_105 : f32 to vector<16x128xf32>
    %272 = arith.select %261, %270, %271 : vector<16x128xi1>, vector<16x128xf32>
    %cst_106 = arith.constant dense<0.000000e+00> : vector<16xf32>
    %273 = vector.multi_reduction <add>, %272, %cst_106 [1] : vector<16x128xf32> to vector<16xf32>
    %274 = vector.shape_cast %273 : vector<16xf32> to vector<16x1xf32>
    %275 = arith.mulf %272, %269 : vector<16x128xf32>
    %cst_107 = arith.constant dense<0.000000e+00> : vector<16xf32>
    %276 = vector.multi_reduction <add>, %275, %cst_107 [1] : vector<16x128xf32> to vector<16xf32>
    %277 = vector.shape_cast %276 : vector<16xf32> to vector<16x1xf32>
    %278 = vector.extract_strided_slice %2 {offsets = [8, 0], sizes = [1, 1], strides = [1, 1]} : vector<16x512xf32> to vector<1x1xf32>
    %279 = math.log %274 : vector<16x1xf32>
    %280 = tpu.reciprocal %274 {approx = true} : vector<16x1xf32> -> vector<16x1xf32>
    %281 = arith.mulf %277, %280 : vector<16x1xf32>
    %282 = arith.subf %279, %281 : vector<16x1xf32>
    %283 = vector.broadcast %278 : vector<1x1xf32> to vector<16x1xf32>
    %284 = arith.mulf %283, %282 : vector<16x1xf32>
    %285 = vector.extract_strided_slice %2 {offsets = [7, 0], sizes = [1, 256], strides = [1, 1]} : vector<16x512xf32> to vector<1x256xf32>
    %286 = vector.broadcast %285 : vector<1x256xf32> to vector<16x256xf32>
    %287 = arith.mulf %286, %257 : vector<16x256xf32>
    %cst_108 = arith.constant dense<0.000000e+00> : vector<16xf32>
    %288 = vector.multi_reduction <add>, %287, %cst_108 [1] : vector<16x256xf32> to vector<16xf32>
    %289 = vector.shape_cast %288 : vector<16xf32> to vector<16x1xf32>
    %290 = arith.addf %284, %289 : vector<16x1xf32>
    %291 = vector.extract_strided_slice %2 {offsets = [10, 0], sizes = [1, 384], strides = [1, 1]} : vector<16x512xf32> to vector<1x384xf32>
    %292 = vector.broadcast %290 : vector<16x1xf32> to vector<16x384xf32>
    %293 = vector.broadcast %291 : vector<1x384xf32> to vector<16x384xf32>
    %294 = arith.mulf %292, %293 : vector<16x384xf32>
    %c0_109 = arith.constant 0 : index
    %c0_110 = arith.constant 0 : index
    %295 = vector.load %arg9[%c0_109, %c0_110] : memref<128x384xbf16, #tpu.memory_space<vmem>>, vector<128x384xbf16>
    %cst_111 = arith.constant dense<0.000000e+00> : vector<16x384xf32>
    %296 = tpu.matmul %121, %295, %cst_111 {dimension_numbers = #tpu.dot_dimension_numbers<[1], [0], [0], [1], [0, 0, 1, 1], [], []>} : vector<16x128xbf16>, vector<128x384xbf16>, vector<16x384xf32> -> vector<16x384xf32>
    %297 = arith.addf %294, %296 : vector<16x384xf32>
    %298 = vector.extract_strided_slice %2 {offsets = [9, 0], sizes = [1, 384], strides = [1, 1]} : vector<16x512xf32> to vector<1x384xf32>
    %299 = vector.broadcast %298 : vector<1x384xf32> to vector<16x384xf32>
    %300 = arith.addf %297, %299 : vector<16x384xf32>
    %cst_112 = arith.constant 5.000000e-01 : f32
    %301 = vector.broadcast %cst_112 : f32 to vector<16x384xf32>
    %302 = arith.mulf %301, %300 : vector<16x384xf32>
    %303 = math.tanh %302 : vector<16x384xf32>
    %cst_113 = arith.constant 1.000000e+00 : f32
    %304 = vector.broadcast %cst_113 : f32 to vector<16x384xf32>
    %305 = arith.addf %303, %304 : vector<16x384xf32>
    %cst_114 = arith.constant 5.000000e-01 : f32
    %306 = vector.broadcast %cst_114 : f32 to vector<16x384xf32>
    %307 = arith.mulf %306, %305 : vector<16x384xf32>
    %308 = vector.extract_strided_slice %2 {offsets = [11, 0], sizes = [1, 384], strides = [1, 1]} : vector<16x512xf32> to vector<1x384xf32>
    %309 = vector.broadcast %308 : vector<1x384xf32> to vector<16x384xf32>
    %310 = arith.mulf %307, %309 : vector<16x384xf32>
    %cst_115 = arith.constant dense<0.000000e+00> : vector<16xf32>
    %311 = vector.multi_reduction <add>, %310, %cst_115 [1] : vector<16x384xf32> to vector<16xf32>
    %312 = vector.shape_cast %311 : vector<16xf32> to vector<16x1xf32>
    %313 = vector.extract_strided_slice %2 {offsets = [12, 0], sizes = [1, 1], strides = [1, 1]} : vector<16x512xf32> to vector<1x1xf32>
    %314 = vector.broadcast %313 : vector<1x1xf32> to vector<16x1xf32>
    %315 = arith.addf %312, %314 : vector<16x1xf32>
    %316 = vector.shape_cast %315 : vector<16x1xf32> to vector<16x1xf32>
    %317 = vector.broadcast %316 : vector<16x1xf32> to vector<16x128xf32>
    %c0_116 = arith.constant 0 : index
    %c0_117 = arith.constant 0 : index
    %318 = vector.load %arg11[%c0_116, %c0_117] : memref<16x128xf32, #tpu.memory_space<vmem>>, vector<16x128xf32>
    tpu.vector_store %arg11[%c0_116, %c0_117], %317 {strides = array<i32>} : memref<16x128xf32, #tpu.memory_space<vmem>>, vector<16x128xf32>,
    return
  }
  func.func @transform_0(%arg0: i32) -> (i32, i32) {
    %c0_i32 = arith.constant 0 : i32
    %c0_i32_0 = arith.constant 0 : i32
    return %arg0, %c0_i32 : i32, i32
  }
  func.func @transform_1(%arg0: i32) -> (i32, i32) {
    %c0_i32 = arith.constant 0 : i32
    %c0_i32_0 = arith.constant 0 : i32
    %c0_i32_1 = arith.constant 0 : i32
    return %c0_i32, %c0_i32_0 : i32, i32
  }
  func.func @transform_2(%arg0: i32) -> (i32, i32) {
    %c0_i32 = arith.constant 0 : i32
    %c0_i32_0 = arith.constant 0 : i32
    %c0_i32_1 = arith.constant 0 : i32
    return %c0_i32, %c0_i32_0 : i32, i32
  }
  func.func @transform_3(%arg0: i32) -> (i32, i32) {
    %c0_i32 = arith.constant 0 : i32
    %c0_i32_0 = arith.constant 0 : i32
    %c0_i32_1 = arith.constant 0 : i32
    return %c0_i32, %c0_i32_0 : i32, i32
  }
  func.func @transform_4(%arg0: i32) -> (i32, i32) {
    %c0_i32 = arith.constant 0 : i32
    %c0_i32_0 = arith.constant 0 : i32
    %c0_i32_1 = arith.constant 0 : i32
    return %c0_i32, %c0_i32_0 : i32, i32
  }
  func.func @transform_5(%arg0: i32) -> (i32, i32) {
    %c0_i32 = arith.constant 0 : i32
    %c0_i32_0 = arith.constant 0 : i32
    %c0_i32_1 = arith.constant 0 : i32
    return %c0_i32, %c0_i32_0 : i32, i32
  }
  func.func @transform_6(%arg0: i32) -> (i32, i32) {
    %c0_i32 = arith.constant 0 : i32
    %c0_i32_0 = arith.constant 0 : i32
    %c0_i32_1 = arith.constant 0 : i32
    return %c0_i32, %c0_i32_0 : i32, i32
  }
  func.func @transform_7(%arg0: i32) -> (i32, i32) {
    %c0_i32 = arith.constant 0 : i32
    %c0_i32_0 = arith.constant 0 : i32
    %c0_i32_1 = arith.constant 0 : i32
    return %c0_i32, %c0_i32_0 : i32, i32
  }
  func.func @transform_8(%arg0: i32) -> (i32, i32) {
    %c0_i32 = arith.constant 0 : i32
    %c0_i32_0 = arith.constant 0 : i32
    %c0_i32_1 = arith.constant 0 : i32
    return %c0_i32, %c0_i32_0 : i32, i32
  }
  func.func @transform_9(%arg0: i32) -> (i32, i32) {
    %c0_i32 = arith.constant 0 : i32
    %c0_i32_0 = arith.constant 0 : i32
    %c0_i32_1 = arith.constant 0 : i32
    return %c0_i32, %c0_i32_0 : i32, i32
  }
  func.func @transform_10(%arg0: i32) -> (i32, i32) {
    %c0_i32 = arith.constant 0 : i32
    %c0_i32_0 = arith.constant 0 : i32
    return %arg0, %c0_i32 : i32, i32
  }
}

</mosaic_0001>

<bundles_post_ra>
// kernel: tpu_custom_call.1
= control target key start
LH: loop header
LB: loop body
LE: loop exit
PB: predicated region body
PF: predicated region fallthrough
CT: control target
= control target key end

     0   :  { %15 = vsyncpa [#allocation3], 0  ;;  %s6948_s0 = inlined_call_operand.hbm [shape: f32[16,36], index: 0, kind: input, shape index: {}]   ;;  %s6949_s1 = inlined_call_operand.hbm [shape: bf16[36,1664], index: 1, kind: input, shape index: {}]   ;;  %s6950_s2 = inlined_call_operand.hbm [shape: f32[1,1664], index: 2, kind: input, shape index: {}]   ;;  %s6951_s3 = inlined_call_operand.hbm [shape: bf16[256,128], index: 3, kind: input, shape index: {}]   ;;  %s6952_s4 = inlined_call_operand.hbm [shape: bf16[1152,128], index: 4, kind: input, shape index: {}]   ;;  %s6953_s5 = inlined_call_operand.hbm [shape: bf16[256,128], index: 5, kind: input, shape index: {}]   ;;  %s6954_s6 = inlined_call_operand.hbm [shape: bf16[384,512], index: 6, kind: input, shape index: {}]   ;;  %s6955_s7 = inlined_call_operand.hbm [shape: bf16[512,256], index: 7, kind: input, shape index: {}]   ;;  %s6956_s8 = inlined_call_operand.hbm [shape: bf16[128,384], index: 8, kind: input, shape index: {}]   ;;  %s6957_s9 = inlined_call_operand.hbm [shape: f32[16,512], index: 9, kind: input, shape index: {}]   ;;  %s6958_s10 = inlined_call_operand.hbm [shape: f32[16,128], index: 10, kind: output, shape index: {}]  }
   0x1   :  { %16 = vsyncpa [#allocation6], 0 }
   0x2   :  { %17 = vsyncpa [#allocation9], 0 }
   0x3   :  { %18 = vsyncpa [#allocation12], 0 }
   0x4   :  { %19 = vsyncpa [#allocation15], 0 }
   0x5   :  { %20 = vsyncpa [#allocation18], 0  ;;  %s39_s15 = sshll.u32 %s6949_s1, 4  ;;  %s40_s15 = int_to_ptr.hbm [resolvable:$true] %s39_s15 }
   0x6   :  { %21 = vsyncpa [#allocation4], 0  ;;  %s6087_s16 = smov [#allocation5]   ;;  %s63_s20 = sshll.u32 %s6951_s3, 4  ;;  %s64_s20 = int_to_ptr.hbm [resolvable:$true] %s63_s20 }
   0x7   :  { %s41_s17 = sshll.u32 %s6087_s16, 4  ;;  %s6088_s21 = smov 832   ;;  %s42_s17 = int_to_ptr.vmem [resolvable:$true] %s41_s17 }
   0x8   :  { %s6089_s22 = smov 52   ;;  %s6090_s23 = smov [#allocation8]  }
   0x9   :  { %47 = dma.hbm_to_vmem [thread:$0]  %s40_s15, 4160, %s42_s17, [#allocation6], %s6088_s21, %s6088_s21, %s6089_s22  }
   0xa   :  { %s65_s24 = sshll.u32 %s6090_s23, 4  ;;  %s6091_s25 = smov 64   ;;  %s66_s24 = int_to_ptr.vmem [resolvable:$true] %s65_s24 }
   0xb   :  { %s6092_s26 = smov 4   ;;  %s89_s28 = sshll.u32 %s6953_s5, 4  ;;  %s90_s28 = int_to_ptr.hbm [resolvable:$true] %s89_s28 }
   0xc   :  { %71 = dma.hbm_to_vmem [thread:$0]  %s64_s20, 2048, %s66_s24, [#allocation9], %s6091_s25, %s6091_s25, %s6092_s26  }
   0xd   :  { %s6093_s29 = smov [#allocation11]   ;;  %s115_s12 = sshll.u32 %s6955_s7, 4  ;;  %s116_s12 = int_to_ptr.hbm [resolvable:$true] %s115_s12 }
   0xe   :  { %s91_s3 = sshll.u32 %s6093_s29, 4  ;;  %s6094_s13 = smov [#allocation14]   ;;  %s92_s3 = int_to_ptr.vmem [resolvable:$true] %s91_s3 }
   0xf   :  { %97 = dma.hbm_to_vmem [thread:$0]  %s90_s28, 2048, %s92_s3, [#allocation12], %s6091_s25, %s6091_s25, %s6092_s26  }
  0x10   :  { %s117_s14 = sshll.u32 %s6094_s13, 4  ;;  %s26_s17 = sshll.u32 %s6948_s0, 4  ;;  %s118_s14 = int_to_ptr.vmem [resolvable:$true] %s117_s14  ;;  %s27_s17 = int_to_ptr.hbm [resolvable:$true] %s26_s17 }
  0x11   :  { %s6095_s5 = smov 128   ;;  %s6096_s18 = smov 8  }
  0x12   :  { %123 = dma.hbm_to_vmem [thread:$0]  %s116_s12, 8192, %s118_s14, [#allocation15], %s6095_s5, %s6095_s5, %s6096_s18  }
  0x13   :  { %s53_s21 = sshll.u32 %s6950_s2, 4  ;;  %s6097_s7 = smov [#allocation2]   ;;  %s54_s21 = int_to_ptr.hbm [resolvable:$true] %s53_s21 }
  0x14   :  { %s28_s22 = sshll.u32 %s6097_s7, 4  ;;  %s6098_s0 = smov [#allocation7]   ;;  %s29_s22 = int_to_ptr.vmem [resolvable:$true] %s28_s22 }
  0x15   :  { %34 = dma.hbm_to_vmem [thread:$0]  %s27_s17, 256, %s29_s22, [#allocation3], %s6095_s5, %s6095_s5, %s6096_s18  }
  0x16   :  { %s55_s23 = sshll.u32 %s6098_s0, 4  ;;  %s76_s27 = sshll.u32 %s6952_s4, 4  ;;  %s56_s23 = int_to_ptr.vmem [resolvable:$true] %s55_s23  ;;  %s77_s27 = int_to_ptr.hbm [resolvable:$true] %s76_s27 }
  0x17   :  { %58 = dma.hbm_to_vmem [thread:$0]  %s54_s21, 208, %s56_s23, [#allocation6]  }
  0x18   :  { %s102_s2 = sshll.u32 %s6954_s6, 4  ;;  %s6099_s3 = smov [#allocation10]   ;;  %s103_s2 = int_to_ptr.hbm [resolvable:$true] %s102_s2 }
  0x19   :  { %s78_s30 = sshll.u32 %s6099_s3, 4  ;;  %s6100_s11 = smov [#allocation13]   ;;  %s79_s30 = int_to_ptr.vmem [resolvable:$true] %s78_s30 }
  0x1a   :  { %84 = dma.hbm_to_vmem [thread:$0]  %s77_s27, 9216, %s79_s30, [#allocation9], %s6091_s25, %s6091_s25, %s6092_s26  }
  0x1b   :  { %s104_s12 = sshll.u32 %s6100_s11, 4  ;;  %s6101_s13 = smov 256   ;;  %s105_s12 = int_to_ptr.vmem [resolvable:$true] %s104_s12 }
  0x1c   :  { %s6102_s4 = smov 16   ;;  %s128_s16 = sshll.u32 %s6956_s8, 4  ;;  %s129_s16 = int_to_ptr.hbm [resolvable:$true] %s128_s16 }
  0x1d   :  { %110 = dma.hbm_to_vmem [thread:$0]  %s103_s2, 12288, %s105_s12, [#allocation12], %s6101_s13, %s6101_s13, %s6102_s4  }
  0x1e   :  { %s6103_s6 = smov [#allocation16]   ;;  %s141_s21 = sshll.u32 %s6957_s9, 4  ;;  %s142_s21 = int_to_ptr.hbm [resolvable:$true] %s141_s21 }
  0x1f   :  { %s130_s17 = sshll.u32 %s6103_s6, 4  ;;  %s6104_s7 = smov 192   ;;  %s131_s17 = int_to_ptr.vmem [resolvable:$true] %s130_s17 }
  0x20   :  { %s6105_s25 = smov 12   ;;  %s6106_s26 = smov [#allocation17]  }
  0x21   :  { %136 = dma.hbm_to_vmem [thread:$0]  %s129_s16, 3072, %s131_s17, [#allocation15], %s6104_s7, %s6104_s7, %s6105_s25  }
  0x22   :  { %s143_s22 = sshll.u32 %s6106_s26, 4  ;;  %s6107_s0 = smov 512   ;;  %s144_s22 = int_to_ptr.vmem [resolvable:$true] %s143_s22 }
  0x23   :  { %s6108_s23 = smov 32  }
  0x24   :  { %149 = dma.hbm_to_vmem [thread:$0]  %s142_s21, 1024, %s144_s22, [#allocation18], %s6107_s0, %s6107_s0, %s6108_s23  }
  0x25   :  { %6073 = dma.done.wait [#allocation3], 256  }
  0x26   :  { %6074 = vsyncadd [#allocation3], 4294967040 }
  0x27   :  { %6075 = dma.done.wait [#allocation6], 4368  }
  0x28   :  { %6076 = vsyncadd [#allocation6], 4294962928 }
  0x29   :  { %6077 = dma.done.wait [#allocation9], 11264  }
  0x2a   :  { %6078 = vsyncadd [#allocation9], 4294956032 }
  0x2b   :  { %6079 = dma.done.wait [#allocation12], 14336  }
  0x2c   :  { %6080 = vsyncadd [#allocation12], 4294952960 }
  0x2d   :  { %6081 = dma.done.wait [#allocation15], 11264  }
  0x2e   :  { %6082 = vsyncadd [#allocation15], 4294956032 }
  0x2f   :  { %6083 = dma.done.wait [#allocation18], 1024  }
  0x30   :  { %6084 = vsyncadd [#allocation18], 4294966272  ;;  %v229_v0 = vld [vmem:[#allocation5 + $0xd0] sm:$0x33]  ;;  %vm435_vm0 = vcmask 1041408   ;;  %v192_v33 = vld [vmem:[#allocation2 + $0x8] sm:$0xff] }
  0x31   :  { %v353_v1 = vunpack.c.l.b16 %v229_v0  ;;  %v354_v2 = vunpack.c.h.b16 %v229_v0  ;;  %v4075_v3 = vld [vmem:[#allocation5 + $0x68] sm:$0xf]  ;;  %v5335_v4 = vld [vmem:[#allocation5 + $0x98] sm:$0xf0]  ;;  %v5329_v7 = vld [vmem:[#allocation5 + $0x6c] sm:$0xf] }
  0x32   :  { %v4077_v8 = vld [vmem:[#allocation5 + $0x9c] sm:$0xf0]  ;;  %v230_v9 = vld [vmem:[#allocation5 + $0xd8] sm:$0x33]  ;;  %v4076_v15 = vor.u32 %v5335_v4, %v4075_v3  ;;  %v5322_v16 = vld [vmem:[#allocation5 + $0x30] sm:$0xf0] }
  0x33   :  { %v392_v5 = vpack.c.b16 %v353_v1, %v353_v1  ;;  %v393_v6 = vpack.c.b16 %v354_v2, %v354_v2  ;;  %v4023_v10 = vld [vmem:[#allocation5] sm:$0xf]  ;;  %v355_v11 = vunpack.c.l.b16 %v230_v9  ;;  %v356_v12 = vunpack.c.h.b16 %v230_v9  ;;  %v4083_v17 = vld [vmem:[#allocation5 + $0x70] sm:$0xf]  ;;  %v5336_v21 = vld [vmem:[#allocation5 + $0xa0] sm:$0xf0] }
  0x34   :  { %v4080_v18 = vor.u32 %v5329_v7, %v4077_v8  ;;  %v5330_v22 = vld [vmem:[#allocation5 + $0x74] sm:$0xf]  ;;  %v4085_v23 = vld [vmem:[#allocation5 + $0xa4] sm:$0xf0]  ;;  %v5316_v24 = vld [vmem:[#allocation5 + $0x4] sm:$0xf]  ;;  %v4024_v31 = vor.u32 %v5322_v16, %v4023_v10  ;;  %v4084_v34 = vor.u32 %v5336_v21, %v4083_v17 }
  0x35   :  { %v437_v13 = vsel %vm435_vm0, %v392_v5, 0  ;;  %v440_v14 = vsel %vm435_vm0, %v393_v6, 0  ;;  %v394_v19 = vpack.c.b16 %v355_v11, %v355_v11  ;;  %v395_v20 = vpack.c.b16 %v356_v12, %v356_v12  ;;  %v4025_v25 = vld [vmem:[#allocation5 + $0x34] sm:$0xf0]  ;;  %v231_v26 = vld [vmem:[#allocation5 + $0xe0] sm:$0x33] }
  0x36   :  { %480 = vmatpush.bf16.msra.mxu0 %v437_v13  ;;  %494 = vmatpush.bf16.msra.mxu1 %v440_v14  ;;  %v357_v29 = vunpack.c.l.b16 %v231_v26  ;;  %v358_v30 = vunpack.c.h.b16 %v231_v26  ;;  %v191_v32 = vld [vmem:[#allocation2] sm:$0xff]  ;;  %v4088_v35 = vor.u32 %v5330_v22, %v4085_v23  ;;  %v4031_v36 = vld [vmem:[#allocation5 + $0x8] sm:$0xf]  ;;  %v4028_v37 = vor.u32 %v5316_v24, %v4025_v25  ;;  %v5323_v38 = vld [vmem:[#allocation5 + $0x38] sm:$0xf0]  ;;  %s6111_s8 = smov [#allocation19]  }
  0x37   :  { %v443_v27 = vsel %vm435_vm0, %v394_v19, 0  ;;  %v446_v28 = vsel %vm435_vm0, %v395_v20, 0  ;;  %v5317_v39 = vld [vmem:[#allocation5 + $0xc] sm:$0xf]  ;;  %v4033_v43 = vld [vmem:[#allocation5 + $0x3c] sm:$0xf0]  ;;  %v6218_v52 = vpack.c.bf16 %v192_v33, %v191_v32  ;;  %v4032_v56 = vor.u32 %v5323_v38, %v4031_v36 }
  0x38   :  { %508 = vmatpush.bf16.msra.mxu2 %v443_v27  ;;  %522 = vmatpush.bf16.msra.mxu3 %v446_v28  ;;  %v396_v40 = vpack.c.b16 %v357_v29, %v357_v29  ;;  %v397_v41 = vpack.c.b16 %v358_v30, %v358_v30  ;;  %v232_v42 = vld [vmem:[#allocation5 + $0xe8] sm:$0x33]  ;;  %v4091_v44 = vld [vmem:[#allocation5 + $0x78] sm:$0xf]  ;;  %v5331_v50 = vld [vmem:[#allocation5 + $0x7c] sm:$0xf]  ;;  %v4036_v57 = vor.u32 %v5317_v39, %v4033_v43 }
  0x39   :  { %v5337_v45 = vld [vmem:[#allocation5 + $0xa8] sm:$0xf0]  ;;  %v359_v46 = vunpack.c.l.b16 %v232_v42  ;;  %v360_v47 = vunpack.c.h.b16 %v232_v42  ;;  %v4093_v51 = vld [vmem:[#allocation5 + $0xac] sm:$0xf0]  ;;  %vm431_vm1 = vcmask 293888   ;;  %s4001_s9 = sshll.u32 %s6111_s8, 4  ;;  %s4002_s9 = int_to_ptr.vmem [resolvable:$true] %s4001_s9 }
  0x3a   :  { %481 = vmatpush.bf16.msra.mxu0 %v4076_v15  ;;  %495 = vmatpush.bf16.msra.mxu1 %v4080_v18  ;;  %v449_v48 = vsel %vm435_vm0, %v396_v40, 0  ;;  %v452_v49 = vsel %vm435_vm0, %v397_v41, 0  ;;  %v233_v55 = vld [vmem:[#allocation5 + $0xf0] sm:$0x33]  ;;  %v4092_v61 = vor.u32 %v5337_v45, %v4091_v44  ;;  %v4096_v62 = vor.u32 %v5331_v50, %v4093_v51  ;;  %v5324_v63 = vld [vmem:[#allocation5 + $0x40] sm:$0xf0] }
  0x3b   :  { %v398_v53 = vpack.c.b16 %v359_v46, %v359_v46  ;;  %v399_v54 = vpack.c.b16 %v360_v47, %v360_v47  ;;  %v4039_v58 = vld [vmem:[#allocation5 + $0x10] sm:$0xf]  ;;  %v361_v59 = vunpack.c.l.b16 %v233_v55  ;;  %v362_v60 = vunpack.c.h.b16 %v233_v55  ;;  %v5318_v0 = vld [vmem:[#allocation5 + $0x14] sm:$0xf]  ;;  %v4041_v1 = vld [vmem:[#allocation5 + $0x44] sm:$0xf0] }
  0x3c   :  { %509 = vmatpush.bf16.msra.mxu2 %v4084_v34  ;;  %523 = vmatpush.bf16.msra.mxu3 %v4088_v35  ;;  %v4099_v2 = vld [vmem:[#allocation5 + $0x80] sm:$0xf]  ;;  %v5338_v3 = vld [vmem:[#allocation5 + $0xb0] sm:$0xf0]  ;;  %v5332_v4 = vld [vmem:[#allocation5 + $0x84] sm:$0xf]  ;;  %v4040_v11 = vor.u32 %v5324_v63, %v4039_v58  ;;  %v4044_v12 = vor.u32 %v5318_v0, %v4041_v1 }
  0x3d   :  { %v455_v5 = vsel %vm435_vm0, %v398_v53, 0  ;;  %v458_v6 = vsel %vm435_vm0, %v399_v54, 0  ;;  %v4101_v7 = vld [vmem:[#allocation5 + $0xb4] sm:$0xf0]  ;;  %v400_v9 = vpack.c.b16 %v361_v59, %v361_v59  ;;  %v401_v10 = vpack.c.b16 %v362_v60, %v362_v60  ;;  %v5325_v18 = vld [vmem:[#allocation5 + $0x48] sm:$0xf0] }
  0x3e   :  { %482 = vmatpush.bf16.msra.mxu0 %v4024_v31  ;;  %496 = vmatpush.bf16.msra.mxu1 %v4028_v37  ;;  %v234_v8 = vld [vmem:[#allocation5 + $0xf8] sm:$0x33]  ;;  %v4100_v16 = vor.u32 %v5338_v3, %v4099_v2  ;;  %v4104_v17 = vor.u32 %v5332_v4, %v4101_v7  ;;  %v4049_v20 = vld [vmem:[#allocation5 + $0x4c] sm:$0xf0]  ;;  %v4107_v21 = vld [vmem:[#allocation5 + $0x88] sm:$0xf] }
  0x3f   :  { %v4047_v13 = vld [vmem:[#allocation5 + $0x18] sm:$0xf]  ;;  %v363_v14 = vunpack.c.l.b16 %v234_v8  ;;  %v364_v15 = vunpack.c.h.b16 %v234_v8  ;;  %v5319_v19 = vld [vmem:[#allocation5 + $0x1c] sm:$0xf]  ;;  %v5333_v23 = vld [vmem:[#allocation5 + $0x8c] sm:$0xf] }
  0x40   :  { %510 = vmatpush.bf16.msra.mxu2 %v4032_v56  ;;  %524 = vmatpush.bf16.msra.mxu3 %v4036_v57  ;;  %v5339_v22 = vld [vmem:[#allocation5 + $0xb8] sm:$0xf0]  ;;  %v461_v24 = vsel %vm435_vm0, %v400_v9, 0  ;;  %v464_v25 = vsel %vm435_vm0, %v401_v10, 0  ;;  %v4109_v26 = vld [vmem:[#allocation5 + $0xbc] sm:$0xf0]  ;;  %v4048_v30 = vor.u32 %v5325_v18, %v4047_v13  ;;  %v4052_v31 = vor.u32 %v5319_v19, %v4049_v20 }
  0x41   :  { %4125 = vmatmul.msk.bf16.vlgmr.msra.gmra.mxu0 %vm431_vm1, %v6218_v52  ;;  %4126 = vmatmul.msk.bf16.vlgmr.msra.gmra.mxu1 %vm431_vm1, %v6218_v52  ;;  %v235_v27 = vld [vmem:[#allocation5 + $0x100] sm:$0x3]  ;;  %v402_v28 = vpack.c.b16 %v363_v14, %v363_v14  ;;  %v403_v29 = vpack.c.b16 %v364_v15, %v364_v15  ;;  %v4108_v32 = vor.u32 %v5339_v22, %v4107_v21  ;;  %v5326_v36 = vld [vmem:[#allocation5 + $0x50] sm:$0xf0]  ;;  %v5320_v37 = vld [vmem:[#allocation5 + $0x24] sm:$0xf] }
  0x42   :  { %536 = vmatpush.bf16.msrb.mxu0 %v449_v48  ;;  %550 = vmatpush.bf16.msrb.mxu1 %v452_v49  ;;  %v4112_v33 = vor.u32 %v5333_v23, %v4109_v26  ;;  %v365_v34 = vunpack.c.l.b16 %v235_v27  ;;  %v4055_v35 = vld [vmem:[#allocation5 + $0x20] sm:$0xf]  ;;  %v4057_v38 = vld [vmem:[#allocation5 + $0x54] sm:$0xf0]  ;;  %v4115_v41 = vld [vmem:[#allocation5 + $0x90] sm:$0xf] }
  0x43   :  { %4127 = vmatmul.msk.bf16.vlgmr.msra.gmra.mxu2 %vm431_vm1, %v6218_v52  ;;  %4128 = vmatmul.msk.bf16.vlgmr.msra.gmra.mxu3 %vm431_vm1, %v6218_v52  ;;  %v467_v39 = vsel %vm435_vm0, %v402_v28, 0  ;;  %v470_v40 = vsel %vm435_vm0, %v403_v29, 0  ;;  %v5340_v42 = vld [vmem:[#allocation5 + $0xc0] sm:$0xf0]  ;;  %v5334_v43 = vld [vmem:[#allocation5 + $0x94] sm:$0xf]  ;;  %v4056_v46 = vor.u32 %v5326_v36, %v4055_v35  ;;  %v4060_v47 = vor.u32 %v5320_v37, %v4057_v38 }
  0x44   :  { %564 = vmatpush.bf16.msrb.mxu2 %v455_v5  ;;  %578 = vmatpush.bf16.msrb.mxu3 %v458_v6  ;;  %v4117_v44 = vld [vmem:[#allocation5 + $0xc4] sm:$0xf0]  ;;  %v404_v45 = vpack.c.b16 %v365_v34, %v365_v34  ;;  %v4116_v48 = vor.u32 %v5340_v42, %v4115_v41  ;;  %v5327_v51 = vld [vmem:[#allocation5 + $0x58] sm:$0xf0]  ;;  %v5321_v53 = vld [vmem:[#allocation5 + $0x2c] sm:$0xf] }
  0x45   :  { %v4120_v49 = vor.u32 %v5334_v43, %v4117_v44  ;;  %v4063_v50 = vld [vmem:[#allocation5 + $0x28] sm:$0xf]  ;;  %v4065_v54 = vld [vmem:[#allocation5 + $0x5c] sm:$0xf0]  ;;  %v4123_v56 = vld [vmem:[#allocation5 + $0x98] sm:$0xf] }
  0x46   :  { %537 = vmatpush.bf16.msrb.mxu0 %v4092_v61  ;;  %551 = vmatpush.bf16.msrb.mxu1 %v4096_v62  ;;  %v473_v55 = vsel %vm435_vm0, %v404_v45, 0  ;;  %v5341_v57 = vld [vmem:[#allocation5 + $0xc8] sm:$0xf0]  ;;  %v4064_v59 = vor.u32 %v5327_v51, %v4063_v50  ;;  %v4068_v60 = vor.u32 %v5321_v53, %v4065_v54  ;;  %v4071_v63 = vld [vmem:[#allocation5 + $0x30] sm:$0xf]  ;;  %v5364_v3 = vld [vmem:[#allocation10 + $0x30] sm:$0xff] }
  0x47   :  { %v5349_v58 = vld [vmem:[#allocation8 + $0x38] sm:$0xff]  ;;  %v4124_v61 = vor.u32 %v5341_v57, %v4123_v56  ;;  %v5328_v0 = vld [vmem:[#allocation5 + $0x60] sm:$0xf0]  ;;  %v5363_v4 = vld [vmem:[#allocation10 + $0x28] sm:$0xff]  ;;  %s4003_s27 = sshll.u32 %s6958_s10, 4  ;;  %s4004_s27 = int_to_ptr.hbm [resolvable:$true] %s4003_s27 }
  0x48   :  { %565 = vmatpush.bf16.msrb.mxu2 %v4100_v16  ;;  %579 = vmatpush.bf16.msrb.mxu3 %v4104_v17  ;;  %v5365_v62 = vld [vmem:[#allocation10 + $0x38] sm:$0xff]  ;;  %v4072_v2 = vor.u32 %v5328_v0, %v4071_v63  ;;  %v5372_v6 = vld [vmem:[#allocation10 + $0x70] sm:$0xff]  ;;  %v5371_v7 = vld [vmem:[#allocation10 + $0x68] sm:$0xff] }
  0x49   :  { %v5357_v1 = vld [vmem:[#allocation8 + $0x78] sm:$0xff]  ;;  %v5348_v8 = vld [vmem:[#allocation8 + $0x30] sm:$0xff]  ;;  %v5362_v9 = vld [vmem:[#allocation10 + $0x20] sm:$0xff] }
  0x4a   :  { %538 = vmatpush.bf16.msrb.mxu0 %v4040_v11  ;;  %552 = vmatpush.bf16.msrb.mxu1 %v4044_v12  ;;  %v5373_v5 = vld [vmem:[#allocation10 + $0x78] sm:$0xff]  ;;  %v5370_v10 = vld [vmem:[#allocation10 + $0x60] sm:$0xff]  ;;  %v5356_v11 = vld [vmem:[#allocation8 + $0x70] sm:$0xff] }
  0x4b   :  { %v5347_v12 = vld [vmem:[#allocation8 + $0x28] sm:$0xff]  ;;  %v5361_v13 = vld [vmem:[#allocation10 + $0x18] sm:$0xff]  ;;  %v5346_v16 = vld [vmem:[#allocation8 + $0x20] sm:$0xff] }
  0x4c   :  { %566 = vmatpush.bf16.msrb.mxu2 %v4048_v30  ;;  %580 = vmatpush.bf16.msrb.mxu3 %v4052_v31  ;;  %v5369_v14 = vld [vmem:[#allocation10 + $0x58] sm:$0xff]  ;;  %v5355_v15 = vld [vmem:[#allocation8 + $0x68] sm:$0xff]  ;;  %v5360_v17 = vld [vmem:[#allocation10 + $0x10] sm:$0xff] }
  0x4d   :  { %v5368_v18 = vld [vmem:[#allocation10 + $0x50] sm:$0xff]  ;;  %v5345_v19 = vld [vmem:[#allocation8 + $0x18] sm:$0xff]  ;;  %v5359_v20 = vld [vmem:[#allocation10 + $0x8] sm:$0xff] }
  0x4e   :  { %592 = vmatpush.bf16.msra.mxu0 %v461_v24  ;;  %606 = vmatpush.bf16.msra.mxu1 %v464_v25  ;;  %v5367_v21 = vld [vmem:[#allocation10 + $0x48] sm:$0xff]  ;;  %v5353_v22 = vld [vmem:[#allocation8 + $0x58] sm:$0xff]  ;;  %v5344_v23 = vld [vmem:[#allocation8 + $0x10] sm:$0xff] }
  0x4f   :  { %v5358_v24 = vld [vmem:[#allocation10] sm:$0xff]  ;;  %v5352_v26 = vld [vmem:[#allocation8 + $0x50] sm:$0xff]  ;;  %v5397_v27 = vld [vmem:[#allocation10 + $0x138] sm:$0xff] }
  0x50   :  { %620 = vmatpush.bf16.msra.mxu2 %v467_v39  ;;  %634 = vmatpush.bf16.msra.mxu3 %v470_v40  ;;  %v5366_v25 = vld [vmem:[#allocation10 + $0x40] sm:$0xff]  ;;  %v5405_v28 = vld [vmem:[#allocation10 + $0x178] sm:$0xff]  ;;  %v5343_v29 = vld [vmem:[#allocation8 + $0x8] sm:$0xff] }
  0x51   :  { %4129 = vmatmul.msk.bf16.vlgmr.msrb.gmra.mxu0 %vm431_vm1, %v6218_v52  ;;  %4130 = vmatmul.msk.bf16.vlgmr.msrb.gmra.mxu1 %vm431_vm1, %v6218_v52  ;;  %v5351_v30 = vld [vmem:[#allocation8 + $0x48] sm:$0xff]  ;;  %v5396_v31 = vld [vmem:[#allocation10 + $0x130] sm:$0xff]  ;;  %v5350_v56 = vld [vmem:[#allocation8 + $0x40] sm:$0xff] }
  0x52   :  { %593 = vmatpush.bf16.msra.mxu0 %v4108_v32  ;;  %607 = vmatpush.bf16.msra.mxu1 %v4112_v33  ;;  %v5404_v32 = vld [vmem:[#allocation10 + $0x170] sm:$0xff]  ;;  %v5381_v57 = vld [vmem:[#allocation10 + $0xb8] sm:$0xff] }
  0x53   :  { %4131 = vmatmul.msk.bf16.vlgmr.msrb.gmra.mxu2 %vm431_vm1, %v6218_v52  ;;  %4132 = vmatmul.msk.bf16.vlgmr.msrb.gmra.mxu3 %vm431_vm1, %v6218_v52  ;;  %v6253_v33 = vld [vmem:[#allocation7] sm:$0xff] }
  0x54   :  { %621 = vmatpush.bf16.msra.mxu2 %v4116_v48  ;;  %635 = vmatpush.bf16.msra.mxu3 %v4120_v49  ;;  %v240_v34 = vperm.slane %v6253_v33, 0  ;;  %v241_v35 = vperm.slane %v6253_v33, 1  ;;  %v243_v53 = vperm.slane %v6253_v33, 3 }
  0x56   :  { %594 = vmatpush.bf16.msra.mxu0 %v4056_v46  ;;  %608 = vmatpush.bf16.msra.mxu1 %v4060_v47 }
  0x58   :  { %622 = vmatpush.bf16.msra.mxu2 %v4064_v59  ;;  %636 = vmatpush.bf16.msra.mxu3 %v4068_v60  ;;  %v5395_v59 = vld [vmem:[#allocation10 + $0x128] sm:$0xff] }
  0x59   :  { %v5403_v60 = vld [vmem:[#allocation10 + $0x168] sm:$0xff] }
  0x5a   :  { %648 = vmatpush.bf16.msrb.mxu0 %v473_v55  ;;  %1068 = vmatpush.bf16.msrb.mxu1 %v5349_v58  ;;  %v5342_v55 = vld [vmem:[#allocation8] sm:$0xff] }
  0x5c   :  { %1736 = vmatpush.bf16.msrb.mxu3 %v5365_v62  ;;  %1082 = vmatpush.bf16.msrb.mxu2 %v5357_v1  ;;  %v5389_v62 = vld [vmem:[#allocation10 + $0xf8] sm:$0xff]  ;;  %v244_v1 = vperm.slane %v6253_v33, 4 }
  0x5e   :  { %649 = vmatpush.bf16.msrb.mxu0 %v4124_v61  ;;  %1069 = vmatpush.bf16.msrb.mxu1 %v5348_v8 }
  0x60   :  { %1737 = vmatpush.bf16.msrb.mxu3 %v5364_v3  ;;  %1083 = vmatpush.bf16.msrb.mxu2 %v5356_v11  ;;  %v242_v3 = vperm.slane %v6253_v33, 2  ;;  %v5394_v11 = vld [vmem:[#allocation10 + $0x120] sm:$0xff] }
  0x61   :  { %4133 = vmatmul.msk.bf16.vlgmr.msra.gmra.mxu0 %vm431_vm1, %v6218_v52  ;;  %4134 = vmatmul.msk.bf16.vlgmr.msra.gmra.mxu1 %vm431_vm1, %v6218_v52 }
  0x62   :  { %650 = vmatpush.bf16.msrb.mxu0 %v4072_v2  ;;  %1070 = vmatpush.bf16.msrb.mxu1 %v5347_v12  ;;  %v5402_v12 = vld [vmem:[#allocation10 + $0x160] sm:$0xff] }
  0x63   :  { %4135 = vmatmul.msk.bf16.vlgmr.msra.gmra.mxu2 %vm431_vm1, %v6218_v52  ;;  %4136 = vmatmul.msk.bf16.vlgmr.msra.gmra.mxu3 %vm431_vm1, %v6218_v52 }
  0x64   :  { %1738 = vmatpush.bf16.msrb.mxu3 %v5363_v4  ;;  %1084 = vmatpush.bf16.msrb.mxu2 %v5355_v15 }
  0x66   :  { %1750 = vmatpush.bf16.msra.mxu0 %v5373_v5  ;;  %1071 = vmatpush.bf16.msrb.mxu1 %v5346_v16  ;;  %v5380_v5 = vld [vmem:[#allocation10 + $0xb0] sm:$0xff] }
  0x68   :  { %1739 = vmatpush.bf16.msrb.mxu3 %v5362_v9 }
  0x6a   :  { %1751 = vmatpush.bf16.msra.mxu0 %v5372_v6  ;;  %1072 = vmatpush.bf16.msrb.mxu1 %v5345_v19 }
  0x6c   :  { %1740 = vmatpush.bf16.msrb.mxu3 %v5361_v13 }
  0x6e   :  { %1752 = vmatpush.bf16.msra.mxu0 %v5371_v7  ;;  %1073 = vmatpush.bf16.msrb.mxu1 %v5344_v23 }
  0x70   :  { %1741 = vmatpush.bf16.msrb.mxu3 %v5360_v17 }
  0x71   :  { %4137 = vmatmul.msk.bf16.vlgmr.msrb.gmra.mxu0 %vm431_vm1, %v6218_v52  ;;  %v5354_v52 = vld [vmem:[#allocation8 + $0x60] sm:$0xff] }
  0x72   :  { %1753 = vmatpush.bf16.msra.mxu0 %v5370_v10  ;;  %1085 = vmatpush.bf16.msrb.mxu2 %v5354_v52  ;;  %v5388_v52 = vld [vmem:[#allocation10 + $0xf0] sm:$0xff] }
  0x73   :  { %1074 = vmatpush.bf16.msrb.mxu1 %v5343_v29  ;;  %v245_v29 = vperm.slane %v6253_v33, 5 }
  0x74   :  { %1742 = vmatpush.bf16.msrb.mxu3 %v5359_v20 }
  0x76   :  { %1754 = vmatpush.bf16.msra.mxu0 %v5369_v14  ;;  %1086 = vmatpush.bf16.msrb.mxu2 %v5353_v22  ;;  %v5379_v22 = vld [vmem:[#allocation10 + $0xa8] sm:$0xff] }
  0x77   :  { %1075 = vmatpush.bf16.msrb.mxu1 %v5342_v55 }
  0x78   :  { %1743 = vmatpush.bf16.msrb.mxu3 %v5358_v24 }
  0x7a   :  { %1755 = vmatpush.bf16.msra.mxu0 %v5368_v18  ;;  %1087 = vmatpush.bf16.msrb.mxu2 %v5352_v26  ;;  %v5393_v26 = vld [vmem:[#allocation10 + $0x118] sm:$0xff] }
  0x7b   :  { %1764 = vmatpush.bf16.msra.mxu1 %v5381_v57  ;;  %v5386_v57 = vld [vmem:[#allocation10 + $0xe0] sm:$0xff] }
  0x7c   :  { %1792 = vmatpush.bf16.msra.mxu3 %v5397_v27 }
  0x7e   :  { %1756 = vmatpush.bf16.msra.mxu0 %v5367_v21  ;;  %1088 = vmatpush.bf16.msrb.mxu2 %v5351_v30  ;;  %v5401_v30 = vld [vmem:[#allocation10 + $0x158] sm:$0xff] }
  0x7f   :  { %1765 = vmatpush.bf16.msra.mxu1 %v5380_v5 }
  0x80   :  { %1793 = vmatpush.bf16.msra.mxu3 %v5396_v31 }
  0x82   :  { %1757 = vmatpush.bf16.msra.mxu0 %v5366_v25  ;;  %1089 = vmatpush.bf16.msrb.mxu2 %v5350_v56 }
  0x83   :  { %1766 = vmatpush.bf16.msra.mxu1 %v5379_v22 }
  0x84   :  { %1794 = vmatpush.bf16.msra.mxu3 %v5395_v59 }
  0x86   :  { %1806 = vmatpush.bf16.msrb.mxu0 %v5405_v28  ;;  %1778 = vmatpush.bf16.msra.mxu2 %v5389_v62  ;;  %v6109_v62 = vmov -1.0  }
  0x88   :  { %1795 = vmatpush.bf16.msra.mxu3 %v5394_v11 }
  0x8a   :  { %1807 = vmatpush.bf16.msrb.mxu0 %v5404_v32  ;;  %1779 = vmatpush.bf16.msra.mxu2 %v5388_v52 }
  0x8c   :  { %1796 = vmatpush.bf16.msra.mxu3 %v5393_v26 }
  0x8e   :  { %1808 = vmatpush.bf16.msrb.mxu0 %v5403_v60 }
  0x92   :  { %1809 = vmatpush.bf16.msrb.mxu0 %v5402_v12 }
  0x96   :  { %1810 = vmatpush.bf16.msrb.mxu0 %v5401_v30  ;;  %v5399_v30 = vld [vmem:[#allocation10 + $0x148] sm:$0xff] }
  0xbe   :  { %v484_v36 = vpop.f32.mrf.mxu0  ;;  %v498_v37 = vpop.f32.mrf.mxu1 }
  0xbf   :  { %v6257_v38 = vadd.f32 %v484_v36, %v240_v34  ;;  %v6259_v39 = vadd.f32 %v498_v37, %v241_v35 }
  0xc1   :  { %v6262_v40 = vmul.f32 0.70710677, %v6257_v38  ;;  %v6265_v41 = vmul.f32 0.70710677, %v6259_v39  ;;  %v6334_v55 = vmul.f32 0.5, %v6259_v39 }
  0xc3   :  { %v6268_v42 = vand.u32 2147483647, %v6262_v40  ;;  %v6271_v43 = vand.u32 2147483647, %v6265_v41  ;;  %vm666_vm2 = vcmp.ge.f32.partialorder %v6265_v41, 0.0  ;;  %vm665_vm8 = vcmp.ge.f32.partialorder %v6262_v40, 0.0 }
  0xc5   :  { %v677_v44 = vmul.f32 0.3275911, %v6268_v42  ;;  %v678_v45 = vmul.f32 0.3275911, %v6271_v43  ;;  %v725_v7 = vsub.f32 0.0, %v6268_v42  ;;  %v726_v15 = vsub.f32 0.0, %v6271_v43 }
  0xc6   :  { %v486_v46 = vpop.f32.mrf.mxu0  ;;  %v500_v47 = vpop.f32.mrf.mxu1 }
  0xc7   :  { %v681_v48 = vadd.f32 1.0, %v677_v44  ;;  %v682_v49 = vadd.f32 1.0, %v678_v45  ;;  %v6275_v50 = vadd.f32 %v486_v46, %v240_v34  ;;  %v6277_v51 = vadd.f32 %v500_v47, %v241_v35  ;;  %v526_v54 = vpop.f32.mrf.mxu3  ;;  %v512_v17 = vpop.f32.mrf.mxu2  ;;  %v5387_v35 = vld [vmem:[#allocation10 + $0xe8] sm:$0xff]  ;;  %v5378_v45 = vld [vmem:[#allocation10 + $0xa0] sm:$0xff]  ;;  %v5392_v46 = vld [vmem:[#allocation10 + $0x110] sm:$0xff] }
  0xc8   :  { %v6291_v0 = vadd.f32 %v526_v54, %v243_v53  ;;  %v6315_v21 = vadd.f32 %v512_v17, %v242_v3  ;;  %v729_v32 = vmul.f32 %v725_v7, %v6268_v42  ;;  %v730_v34 = vmul.f32 %v726_v15, %v6271_v43  ;;  %v5400_v47 = vld [vmem:[#allocation10 + $0x150] sm:$0xff]  ;;  %1780 = vmatpush.bf16.msra.mxu2 %v5387_v35 }
  0xc9   :  { %5658 = vrcp.f32 %v681_v48  ;;  %v6281_v58 = vmul.f32 0.70710677, %v6275_v50  ;;  %v6284_v61 = vmul.f32 0.70710677, %v6277_v51  ;;  %v6331_v54 = vmul.f32 0.5, %v6257_v38  ;;  %1767 = vmatpush.bf16.msra.mxu1 %v5378_v45  ;;  %1797 = vmatpush.bf16.msra.mxu3 %v5392_v46  ;;  %v5376_v35 = vld [vmem:[#allocation10 + $0x90] sm:$0xff] }
  0xca   :  { %5660 = vrcp.f32 %v682_v49  ;;  %v766_v9 = vmin.f32 %v6291_v0, 0.0  ;;  %v765_v37 = vmin.f32 %v6315_v21, 0.0  ;;  %v6342_v60 = vmul.f32 1.442695, %v729_v32  ;;  %1811 = vmatpush.bf16.msrb.mxu0 %v5400_v47  ;;  %v5398_v46 = vld [vmem:[#allocation10 + $0x140] sm:$0xff] }
  0xcb   :  { %v6287_v63 = vand.u32 2147483647, %v6281_v58  ;;  %v6295_v2 = vand.u32 2147483647, %v6284_v61  ;;  %v735_v38 = vmul.f32 1.442695, %v730_v34 }
  0xcc   :  { %v771_v24 = vmul.f32 1.442695, %v766_v9  ;;  %v6354_v9 = vmul.f32 1.442695, %v765_v37  ;;  %1781 = vmatpush.bf16.msra.mxu2 %v5386_v57  ;;  %v6361_v17 = vmul.f32 0.5, %v6277_v51  ;;  %vm667_vm3 = vcmp.ge.f32.partialorder %v6281_v58, 0.0 }
  0xcd   :  { %v679_v4 = vmul.f32 0.3275911, %v6287_v63  ;;  %v680_v8 = vmul.f32 0.3275911, %v6295_v2  ;;  %v728_v43 = vsub.f32 0.0, %v6295_v2  ;;  %v727_v39 = vsub.f32 0.0, %v6287_v63 }
  0xce   :  { %v540_v10 = vpop.f32.mrf.mxu0  ;;  %v554_v49 = vpop.f32.mrf.mxu1  ;;  %1812 = vmatpush.bf16.msrb.mxu0 %v5399_v30  ;;  %vm668_vm4 = vcmp.ge.f32.partialorder %v6284_v61, 0.0  ;;  %vm762_vm5 = vcmp.gt.f32.partialorder %v6291_v0, 0.0 }
  0xcf   :  { %v6299_v6 = vpop.eup %5658  ;;  %v683_v16 = vadd.f32 1.0, %v679_v4  ;;  %v6310_v18 = vadd.f32 %v540_v10, %v244_v1  ;;  %v684_v20 = vadd.f32 1.0, %v680_v8  ;;  %v528_v25 = vpop.f32.mrf.mxu3  ;;  %v6338_v56 = vadd.f32 %v554_v49, %v245_v29  ;;  %v5384_v49 = vld [vmem:[#allocation10 + $0xd0] sm:$0xff] }
  0xd0   :  { %v6304_v13 = vpop.eup %5660  ;;  %v689_v14 = vmul.f32 1.0614054, %v6299_v6  ;;  %v6327_v44 = vadd.f32 %v528_v25, %v243_v53  ;;  %v6347_v4 = vsel %vm666_vm2, 1.0, %v6109_v62  ;;  %v732_v12 = vmul.f32 %v728_v43, %v6295_v2  ;;  %v5391_v25 = vld [vmem:[#allocation10 + $0x108] sm:$0xff] }
  0xd1   :  { %v690_v19 = vmul.f32 1.0614054, %v6304_v13  ;;  %5662 = vrcp.f32 %v683_v16  ;;  %v811_v28 = vmin.f32 %v6310_v18, 0.0  ;;  %v812_v52 = vmin.f32 %v6338_v56, 0.0  ;;  %1798 = vmatpush.bf16.msra.mxu3 %v5391_v25 }
  0xd2   :  { %v693_v23 = vadd.f32 -1.4531521, %v689_v14  ;;  %5664 = vrcp.f32 %v684_v20  ;;  %v768_v10 = vmin.f32 %v6327_v44, 0.0  ;;  %v731_v20 = vmul.f32 %v727_v39, %v6287_v63  ;;  %1813 = vmatpush.bf16.msrb.mxu0 %v5398_v46 }
  0xd3   :  { %v694_v27 = vadd.f32 -1.4531521, %v690_v19  ;;  %5666 = vpow2.f32 %v771_v24  ;;  %v829_v48 = vmul.f32 1.442695, %v811_v28  ;;  %v5377_v24 = vld [vmem:[#allocation10 + $0x98] sm:$0xff]  ;;  %v514_v28 = vpop.f32.mrf.mxu2  ;;  %vm793_vm6 = vcmp.gt.f32.partialorder %v6310_v18, 0.0 }
  0xd4   :  { %v697_v31 = vmul.f32 %v6299_v6, %v693_v23  ;;  %v775_v23 = vmul.f32 1.442695, %v768_v10  ;;  %v739_v63 = vmul.f32 1.442695, %v732_v12  ;;  %1768 = vmatpush.bf16.msra.mxu1 %v5377_v24  ;;  %v6376_v43 = vadd.f32 %v514_v28, %v242_v3  ;;  %v5375_v3 = vld [vmem:[#allocation10 + $0x88] sm:$0xff] }
  0xd5   :  { %v698_v36 = vmul.f32 %v6304_v13, %v694_v27  ;;  %5668 = vpow2.f32 %v829_v48  ;;  %vm764_vm7 = vcmp.gt.f32.partialorder %v6327_v44, 0.0  ;;  %vm794_vm10 = vcmp.gt.f32.partialorder %v6338_v56, 0.0 }
  0xd6   :  { %v701_v42 = vadd.f32 1.4214138, %v697_v31  ;;  %v542_v14 = vpop.f32.mrf.mxu0  ;;  %5670 = vpow2.f32 %v735_v38  ;;  %v5385_v31 = vld [vmem:[#allocation10 + $0xd8] sm:$0xff]  ;;  %v556_v48 = vpop.f32.mrf.mxu1  ;;  %vm761_vm2 = vcmp.gt.f32.partialorder %v6315_v21, 0.0 }
  0xd7   :  { %v702_v53 = vadd.f32 1.4214138, %v698_v36  ;;  %v6340_v59 = vpop.eup %5662  ;;  %v6369_v51 = vadd.f32 %v542_v14, %v244_v1  ;;  %5672 = vpow2.f32 %v775_v23  ;;  %v5390_v36 = vld [vmem:[#allocation10 + $0x100] sm:$0xff]  ;;  %1782 = vmatpush.bf16.msra.mxu2 %v5385_v31  ;;  %v582_v14 = vpop.f32.mrf.mxu3  ;;  %v767_v23 = vmin.f32 %v6376_v43, 0.0 }
  0xd8   :  { %v6350_v5 = vpop.eup %5664  ;;  %v691_v8 = vmul.f32 1.0614054, %v6340_v59  ;;  %v705_v41 = vmul.f32 %v6299_v6, %v701_v42  ;;  %v831_v42 = vmul.f32 1.442695, %v812_v52  ;;  %5674 = vpow2.f32 %v739_v63  ;;  %1769 = vmatpush.bf16.msra.mxu1 %v5376_v35  ;;  %1799 = vmatpush.bf16.msra.mxu3 %v5390_v36 }
  0xd9   :  { %v706_v7 = vmul.f32 %v6304_v13, %v702_v53  ;;  %v692_v11 = vmul.f32 1.0614054, %v6350_v5  ;;  %v5667_v19 = vpop.eup %5666  ;;  %v820_v39 = vmin.f32 %v6369_v51, 0.0  ;;  %v6394_v31 = vadd.f32 %v556_v48, %v245_v29 }
  0xda   :  { %v695_v16 = vadd.f32 -1.4531521, %v691_v8  ;;  %v4139_v27 = vadd.f32 -1.0, %v5667_v19  ;;  %v709_v32 = vadd.f32 -0.28449672, %v705_v41  ;;  %5676 = vpow2.f32 %v831_v42 }
  0xdb   :  { %v710_v15 = vadd.f32 -0.28449672, %v706_v7  ;;  %v696_v22 = vadd.f32 -1.4531521, %v692_v11  ;;  %v5669_v1 = vpop.eup %5668  ;;  %v737_v8 = vmul.f32 1.442695, %v731_v20  ;;  %1783 = vmatpush.bf16.msra.mxu2 %v5384_v49 }
  0xdc   :  { %v699_v26 = vmul.f32 %v6340_v59, %v695_v16  ;;  %v782_v38 = vmul.f32 1.6732632, %v4139_v27  ;;  %v5671_v7 = vpop.eup %5670  ;;  %v713_v41 = vmul.f32 %v6299_v6, %v709_v32  ;;  %v847_v19 = vmul.f32 1.442695, %v820_v39  ;;  %1770 = vmatpush.bf16.msra.mxu1 %v5375_v3 }
  0xdd   :  { %v714_v2 = vmul.f32 %v6304_v13, %v710_v15  ;;  %v700_v34 = vmul.f32 %v6350_v5, %v696_v22  ;;  %v5383_v15 = vld [vmem:[#allocation10 + $0xc8] sm:$0xff]  ;;  %v5673_v16 = vpop.eup %5672  ;;  %v6402_v35 = vsel %vm667_vm3, 1.0, %v6109_v62  ;;  %v672_v36 = vsel %vm668_vm4, 1.0, %v6109_v62 }
  0xde   :  { %v703_v45 = vadd.f32 1.4214138, %v699_v26  ;;  %v786_v22 = vsel %vm762_vm5, %v6291_v0, %v782_v38  ;;  %v4141_v24 = vadd.f32 -1.0, %v5673_v16  ;;  %5678 = vpow2.f32 %v847_v19  ;;  %v5374_v26 = vld [vmem:[#allocation10 + $0x80] sm:$0xff]  ;;  %v5675_v0 = vpop.eup %5674  ;;  %v610_v61 = vpop.f32.mrf.mxu1 }
  0xdf   :  { %v718_v37 = vadd.f32 0.2548296, %v714_v2  ;;  %v704_v47 = vadd.f32 1.4214138, %v700_v34  ;;  %v717_v27 = vadd.f32 0.2548296, %v713_v41  ;;  %1784 = vmatpush.bf16.msra.mxu2 %v5383_v15  ;;  %5680 = vpow2.f32 %v6342_v60  ;;  %v596_v60 = vpop.f32.mrf.mxu0 }
  0xe0   :  { %v707_v57 = vmul.f32 %v6340_v59, %v703_v45  ;;  %v784_v30 = vmul.f32 1.6732632, %v4141_v24  ;;  %v6397_v63 = vmul.f32 1.050701, %v786_v22  ;;  %5682 = vpow2.f32 %v737_v8  ;;  %v5677_v45 = vpop.eup %5676  ;;  %1771 = vmatpush.bf16.msra.mxu1 %v5374_v26  ;;  %v5382_v41 = vld [vmem:[#allocation10 + $0xc0] sm:$0xff] }
  0xe1   :  { %v722_v53 = vmul.f32 %v6304_v13, %v718_v37  ;;  %v708_v10 = vmul.f32 %v6350_v5, %v704_v47  ;;  %v4142_v13 = vadd.f32 -1.0, %v5669_v1  ;;  %v6410_v37 = vpop.f32.mrf.mxu2  ;;  %5684 = vpow2.f32 %v6354_v9  ;;  %v6417_v47 = vld [vmem:[#allocation7 + $0x8] sm:$0x1f] }
  0xe2   :  { %v711_v12 = vadd.f32 -0.28449672, %v707_v57  ;;  %v788_v29 = vsel %vm764_vm7, %v6327_v44, %v784_v30  ;;  %v721_v42 = vmul.f32 %v6299_v6, %v717_v27  ;;  %v773_v48 = vmul.f32 1.442695, %v767_v23 }
  0xe3   :  { %v742_v11 = vmul.f32 %v5671_v7, %v722_v53  ;;  %v712_v52 = vadd.f32 -0.28449672, %v708_v10  ;;  %v883_v28 = vmul.f32 1.6732632, %v4142_v13  ;;  %v6415_v58 = vmul.f32 1.050701, %v788_v29  ;;  %1785 = vmatpush.bf16.msra.mxu2 %v5382_v41 }
  0xe4   :  { %v715_v20 = vmul.f32 %v6340_v59, %v711_v12  ;;  %v821_v49 = vmin.f32 %v6394_v31, 0.0  ;;  %v247_v57 = vperm.slane %v6253_v33, 7  ;;  %v4143_v38 = vadd.f32 -1.0, %v5677_v45 }
  0xe5   :  { %v746_v25 = vsub.f32 1.0, %v742_v11  ;;  %v716_v2 = vmul.f32 %v6350_v5, %v712_v52  ;;  %v901_v44 = vsel %vm793_vm6, %v6310_v18, %v883_v28  ;;  %v1879_v9 = vpack.c.bf16 %v6415_v58, %v6397_v63  ;;  %v584_v18 = vpop.f32.mrf.mxu3  ;;  %v5466_v63 = vld [vmem:[#allocation13 + $0xa4] sm:$0xf] }
  0xe6   :  { %v719_v32 = vadd.f32 0.2548296, %v715_v20  ;;  %v849_v39 = vmul.f32 1.442695, %v821_v49  ;;  %v248_v7 = vperm.slane %v6417_v47, 0  ;;  %vm802_vm9 = vcmp.gt.f32.partialorder %v6369_v51, 0.0 }
  0xe7   :  { %v720_v34 = vadd.f32 0.2548296, %v716_v2  ;;  %v750_v46 = vmul.f32 %v746_v25, %v6347_v4  ;;  %v5679_v4 = vpop.eup %5678  ;;  %v249_v15 = vperm.slane %v6417_v47, 1  ;;  %v919_v20 = vmul.f32 1.050701, %v901_v44 }
  0xe8   :  { %v4151_v6 = vadd.f32 -1.0, %v5679_v4  ;;  %v5681_v8 = vpop.eup %5680  ;;  %5686 = vpow2.f32 %v849_v39  ;;  %v6433_v13 = vadd.f32 %v596_v60, %v248_v7  ;;  %v884_v22 = vmul.f32 1.6732632, %v4143_v38  ;;  %v5428_v38 = vld [vmem:[#allocation10 + $0x230] sm:$0xff] }
  0xe9   :  { %v724_v1 = vmul.f32 %v6350_v5, %v720_v34  ;;  %v723_v5 = vmul.f32 %v6340_v59, %v719_v32  ;;  %v754_v10 = vadd.f32 1.0, %v750_v46  ;;  %v6431_v59 = vadd.f32 %v582_v14, %v247_v57  ;;  %v5683_v11 = vpop.eup %5682  ;;  %v570_v32 = vpop.f32.mrf.mxu2 }
  0xea   :  { %v892_v12 = vmul.f32 1.6732632, %v4151_v6  ;;  %v6436_v16 = vpop.eup %5684  ;;  %5688 = vpow2.f32 %v773_v48  ;;  %v246_v2 = vperm.slane %v6253_v33, 6  ;;  %v815_v26 = vmin.f32 %v6433_v13, 0.0  ;;  %v598_v34 = vpop.f32.mrf.mxu0 }
  0xeb   :  { %v744_v53 = vmul.f32 %v5675_v0, %v724_v1  ;;  %v743_v52 = vmul.f32 %v5683_v11, %v723_v5  ;;  %v814_v23 = vmin.f32 %v6431_v59, 0.0  ;;  %v741_v27 = vmul.f32 %v5681_v8, %v721_v42  ;;  %v612_v46 = vpop.f32.mrf.mxu1 }
  0xec   :  { %v910_v14 = vsel %vm802_vm9, %v6369_v51, %v892_v12  ;;  %v758_v28 = vmul.f32 %v754_v10, %v6334_v55  ;;  %v6446_v0 = vadd.f32 %v610_v61, %v249_v15  ;;  %v837_v45 = vmul.f32 1.442695, %v815_v26  ;;  %v5421_v61 = vld [vmem:[#allocation10 + $0x1f8] sm:$0xff] }
  0xed   :  { %v748_v3 = vsub.f32 1.0, %v744_v53  ;;  %v928_v25 = vmul.f32 1.050701, %v910_v14  ;;  %v835_v30 = vmul.f32 1.442695, %v814_v23  ;;  %v747_v29 = vsub.f32 1.0, %v743_v52  ;;  %v638_v53 = vpop.f32.mrf.mxu3 }
  0xee   :  { %v5687_v1 = vpop.eup %5686  ;;  %v902_v33 = vsel %vm794_vm10, %v6338_v56, %v884_v22  ;;  %vm803_vm11 = vcmp.gt.f32.partialorder %v6394_v31, 0.0  ;;  %v816_v55 = vmin.f32 %v6446_v0, 0.0  ;;  %v6455_v48 = vadd.f32 %v6410_v37, %v246_v2 }
  0xef   :  { %v752_v19 = vmul.f32 %v748_v3, %v672_v36  ;;  %v5429_v36 = vld [vmem:[#allocation10 + $0x238] sm:$0xff]  ;;  %v1150_v60 = vpack.c.bf16 %v928_v25, %v919_v20  ;;  %5690 = vpow2.f32 %v835_v30  ;;  %v4152_v44 = vadd.f32 -1.0, %v5687_v1  ;;  %v5419_v30 = vld [vmem:[#allocation10 + $0x1e8] sm:$0xff]  ;;  %v5426_v1 = vld [vmem:[#allocation10 + $0x220] sm:$0xff] }
  0xf0   :  { %5692 = vpow2.f32 %v837_v45  ;;  %v839_v49 = vmul.f32 1.442695, %v816_v55  ;;  %v6457_v4 = vadd.f32 %v584_v18, %v247_v57  ;;  %v6459_v5 = vadd.f32 %v598_v34, %v248_v7  ;;  %v5420_v18 = vld [vmem:[#allocation10 + $0x1f0] sm:$0xff]  ;;  %v5437_v25 = vld [vmem:[#allocation11 + $0x38] sm:$0xff] }
  0xf1   :  { %v756_v24 = vadd.f32 1.0, %v752_v19  ;;  %1744 = vmatmul.bf16.vlgmr.msrb.gmra.mxu3 %v1150_v60  ;;  %v6461_v56 = vadd.f32 %v612_v46, %v249_v15  ;;  %v669_v6 = vsel %vm665_vm8, 1.0, %v6109_v62  ;;  %v745_v39 = vsub.f32 1.0, %v741_v27  ;;  %v5427_v19 = vld [vmem:[#allocation10 + $0x228] sm:$0xff]  ;;  %v6478_v27 = vpop.f32.mrf.mxu2 }
  0xf2   :  { %1848 = vmatpush.bf16.msrb.mxu3 %v5429_v36  ;;  %v751_v37 = vmul.f32 %v747_v29, %v6402_v35  ;;  %v893_v8 = vmul.f32 1.6732632, %v4152_v44  ;;  %v920_v10 = vmul.f32 1.050701, %v902_v33  ;;  %5694 = vpow2.f32 %v839_v49 }
  0xf3   :  { %v760_v51 = vmul.f32 %v756_v24, %v6361_v17  ;;  %v5689_v17 = vpop.eup %5688  ;;  %v6467_v57 = vadd.f32 %v570_v32, %v246_v2  ;;  %v823_v7 = vmin.f32 %v6457_v4, 0.0  ;;  %v813_v40 = vmin.f32 %v6455_v48, 0.0 }
  0xf4   :  { %v911_v3 = vsel %vm803_vm11, %v6394_v31, %v893_v8  ;;  %v824_v41 = vmin.f32 %v6459_v5, 0.0  ;;  %v251_v35 = vperm.slane %v6417_v47, 3  ;;  %v825_v52 = vmin.f32 %v6461_v56, 0.0  ;;  %v5425_v8 = vld [vmem:[#allocation10 + $0x218] sm:$0xff] }
  0xf5   :  { %v938_v42 = vpack.c.bf16 %v760_v51, %v758_v28  ;;  %v5691_v11 = vpop.eup %5690  ;;  %v929_v12 = vmul.f32 1.050701, %v911_v3  ;;  %v853_v15 = vmul.f32 1.442695, %v823_v7  ;;  %v749_v22 = vmul.f32 %v745_v39, %v669_v6  ;;  %v652_v28 = vpop.f32.mrf.mxu0 }
  0xf6   :  { %1849 = vmatpush.bf16.msrb.mxu3 %v5428_v38  ;;  %v5693_v20 = vpop.eup %5692  ;;  %v755_v14 = vadd.f32 1.0, %v751_v37  ;;  %v4145_v23 = vadd.f32 -1.0, %v5691_v11  ;;  %v855_v24 = vmul.f32 1.442695, %v824_v41  ;;  %v822_v26 = vmin.f32 %v6467_v57, 0.0  ;;  %v640_v44 = vpop.f32.mrf.mxu3  ;;  %v5435_v41 = vld [vmem:[#allocation11 + $0x28] sm:$0xff] }
  0xf7   :  { %1090 = vmatmul.bf16.vlgmr.msrb.gmra.mxu2 %v938_v42  ;;  %v1151_v31 = vpack.c.bf16 %v929_v12, %v920_v10  ;;  %v4146_v2 = vadd.f32 -1.0, %v5693_v20  ;;  %5696 = vpow2.f32 %v853_v15  ;;  %v833_v32 = vmul.f32 1.442695, %v813_v40 }
  0xf8   :  { %1834 = vmatpush.bf16.msrb.mxu2 %v5421_v61  ;;  %5698 = vpow2.f32 %v855_v24  ;;  %v857_v34 = vmul.f32 1.442695, %v825_v52  ;;  %v6480_v36 = vadd.f32 %v638_v53, %v251_v35  ;;  %v5695_v29 = vpop.eup %5694  ;;  %v659_v51 = vmul.f32 0.5, %v6275_v50  ;;  %v5436_v61 = vld [vmem:[#allocation11 + $0x30] sm:$0xff] }
  0xf9   :  { %v6484_v60 = vadd.f32 -1.0, %v6436_v16  ;;  %v6486_v45 = vadd.f32 -1.0, %v5689_v17  ;;  %v886_v46 = vmul.f32 1.6732632, %v4145_v23  ;;  %1758 = vmatmul.bf16.vlgmr.msra.gmra.mxu0 %v1151_v31  ;;  %v6488_v33 = vadd.f32 1.0, %v749_v22  ;;  %v5418_v17 = vld [vmem:[#allocation10 + $0x1e0] sm:$0xff]  ;;  %v626_v22 = vpop.f32.mrf.mxu2 }
  0xfa   :  { %1850 = vmatpush.bf16.msrb.mxu3 %v5427_v19  ;;  %vm796_vm12 = vcmp.gt.f32.partialorder %v6431_v59, 0.0  ;;  %v4147_v55 = vadd.f32 -1.0, %v5695_v29  ;;  %5700 = vpow2.f32 %v857_v34  ;;  %2009 = vmatpush.bf16.msra.mxu0 %v5437_v25  ;;  %v6491_v42 = vmul.f32 %v755_v14, %v659_v51  ;;  %v5424_v23 = vld [vmem:[#allocation10 + $0x210] sm:$0xff] }
  0xfb   :  { %vm797_vm13 = vcmp.gt.f32.partialorder %v6433_v13, 0.0  ;;  %v887_v50 = vmul.f32 1.6732632, %v4146_v2  ;;  %v851_v16 = vmul.f32 1.442695, %v822_v26  ;;  %5702 = vpow2.f32 %v833_v32 }
  0xfc   :  { %1835 = vmatpush.bf16.msrb.mxu2 %v5420_v18  ;;  %vm798_vm14 = vcmp.gt.f32.partialorder %v6446_v0, 0.0  ;;  %v818_v49 = vmin.f32 %v6480_v36, 0.0  ;;  %v252_v53 = vperm.slane %v6417_v47, 4  ;;  %v904_v6 = vsel %vm796_vm12, %v6431_v59, %v886_v46 }
  0xfd   :  { %v5697_v38 = vpop.eup %5696  ;;  %v888_v39 = vmul.f32 1.6732632, %v4147_v55  ;;  %vm805_vm15 = vcmp.gt.f32.partialorder %v6457_v4, 0.0  ;;  %v250_v37 = vperm.slane %v6417_v47, 2  ;;  %v6504_v40 = vadd.f32 %v640_v44, %v251_v35  ;;  %v5417_v47 = vld [vmem:[#allocation10 + $0x1d8] sm:$0xff]  ;;  %v654_v14 = vpop.f32.mrf.mxu0 }
  0xfe   :  { %1851 = vmatpush.bf16.msrb.mxu3 %v5426_v1  ;;  %v5699_v10 = vpop.eup %5698  ;;  %v4154_v7 = vadd.f32 -1.0, %v5697_v38  ;;  %v843_v18 = vmul.f32 1.442695, %v818_v49  ;;  %v6502_v3 = vadd.f32 %v652_v28, %v252_v53  ;;  %2010 = vmatpush.bf16.msra.mxu0 %v5436_v61  ;;  %v905_v59 = vsel %vm797_vm13, %v6433_v13, %v887_v50 }
  0xff   :  { %5704 = vpow2.f32 %v851_v16  ;;  %vm806_vm0 = vcmp.gt.f32.partialorder %v6459_v5, 0.0  ;;  %v4155_v11 = vadd.f32 -1.0, %v5699_v10  ;;  %v922_v15 = vmul.f32 1.050701, %v904_v6 }
 0x100   :  { %1836 = vmatpush.bf16.msrb.mxu2 %v5419_v30  ;;  %v5701_v12 = vpop.eup %5700  ;;  %v895_v52 = vmul.f32 1.6732632, %v4154_v7  ;;  %vm807_vm1 = vcmp.gt.f32.partialorder %v6461_v56, 0.0  ;;  %5706 = vpow2.f32 %v843_v18  ;;  %v906_v35 = vsel %vm798_vm14, %v6446_v0, %v888_v39  ;;  %v5434_v0 = vld [vmem:[#allocation11 + $0x20] sm:$0xff] }
 0x101   :  { %v896_v19 = vmul.f32 1.6732632, %v4155_v11  ;;  %v4156_v20 = vadd.f32 -1.0, %v5701_v12  ;;  %v819_v13 = vmin.f32 %v6502_v3, 0.0  ;;  %v5703_v24 = vpop.eup %5702  ;;  %v923_v25 = vmul.f32 1.050701, %v905_v59 }
 0x102   :  { %1852 = vmatpush.bf16.msrb.mxu3 %v5425_v8  ;;  %v913_v31 = vsel %vm805_vm15, %v6457_v4, %v895_v52  ;;  %v6519_v2 = vadd.f32 %v6478_v27, %v250_v37  ;;  %v827_v26 = vmin.f32 %v6504_v40, 0.0  ;;  %2011 = vmatpush.bf16.msra.mxu0 %v5435_v41  ;;  %v924_v29 = vmul.f32 1.050701, %v906_v35  ;;  %v5416_v27 = vld [vmem:[#allocation10 + $0x1d0] sm:$0xff]  ;;  %v5422_v59 = vld [vmem:[#allocation10 + $0x200] sm:$0xff] }
 0x103   :  { %v931_v28 = vmul.f32 1.050701, %v913_v31  ;;  %v914_v30 = vsel %vm806_vm0, %v6459_v5, %v896_v19  ;;  %v897_v32 = vmul.f32 1.6732632, %v4156_v20  ;;  %v845_v34 = vmul.f32 1.442695, %v819_v13 }
 0x104   :  { %1837 = vmatpush.bf16.msrb.mxu2 %v5418_v17  ;;  %v932_v51 = vmul.f32 1.050701, %v914_v30  ;;  %v6525_v46 = vadd.f32 %v626_v22, %v250_v37  ;;  %v6527_v4 = vadd.f32 %v654_v14, %v252_v53  ;;  %v861_v50 = vmul.f32 1.442695, %v827_v26  ;;  %v5423_v5 = vld [vmem:[#allocation10 + $0x208] sm:$0xff]  ;;  %v5433_v37 = vld [vmem:[#allocation11 + $0x18] sm:$0xff] }
 0x105   :  { %v5705_v1 = vpop.eup %5704  ;;  %v1153_v55 = vpack.c.bf16 %v931_v28, %v922_v15  ;;  %v915_v61 = vsel %vm807_vm1, %v6461_v56, %v897_v32  ;;  %5708 = vpow2.f32 %v845_v34  ;;  %v757_v44 = vmul.f32 %v6488_v33, %v6331_v54  ;;  %v5413_v56 = vld [vmem:[#allocation10 + $0x1b8] sm:$0xff]  ;;  %v5432_v12 = vld [vmem:[#allocation11 + $0x10] sm:$0xff]  ;;  %v5414_v35 = vld [vmem:[#allocation10 + $0x1c0] sm:$0xff] }
 0x106   :  { %1853 = vmatpush.bf16.msrb.mxu3 %v5424_v23  ;;  %v5707_v16 = vpop.eup %5706  ;;  %v781_v17 = vmul.f32 1.6732632, %v6484_v60  ;;  %v1154_v49 = vpack.c.bf16 %v932_v51, %v923_v25  ;;  %v933_v53 = vmul.f32 1.050701, %v915_v61  ;;  %2012 = vmatpush.bf16.msra.mxu0 %v5434_v0  ;;  %v817_v38 = vmin.f32 %v6519_v2, 0.0  ;;  %v5415_v60 = vld [vmem:[#allocation10 + $0x1c8] sm:$0xff] }
 0x107   :  { %v4149_v6 = vadd.f32 -1.0, %v5707_v16  ;;  %5710 = vpow2.f32 %v861_v50  ;;  %v828_v39 = vmin.f32 %v6527_v4, 0.0  ;;  %1786 = vmatmul.bf16.vlgmr.msra.gmra.mxu2 %v1153_v55  ;;  %v783_v8 = vmul.f32 1.6732632, %v6486_v45  ;;  %v5430_v55 = vld [vmem:[#allocation11] sm:$0xff] }
 0x108   :  { %1838 = vmatpush.bf16.msrb.mxu2 %v5417_v47  ;;  %v1155_v10 = vpack.c.bf16 %v933_v53, %v924_v29  ;;  %v826_v7 = vmin.f32 %v6525_v46, 0.0  ;;  %v937_v54 = vpack.c.bf16 %v6491_v42, %v757_v44  ;;  %1800 = vmatmul.bf16.vlgmr.msra.gmra.mxu3 %v1154_v49  ;;  %v4144_v33 = vadd.f32 -1.0, %v5703_v24  ;;  %v5412_v42 = vld [vmem:[#allocation10 + $0x1b0] sm:$0xff] }
 0x109   :  { %v4153_v18 = vadd.f32 -1.0, %v5705_v1  ;;  %v863_v41 = vmul.f32 1.442695, %v828_v39  ;;  %vm763_vm3 = vcmp.gt.f32.partialorder %v6376_v43, 0.0  ;;  %v841_v11 = vmul.f32 1.442695, %v817_v38 }
 0x10a   :  { %1854 = vmatpush.bf16.msrb.mxu3 %v5423_v5  ;;  %1076 = vmatmul.bf16.vlgmr.msrb.gmra.mxu1 %v937_v54  ;;  %v890_v47 = vmul.f32 1.6732632, %v4149_v6  ;;  %vm800_vm4 = vcmp.gt.f32.partialorder %v6480_v36, 0.0  ;;  %v859_v52 = vmul.f32 1.442695, %v826_v7  ;;  %v785_v20 = vsel %vm761_vm2, %v6315_v21, %v781_v17  ;;  %v5411_v21 = vld [vmem:[#allocation10 + $0x1a8] sm:$0xff] }
 0x10b   :  { %1814 = vmatmul.bf16.vlgmr.msrb.gmra.mxu0 %v1155_v10  ;;  %v5709_v45 = vpop.eup %5708  ;;  %5712 = vpow2.f32 %v863_v41  ;;  %1820 = vmatpush.bf16.msrb.mxu1 %v5413_v56  ;;  %v787_v13 = vsel %vm763_vm3, %v6376_v43, %v783_v8  ;;  %v885_v22 = vmul.f32 1.6732632, %v4144_v33  ;;  %v894_v14 = vmul.f32 1.6732632, %v4153_v18  ;;  %v5431_v43 = vld [vmem:[#allocation11 + $0x8] sm:$0xff]  ;;  %v5410_v1 = vld [vmem:[#allocation10 + $0x1a0] sm:$0xff] }
 0x10c   :  { %1839 = vmatpush.bf16.msrb.mxu2 %v5416_v27  ;;  %2013 = vmatpush.bf16.msra.mxu0 %v5433_v37  ;;  %v4150_v15 = vadd.f32 -1.0, %v5709_v45  ;;  %vm795_vm5 = vcmp.gt.f32.partialorder %v6455_v48, 0.0  ;;  %vm804_vm6 = vcmp.gt.f32.partialorder %v6467_v57, 0.0  ;;  %5714 = vpow2.f32 %v841_v11  ;;  %v5408_v56 = vld [vmem:[#allocation10 + $0x190] sm:$0xff]  ;;  %v5406_v54 = vld [vmem:[#allocation10 + $0x180] sm:$0xff]  ;;  %v5445_v18 = vld [vmem:[#allocation11 + $0x78] sm:$0xff] }
 0x10d   :  { %v5711_v19 = vpop.eup %5710  ;;  %v908_v25 = vsel %vm800_vm4, %v6480_v36, %v890_v47  ;;  %vm801_vm7 = vcmp.gt.f32.partialorder %v6502_v3, 0.0  ;;  %vm809_vm8 = vcmp.gt.f32.partialorder %v6504_v40, 0.0  ;;  %5716 = vpow2.f32 %v859_v52  ;;  %v5443_v45 = vld [vmem:[#allocation11 + $0x68] sm:$0xff]  ;;  %v5442_v11 = vld [vmem:[#allocation11 + $0x60] sm:$0xff]  ;;  %v5441_v47 = vld [vmem:[#allocation11 + $0x58] sm:$0xff] }
 0x10e   :  { %1855 = vmatpush.bf16.msrb.mxu3 %v5422_v59  ;;  %v891_v23 = vmul.f32 1.6732632, %v4150_v15  ;;  %v4158_v24 = vadd.f32 -1.0, %v5711_v19  ;;  %v789_v0 = vmul.f32 1.050701, %v785_v20  ;;  %v903_v30 = vsel %vm795_vm5, %v6455_v48, %v885_v22  ;;  %v5444_v59 = vld [vmem:[#allocation11 + $0x70] sm:$0xff] }
 0x10f   :  { %1821 = vmatpush.bf16.msrb.mxu1 %v5412_v42  ;;  %v791_v28 = vmul.f32 1.050701, %v787_v13  ;;  %v912_v36 = vsel %vm804_vm6, %v6467_v57, %v894_v14  ;;  %v926_v32 = vmul.f32 1.050701, %v908_v25  ;;  %vm810_vm9 = vcmp.gt.f32.partialorder %v6527_v4, 0.0  ;;  %v5438_v42 = vld [vmem:[#allocation11 + $0x40] sm:$0xff] }
 0x110   :  { %1840 = vmatpush.bf16.msrb.mxu2 %v5415_v60  ;;  %2014 = vmatpush.bf16.msra.mxu0 %v5432_v12  ;;  %v899_v31 = vmul.f32 1.6732632, %v4158_v24  ;;  %v909_v34 = vsel %vm801_vm7, %v6502_v3, %v891_v23  ;;  %v921_v61 = vmul.f32 1.050701, %v903_v30  ;;  %v930_v50 = vmul.f32 1.050701, %v912_v36 }
 0x111   :  { %v5713_v26 = vpop.eup %5712  ;;  %v927_v16 = vmul.f32 1.050701, %v909_v34  ;;  %v1878_v49 = vpack.c.bf16 %v791_v28, %v789_v0  ;;  %vm799_vm10 = vcmp.gt.f32.partialorder %v6519_v2, 0.0  ;;  %vm808_vm11 = vcmp.gt.f32.partialorder %v6525_v46, 0.0  ;;  %v4694_v12 = vld [vmem:[#allocation13 + $0xe0] sm:$0xf] }
 0x112   :  { %v917_v29 = vsel %vm809_vm8, %v6504_v40, %v899_v31  ;;  %v4159_v51 = vadd.f32 -1.0, %v5713_v26  ;;  %v5715_v5 = vpop.eup %5714  ;;  %v5409_v40 = vld [vmem:[#allocation10 + $0x198] sm:$0xff]  ;;  %v1152_v53 = vpack.c.bf16 %v930_v50, %v921_v61  ;;  %v5476_v15 = vld [vmem:[#allocation13 + $0xec] sm:$0xf0]  ;;  %v5474_v52 = vld [vmem:[#allocation13 + $0xe4] sm:$0xf] }
 0x113   :  { %v935_v27 = vmul.f32 1.050701, %v917_v29  ;;  %1822 = vmatpush.bf16.msrb.mxu1 %v5411_v21  ;;  %v5717_v44 = vpop.eup %5716  ;;  %v4148_v38 = vadd.f32 -1.0, %v5715_v5  ;;  %v4696_v19 = vld [vmem:[#allocation13 + $0xf0] sm:$0xf0] }
 0x114   :  { %1841 = vmatpush.bf16.msrb.mxu2 %v5414_v35  ;;  %2015 = vmatpush.bf16.msra.mxu0 %v5431_v43  ;;  %v900_v48 = vmul.f32 1.6732632, %v4159_v51  ;;  %v4157_v6 = vadd.f32 -1.0, %v5717_v44  ;;  %v4695_v35 = vor.u32 %v5476_v15, %v4694_v12  ;;  %v4699_v20 = vor.u32 %v5474_v52, %v4696_v19  ;;  %v4678_v13 = vld [vmem:[#allocation13 + $0xc0] sm:$0xf] }
 0x115   :  { %v1157_v57 = vpack.c.bf16 %v935_v27, %v926_v32  ;;  %v889_v37 = vmul.f32 1.6732632, %v4148_v38  ;;  %v5472_v22 = vld [vmem:[#allocation13 + $0xcc] sm:$0xf0]  ;;  %v5470_v14 = vld [vmem:[#allocation13 + $0xc4] sm:$0xf] }
 0x116   :  { %v918_v17 = vsel %vm810_vm9, %v6527_v4, %v900_v48  ;;  %v898_v8 = vmul.f32 1.6732632, %v4157_v6  ;;  %v5407_v4 = vld [vmem:[#allocation10 + $0x188] sm:$0xff]  ;;  %v4679_v23 = vor.u32 %v5472_v22, %v4678_v13  ;;  %v4680_v24 = vld [vmem:[#allocation13 + $0xd0] sm:$0xf0] }
 0x117   :  { %v936_v3 = vmul.f32 1.050701, %v918_v17  ;;  %1823 = vmatpush.bf16.msrb.mxu1 %v5410_v1  ;;  %1842 = vmatmul.bf16.vlgmr.msrb.gmra.mxu2 %v1157_v57  ;;  %v907_v10 = vsel %vm799_vm10, %v6519_v2, %v889_v37  ;;  %v5440_v2 = vld [vmem:[#allocation11 + $0x50] sm:$0xff]  ;;  %v4683_v25 = vor.u32 %v5470_v14, %v4680_v24  ;;  %v4662_v21 = vld [vmem:[#allocation13 + $0xa0] sm:$0xf] }
 0x118   :  { %2016 = vmatpush.bf16.msra.mxu0 %v5430_v55  ;;  %v916_v7 = vsel %vm808_vm11, %v6525_v46, %v898_v8  ;;  %v925_v60 = vmul.f32 1.050701, %v907_v10  ;;  %v5439_v46 = vld [vmem:[#allocation11 + $0x48] sm:$0xff]  ;;  %2655 = vmatpush.bf16.msra.mxu2 %v4695_v35  ;;  %v5468_v43 = vld [vmem:[#allocation13 + $0xac] sm:$0xf0]  ;;  %v6573_v57 = vld [vmem:[#allocation17] sm:$0xff] }
 0x119   :  { %v1158_v39 = vpack.c.bf16 %v936_v3, %v927_v16  ;;  %v934_v33 = vmul.f32 1.050701, %v916_v7  ;;  %v4663_v58 = vor.u32 %v5468_v43, %v4662_v21  ;;  %v4646_v26 = vld [vmem:[#allocation13 + $0x80] sm:$0xf]  ;;  %v5464_v0 = vld [vmem:[#allocation13 + $0x8c] sm:$0xf0] }
 0x11a   :  { %1772 = vmatmul.bf16.vlgmr.msra.gmra.mxu1 %v1152_v53  ;;  %v5462_v28 = vld [vmem:[#allocation13 + $0x84] sm:$0xf]  ;;  %v4647_v30 = vor.u32 %v5464_v0, %v4646_v26  ;;  %v4648_v36 = vld [vmem:[#allocation13 + $0x90] sm:$0xf0]  ;;  %v4822_v32 = vld [vmem:[#allocation13 + $0x1e0] sm:$0xf] }
 0x11b   :  { %2017 = vmatmul.bf16.vlgmr.msra.gmra.mxu0 %v1878_v49  ;;  %1824 = vmatpush.bf16.msrb.mxu1 %v5409_v40  ;;  %v1156_v41 = vpack.c.bf16 %v934_v33, %v925_v60  ;;  %v5508_v34 = vld [vmem:[#allocation13 + $0x1ec] sm:$0xf0]  ;;  %v4651_v29 = vor.u32 %v5462_v28, %v4648_v36  ;;  %v4630_v1 = vld [vmem:[#allocation13 + $0x60] sm:$0xf]  ;;  %v5458_v50 = vld [vmem:[#allocation13 + $0x64] sm:$0xf] }
 0x11c   :  { %1856 = vmatmul.bf16.vlgmr.msrb.gmra.mxu3 %v1158_v39  ;;  %2656 = vmatpush.bf16.msra.mxu2 %v4679_v23  ;;  %v4823_v51 = vor.u32 %v5508_v34, %v4822_v32  ;;  %v5460_v55 = vld [vmem:[#allocation13 + $0x6c] sm:$0xf0]  ;;  %v4632_v48 = vld [vmem:[#allocation13 + $0x70] sm:$0xf0]  ;;  %v4806_v5 = vld [vmem:[#allocation13 + $0x1c0] sm:$0xf] }
 0x11d   :  { %v4631_v61 = vor.u32 %v5460_v55, %v4630_v1  ;;  %v4635_v16 = vor.u32 %v5458_v50, %v4632_v48  ;;  %v5504_v44 = vld [vmem:[#allocation13 + $0x1cc] sm:$0xf0]  ;;  %v4614_v40 = vld [vmem:[#allocation13 + $0x40] sm:$0xf]  ;;  %v5454_v53 = vld [vmem:[#allocation13 + $0x44] sm:$0xf] }
 0x11e   :  { %2669 = vmatpush.bf16.msra.mxu3 %v4823_v51  ;;  %v4807_v3 = vor.u32 %v5504_v44, %v4806_v5  ;;  %v5456_v49 = vld [vmem:[#allocation13 + $0x4c] sm:$0xf0]  ;;  %v4616_v6 = vld [vmem:[#allocation13 + $0x50] sm:$0xf0]  ;;  %v4790_v39 = vld [vmem:[#allocation13 + $0x1a0] sm:$0xf] }
 0x11f   :  { %1825 = vmatpush.bf16.msrb.mxu1 %v5408_v56  ;;  %v4615_v38 = vor.u32 %v5456_v49, %v4614_v40  ;;  %v5500_v56 = vld [vmem:[#allocation13 + $0x1ac] sm:$0xf0]  ;;  %v971_v37 = vperm.slane %v6573_v57, 0  ;;  %v4619_v8 = vor.u32 %v5454_v53, %v4616_v6  ;;  %v4598_v10 = vld [vmem:[#allocation13 + $0x20] sm:$0xf]  ;;  %v1303_v48 = vperm.slane %v6573_v57, 1 }
 0x120   :  { %2657 = vmatpush.bf16.msra.mxu2 %v4663_v58  ;;  %v5452_v7 = vld [vmem:[#allocation13 + $0x2c] sm:$0xf0]  ;;  %v5446_v15 = vld [vmem:[#allocation13 + $0x4] sm:$0xf]  ;;  %v4584_v19 = vld [vmem:[#allocation13 + $0x10] sm:$0xf0] }
 0x121   :  { %v5448_v12 = vld [vmem:[#allocation13 + $0xc] sm:$0xf0]  ;;  %v4587_v14 = vor.u32 %v5446_v15, %v4584_v19  ;;  %v4950_v24 = vld [vmem:[#allocation13 + $0x2e0] sm:$0xf]  ;;  %v5506_v21 = vld [vmem:[#allocation13 + $0x1e4] sm:$0xf] }
 0x122   :  { %2670 = vmatpush.bf16.msra.mxu3 %v4807_v3  ;;  %v5492_v13 = vld [vmem:[#allocation13 + $0x16c] sm:$0xf0]  ;;  %v4824_v43 = vld [vmem:[#allocation13 + $0x1f0] sm:$0xf0]  ;;  %v5509_v28 = vld [vmem:[#allocation13 + $0x1f4] sm:$0xf0] }
 0x123   :  { %1826 = vmatpush.bf16.msrb.mxu1 %v5407_v4  ;;  %v4791_v4 = vor.u32 %v5500_v56, %v4790_v39  ;;  %v5488_v51 = vld [vmem:[#allocation13 + $0x14c] sm:$0xf0]  ;;  %v4934_v55 = vld [vmem:[#allocation13 + $0x2c0] sm:$0xf]  ;;  %v5502_v50 = vld [vmem:[#allocation13 + $0x1c4] sm:$0xf] }
 0x124   :  { %2658 = vmatpush.bf16.msra.mxu2 %v4647_v30  ;;  %v4742_v30 = vld [vmem:[#allocation13 + $0x140] sm:$0xf]  ;;  %v4808_v3 = vld [vmem:[#allocation13 + $0x1d0] sm:$0xf0]  ;;  %v4814_v40 = vld [vmem:[#allocation13 + $0x1c8] sm:$0xf] }
 0x125   :  { %v4743_v1 = vor.u32 %v5488_v51, %v4742_v30  ;;  %v4811_v49 = vor.u32 %v5502_v50, %v4808_v3  ;;  %v5505_v53 = vld [vmem:[#allocation13 + $0x1d4] sm:$0xf0]  ;;  %v5484_v6 = vld [vmem:[#allocation13 + $0x12c] sm:$0xf0]  ;;  %v4902_v19 = vld [vmem:[#allocation13 + $0x280] sm:$0xf] }
 0x126   :  { %2671 = vmatpush.bf16.msra.mxu3 %v4791_v4  ;;  %v4886_v51 = vld [vmem:[#allocation13 + $0x260] sm:$0xf]  ;;  %v4766_v3 = vld [vmem:[#allocation13 + $0x168] sm:$0xf] }
 0x127   :  { %1827 = vmatpush.bf16.msrb.mxu1 %v5406_v54  ;;  %v5450_v54 = vld [vmem:[#allocation13 + $0x24] sm:$0xf] }
 0x128   :  { %2659 = vmatpush.bf16.msra.mxu2 %v4631_v61  ;;  %v5536_v61 = vld [vmem:[#allocation13 + $0x2cc] sm:$0xf0] }
 0x129   :  { %v4935_v44 = vor.u32 %v5536_v61, %v4934_v55 }
 0x12a   :  { %1828 = vmatmul.bf16.vlgmr.msrb.gmra.mxu1 %v1156_v41  ;;  %v4600_v41 = vld [vmem:[#allocation13 + $0x30] sm:$0xf0] }
 0x12b   :  { %2023 = vmatpush.bf16.msra.mxu1 %v5445_v18  ;;  %v4599_v18 = vor.u32 %v5452_v7, %v4598_v10  ;;  %v4918_v10 = vld [vmem:[#allocation13 + $0x2a0] sm:$0xf]  ;;  %v5532_v7 = vld [vmem:[#allocation13 + $0x2ac] sm:$0xf0] }
 0x12c   :  { %2660 = vmatpush.bf16.msra.mxu2 %v4615_v38  ;;  %v4726_v38 = vld [vmem:[#allocation13 + $0x120] sm:$0xf] }
 0x12d   :  { %v4727_v4 = vor.u32 %v5484_v6, %v4726_v38  ;;  %v5493_v6 = vld [vmem:[#allocation13 + $0x174] sm:$0xf0] }
 0x12f   :  { %2024 = vmatpush.bf16.msra.mxu1 %v5444_v59  ;;  %v4774_v59 = vld [vmem:[#allocation13 + $0x180] sm:$0xf] }
 0x130   :  { %2661 = vmatpush.bf16.msra.mxu2 %v4599_v18  ;;  %v4919_v18 = vor.u32 %v5532_v7, %v4918_v10 }
 0x133   :  { %2025 = vmatpush.bf16.msra.mxu1 %v5443_v45  ;;  %v5496_v45 = vld [vmem:[#allocation13 + $0x18c] sm:$0xf0] }
 0x137   :  { %2026 = vmatpush.bf16.msra.mxu1 %v5442_v11 }
 0x13b   :  { %2027 = vmatpush.bf16.msra.mxu1 %v5441_v47  ;;  %v4603_v47 = vor.u32 %v5450_v54, %v4600_v41  ;;  %v5498_v54 = vld [vmem:[#allocation13 + $0x1a4] sm:$0xf]  ;;  %v4792_v41 = vld [vmem:[#allocation13 + $0x1b0] sm:$0xf0] }
 0x13f   :  { %2028 = vmatpush.bf16.msra.mxu1 %v5440_v2  ;;  %v4775_v2 = vor.u32 %v5496_v45, %v4774_v59  ;;  %v4795_v45 = vor.u32 %v5498_v54, %v4792_v41 }
 0x141   :  { %2672 = vmatpush.bf16.msra.mxu3 %v4775_v2 }
 0x143   :  { %2029 = vmatpush.bf16.msra.mxu1 %v5439_v46 }
 0x147   :  { %2030 = vmatpush.bf16.msra.mxu1 %v5438_v42  ;;  %v4582_v42 = vld [vmem:[#allocation13] sm:$0xf] }
 0x148   :  { %v4583_v35 = vor.u32 %v5448_v12, %v4582_v42  ;;  %v4710_v12 = vld [vmem:[#allocation13 + $0x100] sm:$0xf] }
 0x14a   :  { %2031 = vmatmul.bf16.vlgmr.msra.gmra.mxu1 %v1879_v9  ;;  %v4664_v9 = vld [vmem:[#allocation13 + $0xb0] sm:$0xf0]  ;;  %2662 = vmatpush.bf16.msra.mxu2 %v4583_v35  ;;  %v5480_v35 = vld [vmem:[#allocation13 + $0x10c] sm:$0xf0] }
 0x14b   :  { %2697 = vmatpush.bf16.msrb.mxu1 %v4699_v20  ;;  %v4667_v31 = vor.u32 %v5466_v63, %v4664_v9  ;;  %v4758_v20 = vld [vmem:[#allocation13 + $0x160] sm:$0xf]  ;;  %v4827_v9 = vor.u32 %v5506_v21, %v4824_v43  ;;  %v4776_v21 = vld [vmem:[#allocation13 + $0x190] sm:$0xf0] }
 0x14c   :  { %v4759_v23 = vor.u32 %v5492_v13, %v4758_v20  ;;  %v5528_v20 = vld [vmem:[#allocation13 + $0x28c] sm:$0xf0] }
 0x14e   :  { %2673 = vmatpush.bf16.msra.mxu3 %v4759_v23  ;;  %2711 = vmatpush.bf16.msrb.mxu2 %v4827_v9 }
 0x14f   :  { %2698 = vmatpush.bf16.msrb.mxu1 %v4683_v25  ;;  %v5540_v25 = vld [vmem:[#allocation13 + $0x2ec] sm:$0xf0] }
 0x150   :  { %v4951_v58 = vor.u32 %v5540_v25, %v4950_v24  ;;  %v4711_v24 = vor.u32 %v5480_v35, %v4710_v12  ;;  %v5494_v25 = vld [vmem:[#allocation13 + $0x184] sm:$0xf] }
 0x151   :  { %v4779_v9 = vor.u32 %v5494_v25, %v4776_v21  ;;  %v5530_v12 = vld [vmem:[#allocation13 + $0x2a4] sm:$0xf]  ;;  %v5516_v25 = vld [vmem:[#allocation13 + $0x22c] sm:$0xf0]  ;;  %v4734_v21 = vld [vmem:[#allocation13 + $0x128] sm:$0xf] }
 0x152   :  { %2683 = vmatpush.bf16.msrb.mxu0 %v4951_v58  ;;  %2674 = vmatpush.bf16.msra.mxu3 %v4743_v1  ;;  %v4903_v58 = vor.u32 %v5528_v20, %v4902_v19  ;;  %v5524_v1 = vld [vmem:[#allocation13 + $0x26c] sm:$0xf0] }
 0x153   :  { %2699 = vmatpush.bf16.msrb.mxu1 %v4667_v31  ;;  %v4830_v31 = vld [vmem:[#allocation13 + $0x1e8] sm:$0xf]  ;;  %2712 = vmatpush.bf16.msrb.mxu2 %v4811_v49  ;;  %v4887_v50 = vor.u32 %v5524_v1, %v4886_v51 }
 0x156   :  { %2684 = vmatpush.bf16.msrb.mxu0 %v4935_v44  ;;  %2675 = vmatpush.bf16.msra.mxu3 %v4727_v4  ;;  %v4760_v44 = vld [vmem:[#allocation13 + $0x170] sm:$0xf0]  ;;  %v4767_v4 = vor.u32 %v5493_v6, %v4766_v3 }
 0x157   :  { %2700 = vmatpush.bf16.msrb.mxu1 %v4651_v29  ;;  %v4831_v29 = vor.u32 %v5509_v28, %v4830_v31  ;;  %2713 = vmatpush.bf16.msrb.mxu2 %v4795_v45  ;;  %v4782_v31 = vld [vmem:[#allocation13 + $0x188] sm:$0xf]  ;;  %v4712_v3 = vld [vmem:[#allocation13 + $0x110] sm:$0xf0] }
 0x15a   :  { %2685 = vmatpush.bf16.msrb.mxu0 %v4919_v18  ;;  %2676 = vmatpush.bf16.msra.mxu3 %v4711_v24  ;;  %v4750_v18 = vld [vmem:[#allocation13 + $0x148] sm:$0xf]  ;;  %v4854_v24 = vld [vmem:[#allocation13 + $0x220] sm:$0xf] }
 0x15b   :  { %2701 = vmatpush.bf16.msrb.mxu1 %v4635_v16  ;;  %2714 = vmatpush.bf16.msrb.mxu2 %v4779_v9 }
 0x15e   :  { %2686 = vmatpush.bf16.msrb.mxu0 %v4903_v58 }
 0x15f   :  { %2702 = vmatpush.bf16.msrb.mxu1 %v4619_v8  ;;  %v4815_v8 = vor.u32 %v5505_v53, %v4814_v40 }
 0x162   :  { %2687 = vmatpush.bf16.msrb.mxu0 %v4887_v50  ;;  %v5512_v50 = vld [vmem:[#allocation13 + $0x20c] sm:$0xf0] }
 0x163   :  { %2703 = vmatpush.bf16.msrb.mxu1 %v4603_v47  ;;  %v5501_v47 = vld [vmem:[#allocation13 + $0x1b4] sm:$0xf0] }
 0x167   :  { %2704 = vmatpush.bf16.msrb.mxu1 %v4587_v14 }
 0x16b   :  { %2753 = vmatpush.bf16.msra.mxu1 %v4831_v29 }
 0x16f   :  { %2754 = vmatpush.bf16.msra.mxu1 %v4815_v8  ;;  %v4936_v8 = vld [vmem:[#allocation13 + $0x2d0] sm:$0xf0] }
 0x174   :  { %v6575_v17 = vpop.f32.mrf.mxu3 }
 0x176   :  { %v1759_v26 = vpop.f32.mrf.mxu0 }
 0x17a   :  { %v1091_v27 = vpop.f32.mrf.mxu2 }
 0x17c   :  { %v6580_v52 = vpop.f32.mrf.mxu3 }
 0x17d   :  { %v1748_v55 = vadd.f32 %v6580_v52, %v1303_v48  ;;  %v4870_v52 = vld [vmem:[#allocation13 + $0x240] sm:$0xf] }
 0x17e   :  { %v1761_v15 = vpop.f32.mrf.mxu0 }
 0x182   :  { %v1093_v33 = vpop.f32.mrf.mxu2 }
 0x187   :  { %v1077_v60 = vpop.f32.mrf.mxu1 }
 0x188   :  { %v1078_v11 = vadd.f32 %v1077_v60, %v971_v37  ;;  %v1746_v60 = vadd.f32 %v6575_v17, %v1303_v48  ;;  %v5520_v48 = vld [vmem:[#allocation13 + $0x24c] sm:$0xf0]  ;;  %v1815_v19 = vpop.f32.mrf.mxu0 }
 0x189   :  { %v4871_v54 = vor.u32 %v5520_v48, %v4870_v52 }
 0x18a   :  { %v6578_v46 = vadd.f32 %v1091_v27, %v1078_v11  ;;  %v6586_v27 = vpop.f32.mrf.mxu2  ;;  %v4798_v11 = vld [vmem:[#allocation13 + $0x1a8] sm:$0xf]  ;;  %v1760_v23 = vadd.f32 %v1759_v26, %v1746_v60  ;;  %v4952_v26 = vld [vmem:[#allocation13 + $0x2f0] sm:$0xf0] }
 0x18b   :  { %v4799_v17 = vor.u32 %v5501_v47, %v4798_v11  ;;  %v4744_v60 = vld [vmem:[#allocation13 + $0x150] sm:$0xf0]  ;;  %v1762_v11 = vadd.f32 %v1761_v15, %v1748_v55  ;;  %2688 = vmatpush.bf16.msrb.mxu0 %v4871_v54  ;;  %v4702_v54 = vld [vmem:[#allocation13 + $0xe8] sm:$0xf] }
 0x18c   :  { %v6583_v22 = vmul.f32 0.70710677, %v6578_v46  ;;  %v4728_v15 = vld [vmem:[#allocation13 + $0x130] sm:$0xf0] }
 0x18d   :  { %2755 = vmatpush.bf16.msra.mxu1 %v4799_v17  ;;  %v4920_v17 = vld [vmem:[#allocation13 + $0x2b0] sm:$0xf0] }
 0x18e   :  { %v1104_v63 = vand.u32 2147483647, %v6583_v22  ;;  %vm1100_vm12 = vcmp.ge.f32.partialorder %v6583_v22, 0.0 }
 0x18f   :  { %v1079_v0 = vpop.f32.mrf.mxu1 }
 0x190   :  { %v1106_v36 = vmul.f32 0.3275911, %v1104_v63  ;;  %v1130_v32 = vsub.f32 0.0, %v1104_v63  ;;  %v1080_v34 = vadd.f32 %v1079_v0, %v971_v37  ;;  %v6594_v37 = vpop.f32.mrf.mxu3  ;;  %v5497_v0 = vld [vmem:[#allocation13 + $0x194] sm:$0xf0] }
 0x192   :  { %v1108_v5 = vadd.f32 1.0, %v1106_v36  ;;  %v6589_v16 = vadd.f32 %v1093_v33, %v1080_v34  ;;  %v1132_v39 = vmul.f32 %v1130_v32, %v1104_v63  ;;  %v6608_v63 = vpop.f32.mrf.mxu2  ;;  %v4783_v36 = vor.u32 %v5497_v0, %v4782_v31  ;;  %v5538_v32 = vld [vmem:[#allocation13 + $0x2e4] sm:$0xf] }
 0x193   :  { %v4955_v29 = vor.u32 %v5538_v32, %v4952_v26  ;;  %v4855_v31 = vor.u32 %v5516_v25, %v4854_v24  ;;  %v1102_v24 = vsel %vm1100_vm12, 1.0, %v6109_v62 }
 0x194   :  { %5718 = vrcp.f32 %v1108_v5  ;;  %v6592_v56 = vmul.f32 0.70710677, %v6589_v16  ;;  %v6602_v2 = vmul.f32 1.442695, %v1132_v39  ;;  %v5490_v5 = vld [vmem:[#allocation13 + $0x164] sm:$0xf]  ;;  %2756 = vmatpush.bf16.msra.mxu1 %v4783_v36 }
 0x195   :  { %2725 = vmatpush.bf16.msrb.mxu3 %v4955_v29  ;;  %v4763_v38 = vor.u32 %v5490_v5, %v4760_v44  ;;  %v5534_v39 = vld [vmem:[#allocation13 + $0x2c4] sm:$0xf]  ;;  %v4904_v29 = vld [vmem:[#allocation13 + $0x290] sm:$0xf0]  ;;  %2689 = vmatpush.bf16.msrb.mxu0 %v4855_v31 }
 0x196   :  { %v6600_v33 = vand.u32 2147483647, %v6592_v56  ;;  %v4939_v10 = vor.u32 %v5534_v39, %v4936_v8  ;;  %v5478_v5 = vld [vmem:[#allocation13 + $0x104] sm:$0xf]  ;;  %v4856_v31 = vld [vmem:[#allocation13 + $0x230] sm:$0xf0] }
 0x197   :  { %v1773_v59 = vpop.f32.mrf.mxu1  ;;  %2715 = vmatpush.bf16.msrb.mxu2 %v4763_v38  ;;  %v4715_v8 = vor.u32 %v5478_v5, %v4712_v3  ;;  %vm1101_vm13 = vcmp.ge.f32.partialorder %v6592_v56, 0.0  ;;  %v4622_v56 = vld [vmem:[#allocation13 + $0x48] sm:$0xf] }
 0x198   :  { %v1107_v42 = vmul.f32 0.3275911, %v6600_v33  ;;  %v1131_v28 = vsub.f32 0.0, %v6600_v33  ;;  %v1774_v30 = vadd.f32 %v1773_v59, %v1760_v23  ;;  %v6616_v49 = vpop.f32.mrf.mxu3  ;;  %2757 = vmatpush.bf16.msra.mxu1 %v4767_v4  ;;  %v4923_v23 = vor.u32 %v5530_v12, %v4920_v17  ;;  %v5522_v4 = vld [vmem:[#allocation13 + $0x264] sm:$0xf] }
 0x199   :  { %2726 = vmatpush.bf16.msrb.mxu3 %v4939_v10  ;;  %v4872_v12 = vld [vmem:[#allocation13 + $0x250] sm:$0xf0] }
 0x19a   :  { %v6605_v13 = vpop.eup %5718  ;;  %v1109_v14 = vadd.f32 1.0, %v1107_v42  ;;  %v1788_v61 = vadd.f32 %v6586_v27, %v1774_v30  ;;  %v5486_v27 = vld [vmem:[#allocation13 + $0x144] sm:$0xf]  ;;  %v1133_v59 = vmul.f32 %v1131_v28, %v6600_v33  ;;  %v5489_v42 = vld [vmem:[#allocation13 + $0x154] sm:$0xf0]  ;;  %v1843_v9 = vpop.f32.mrf.mxu2 }
 0x19b   :  { %v1112_v43 = vmul.f32 1.0614054, %v6605_v13  ;;  %v4747_v47 = vor.u32 %v5486_v27, %v4744_v60  ;;  %v5485_v28 = vld [vmem:[#allocation13 + $0x134] sm:$0xf0] }
 0x19c   :  { %5720 = vrcp.f32 %v1109_v14  ;;  %v1802_v45 = vadd.f32 %v6594_v37, %v1788_v61  ;;  %v4751_v14 = vor.u32 %v5489_v42, %v4750_v18  ;;  %v5482_v37 = vld [vmem:[#allocation13 + $0x124] sm:$0xf]  ;;  %v1136_v30 = vmul.f32 1.442695, %v1133_v59  ;;  %v4838_v61 = vld [vmem:[#allocation13 + $0x200] sm:$0xf] }
 0x19d   :  { %v1114_v34 = vadd.f32 -1.4531521, %v1112_v43  ;;  %5722 = vpow2.f32 %v6602_v2  ;;  %2716 = vmatpush.bf16.msrb.mxu2 %v4747_v47  ;;  %v4731_v0 = vor.u32 %v5482_v37, %v4728_v15  ;;  %v4735_v26 = vor.u32 %v5485_v28, %v4734_v21  ;;  %2727 = vmatpush.bf16.msrb.mxu3 %v4923_v23  ;;  %v5477_v60 = vld [vmem:[#allocation13 + $0xf4] sm:$0xf0]  ;;  %v5518_v42 = vld [vmem:[#allocation13 + $0x244] sm:$0xf] }
 0x19e   :  { %v1816_v32 = vadd.f32 %v1815_v19, %v1802_v45  ;;  %2758 = vmatpush.bf16.msra.mxu1 %v4751_v14  ;;  %v4839_v39 = vor.u32 %v5512_v50, %v4838_v61  ;;  %v4703_v47 = vor.u32 %v5477_v60, %v4702_v54  ;;  %v4686_v19 = vld [vmem:[#allocation13 + $0xc8] sm:$0xf]  ;;  %5724 = vpow2.f32 %v1136_v30  ;;  %v5457_v60 = vld [vmem:[#allocation13 + $0x54] sm:$0xf0] }
 0x19f   :  { %v1116_v40 = vmul.f32 %v6605_v13, %v1114_v34  ;;  %v1775_v53 = vpop.f32.mrf.mxu1  ;;  %v5526_v34 = vld [vmem:[#allocation13 + $0x284] sm:$0xf]  ;;  %v4875_v21 = vor.u32 %v5518_v42, %v4872_v12  ;;  %v4670_v30 = vld [vmem:[#allocation13 + $0xa8] sm:$0xf]  ;;  %v4623_v12 = vor.u32 %v5457_v60, %v4622_v56  ;;  %v4688_v56 = vld [vmem:[#allocation13 + $0xd8] sm:$0xf0] }
 0x1a0   :  { %v1776_v33 = vadd.f32 %v1775_v53, %v1762_v11  ;;  %v4907_v55 = vor.u32 %v5526_v34, %v4904_v29  ;;  %v5481_v53 = vld [vmem:[#allocation13 + $0x114] sm:$0xf0]  ;;  %v1857_v6 = vpop.f32.mrf.mxu3  ;;  %2690 = vmatpush.bf16.msrb.mxu0 %v4839_v39  ;;  %v4654_v61 = vld [vmem:[#allocation13 + $0x88] sm:$0xf] }
 0x1a1   :  { %v1118_v7 = vadd.f32 1.4214138, %v1116_v40  ;;  %v4718_v40 = vld [vmem:[#allocation13 + $0x108] sm:$0xf]  ;;  %2717 = vmatpush.bf16.msrb.mxu2 %v4731_v0 }
 0x1a2   :  { %v6618_v41 = vpop.eup %5720  ;;  %v1790_v36 = vadd.f32 %v6608_v63, %v1776_v33  ;;  %v4719_v27 = vor.u32 %v5481_v53, %v4718_v40  ;;  %2759 = vmatpush.bf16.msra.mxu1 %v4735_v26  ;;  %2728 = vmatpush.bf16.msrb.mxu3 %v4907_v55  ;;  %v1845_v15 = vpop.f32.mrf.mxu2  ;;  %v4840_v55 = vld [vmem:[#allocation13 + $0x210] sm:$0xf0]  ;;  %v1096_v53 = vmul.f32 0.5, %v6578_v46  ;;  %v4958_v42 = vld [vmem:[#allocation13 + $0x2e8] sm:$0xf] }
 0x1a3   :  { %v1120_v35 = vmul.f32 %v6605_v13, %v1118_v7  ;;  %v1113_v20 = vmul.f32 1.0614054, %v6618_v41  ;;  %v5723_v10 = vpop.eup %5722  ;;  %v4888_v7 = vld [vmem:[#allocation13 + $0x270] sm:$0xf0] }
 0x1a4   :  { %v1804_v52 = vadd.f32 %v6616_v49, %v1790_v36  ;;  %v4891_v45 = vor.u32 %v5522_v4, %v4888_v7  ;;  %2739 = vmatpush.bf16.msra.mxu0 %v4703_v47  ;;  %v5469_v36 = vld [vmem:[#allocation13 + $0xb4] sm:$0xf0]  ;;  %v1097_v7 = vmul.f32 0.5, %v6589_v16  ;;  %v5539_v16 = vld [vmem:[#allocation13 + $0x2ec] sm:$0xf] }
 0x1a5   :  { %v1122_v43 = vadd.f32 -0.28449672, %v1120_v35  ;;  %v1115_v58 = vadd.f32 -1.4531521, %v1113_v20  ;;  %v1817_v35 = vpop.f32.mrf.mxu0  ;;  %2718 = vmatpush.bf16.msrb.mxu2 %v4715_v8  ;;  %v5473_v20 = vld [vmem:[#allocation13 + $0xd4] sm:$0xf0]  ;;  %v4671_v22 = vor.u32 %v5469_v36, %v4670_v30 }
 0x1a6   :  { %v1818_v14 = vadd.f32 %v1817_v35, %v1804_v52  ;;  %v4687_v23 = vor.u32 %v5473_v20, %v4686_v19  ;;  %2760 = vmatpush.bf16.msra.mxu1 %v4719_v27  ;;  %2729 = vmatpush.bf16.msrb.mxu3 %v4891_v45  ;;  %v4638_v8 = vld [vmem:[#allocation13 + $0x68] sm:$0xf]  ;;  %v5461_v4 = vld [vmem:[#allocation13 + $0x74] sm:$0xf0]  ;;  %v1912_v45 = vperm.slane %v6573_v57, 2 }
 0x1a7   :  { %v1124_v2 = vmul.f32 %v6605_v13, %v1122_v43  ;;  %v1117_v51 = vmul.f32 %v6618_v41, %v1115_v58  ;;  %v1829_v1 = vpop.f32.mrf.mxu1  ;;  %v4639_v27 = vor.u32 %v5461_v4, %v4638_v8  ;;  %v5541_v35 = vld [vmem:[#allocation13 + $0x2f4] sm:$0xf0]  ;;  %v4960_v19 = vld [vmem:[#allocation13 + $0x2f8] sm:$0xf0]  ;;  %v4590_v30 = vld [vmem:[#allocation13 + $0x8] sm:$0xf] }
 0x1a8   :  { %v1830_v44 = vadd.f32 %v1829_v1, %v1816_v32  ;;  %2740 = vmatpush.bf16.msra.mxu0 %v4687_v23  ;;  %v1859_v34 = vpop.f32.mrf.mxu3  ;;  %v5510_v1 = vld [vmem:[#allocation13 + $0x204] sm:$0xf]  ;;  %v4959_v57 = vor.u32 %v5541_v35, %v4958_v42  ;;  %v5449_v36 = vld [vmem:[#allocation13 + $0x14] sm:$0xf0]  ;;  %v4910_v4 = vld [vmem:[#allocation13 + $0x288] sm:$0xf] }
 0x1a9   :  { %v1126_v63 = vadd.f32 0.2548296, %v1124_v2  ;;  %v1119_v38 = vadd.f32 1.4214138, %v1117_v51  ;;  %v5725_v2 = vpop.eup %5724  ;;  %v5525_v42 = vld [vmem:[#allocation13 + $0x274] sm:$0xf0] }
 0x1aa   :  { %v1844_v48 = vadd.f32 %v1843_v9, %v1830_v44  ;;  %v5514_v9 = vld [vmem:[#allocation13 + $0x224] sm:$0xf]  ;;  %2730 = vmatpush.bf16.msrb.mxu3 %v4875_v21  ;;  %v5465_v44 = vld [vmem:[#allocation13 + $0x94] sm:$0xf0]  ;;  %v5467_v35 = vld [vmem:[#allocation13 + $0xac] sm:$0xf] }
 0x1ab   :  { %v1128_v18 = vmul.f32 %v6605_v13, %v1126_v63  ;;  %v1121_v59 = vmul.f32 %v6618_v41, %v1119_v38  ;;  %v4859_v29 = vor.u32 %v5514_v9, %v4856_v31  ;;  %v4655_v40 = vor.u32 %v5465_v44, %v4654_v61  ;;  %v5537_v21 = vld [vmem:[#allocation13 + $0x2d4] sm:$0xf0]  ;;  %v4944_v31 = vld [vmem:[#allocation13 + $0x2d8] sm:$0xf0] }
 0x1ac   :  { %v6632_v11 = vadd.f32 %v1857_v6, %v1844_v48  ;;  %2741 = vmatpush.bf16.msra.mxu0 %v4671_v22  ;;  %v4843_v38 = vor.u32 %v5510_v1, %v4840_v55  ;;  %v4926_v1 = vld [vmem:[#allocation13 + $0x2a8] sm:$0xf]  ;;  %v5533_v61 = vld [vmem:[#allocation13 + $0x2b4] sm:$0xf0] }
 0x1ad   :  { %v1138_v49 = vmul.f32 %v5723_v10, %v1128_v18  ;;  %v1123_v17 = vadd.f32 -0.28449672, %v1121_v59  ;;  %v2018_v47 = vpop.f32.mrf.mxu0 }
 0x1ae   :  { %v1864_v13 = vmin.f32 %v6632_v11, 0.0  ;;  %2731 = vmatpush.bf16.msrb.mxu3 %v4859_v29  ;;  %vm1862_vm14 = vcmp.gt.f32.partialorder %v6632_v11, 0.0 }
 0x1af   :  { %v1140_v25 = vsub.f32 1.0, %v1138_v49  ;;  %v1125_v33 = vmul.f32 %v6618_v41, %v1123_v17  ;;  %v1831_v37 = vpop.f32.mrf.mxu1 }
 0x1b0   :  { %v1866_v43 = vmul.f32 1.442695, %v1864_v13  ;;  %v1832_v58 = vadd.f32 %v1831_v37, %v1818_v14  ;;  %2742 = vmatpush.bf16.msra.mxu0 %v4655_v40  ;;  %v4606_v13 = vld [vmem:[#allocation13 + $0x28] sm:$0xf]  ;;  %v5453_v14 = vld [vmem:[#allocation13 + $0x34] sm:$0xf0]  ;;  %v4963_v37 = vor.u32 %v5539_v16, %v4960_v19 }
 0x1b1   :  { %v1142_v0 = vmul.f32 %v1140_v25, %v1102_v24  ;;  %v1127_v28 = vadd.f32 0.2548296, %v1125_v33  ;;  %v5475_v40 = vld [vmem:[#allocation13 + $0xec] sm:$0xf]  ;;  %v4672_v16 = vld [vmem:[#allocation13 + $0xb8] sm:$0xf0] }
 0x1b2   :  { %5726 = vpow2.f32 %v1866_v43  ;;  %v1846_v32 = vadd.f32 %v1845_v15, %v1832_v58  ;;  %2732 = vmatpush.bf16.msrb.mxu3 %v4843_v38  ;;  %v4942_v15 = vld [vmem:[#allocation13 + $0x2c8] sm:$0xf]  ;;  %v2019_v58 = vadd.f32 %v2018_v47, %v1912_v45 }
 0x1b3   :  { %v1129_v26 = vmul.f32 %v6618_v41, %v1127_v28  ;;  %v1144_v50 = vadd.f32 1.0, %v1142_v0  ;;  %v1103_v41 = vsel %vm1101_vm13, 1.0, %v6109_v62  ;;  %v4607_v0 = vor.u32 %v5453_v14, %v4606_v13 }
 0x1b4   :  { %v6641_v51 = vadd.f32 %v1859_v34, %v1846_v32  ;;  %2743 = vmatpush.bf16.msra.mxu0 %v4639_v27  ;;  %v4943_v29 = vor.u32 %v5537_v21, %v4942_v15  ;;  %v5463_v21 = vld [vmem:[#allocation13 + $0x8c] sm:$0xf] }
 0x1b5   :  { %v1139_v5 = vmul.f32 %v5725_v2, %v1129_v26  ;;  %v1146_v10 = vmul.f32 %v1144_v50, %v1096_v53  ;;  %v5531_v50 = vld [vmem:[#allocation13 + $0x2ac] sm:$0xf]  ;;  %v4704_v53 = vld [vmem:[#allocation13 + $0xf8] sm:$0xf0] }
 0x1b6   :  { %v1865_v3 = vmin.f32 %v6641_v51, 0.0  ;;  %vm1863_vm15 = vcmp.gt.f32.partialorder %v6641_v51, 0.0 }
 0x1b7   :  { %v1141_v63 = vsub.f32 1.0, %v1139_v5  ;;  %v1148_v18 = vpack.c.bf16 %v1146_v10, %v1146_v10  ;;  %v4591_v5 = vor.u32 %v5449_v36, %v4590_v30  ;;  %v5529_v10 = vld [vmem:[#allocation13 + $0x294] sm:$0xf0] }
 0x1b8   :  { %v5727_v6 = vpop.eup %5726  ;;  %v1868_v39 = vmul.f32 1.442695, %v1865_v3  ;;  %2744 = vmatpush.bf16.msra.mxu0 %v4623_v12  ;;  %v4928_v3 = vld [vmem:[#allocation13 + $0x2b8] sm:$0xf0]  ;;  %v5523_v12 = vld [vmem:[#allocation13 + $0x26c] sm:$0xf] }
 0x1b9   :  { %v1143_v52 = vmul.f32 %v1141_v63, %v1103_v41  ;;  %v4512_v48 = vadd.f32 -1.0, %v5727_v6  ;;  %v2059_v23 = vunpack.c.l.b16 %v1148_v18  ;;  %v4927_v6 = vor.u32 %v5533_v61, %v4926_v1  ;;  %v5513_v61 = vld [vmem:[#allocation13 + $0x214] sm:$0xf0] }
 0x1ba   :  { %5728 = vpow2.f32 %v1868_v39  ;;  %v4931_v8 = vor.u32 %v5531_v50, %v4928_v3  ;;  %v4911_v18 = vor.u32 %v5529_v10, %v4910_v4  ;;  %v5507_v10 = vld [vmem:[#allocation13 + $0x1ec] sm:$0xf] }
 0x1bb   :  { %v1145_v46 = vadd.f32 1.0, %v1143_v52  ;;  %v1872_v54 = vmul.f32 1.6732632, %v4512_v48  ;;  %v5527_v52 = vld [vmem:[#allocation13 + $0x28c] sm:$0xf]  ;;  %v4707_v48 = vor.u32 %v5475_v40, %v4704_v53 }
 0x1bc   :  { %2745 = vmatpush.bf16.msra.mxu0 %v4607_v0  ;;  %v5517_v0 = vld [vmem:[#allocation13 + $0x234] sm:$0xf0]  ;;  %v5455_v53 = vld [vmem:[#allocation13 + $0x4c] sm:$0xf] }
 0x1bd   :  { %v1147_v59 = vmul.f32 %v1145_v46, %v1097_v7  ;;  %v1874_v17 = vsel %vm1862_vm14, %v6632_v11, %v1872_v54  ;;  %v5535_v11 = vld [vmem:[#allocation13 + $0x2cc] sm:$0xf]  ;;  %v4912_v46 = vld [vmem:[#allocation13 + $0x298] sm:$0xf0] }
 0x1be   :  { %v1876_v33 = vmul.f32 1.050701, %v1874_v17  ;;  %v4947_v2 = vor.u32 %v5535_v11, %v4944_v31  ;;  %v5471_v54 = vld [vmem:[#allocation13 + $0xcc] sm:$0xf]  ;;  %v4915_v47 = vor.u32 %v5527_v52, %v4912_v46  ;;  %v4896_v17 = vld [vmem:[#allocation13 + $0x278] sm:$0xf0] }
 0x1bf   :  { %v1149_v49 = vpack.c.bf16 %v1147_v59, %v1147_v59  ;;  %v4894_v59 = vld [vmem:[#allocation13 + $0x268] sm:$0xf]  ;;  %v4832_v52 = vld [vmem:[#allocation13 + $0x1f8] sm:$0xf0] }
 0x1c0   :  { %v5729_v20 = vpop.eup %5728  ;;  %v2053_v26 = vpack.c.bf16 %v1876_v33, %v1876_v33  ;;  %2746 = vmatpush.bf16.msra.mxu0 %v4591_v5  ;;  %v4895_v14 = vor.u32 %v5525_v42, %v4894_v59  ;;  %v5519_v33 = vld [vmem:[#allocation13 + $0x24c] sm:$0xf]  ;;  %v4862_v11 = vld [vmem:[#allocation13 + $0x228] sm:$0xf]  ;;  %v4816_v59 = vld [vmem:[#allocation13 + $0x1d8] sm:$0xf0] }
 0x1c1   :  { %v2060_v24 = vunpack.c.l.b16 %v1149_v49  ;;  %v4513_v25 = vadd.f32 -1.0, %v5729_v20  ;;  %v4691_v49 = vor.u32 %v5471_v54, %v4688_v56  ;;  %v4863_v1 = vor.u32 %v5517_v0, %v4862_v11  ;;  %v4592_v42 = vld [vmem:[#allocation13 + $0x18] sm:$0xf0]  ;;  %v5557_v0 = vld [vmem:[#allocation14 + $0x74] sm:$0xf0] }
 0x1c2   :  { %v2065_v63 = vunpack.c.l.b16 %v2053_v26  ;;  %v5459_v26 = vld [vmem:[#allocation13 + $0x6c] sm:$0xf]  ;;  %v4835_v56 = vor.u32 %v5507_v10, %v4832_v52  ;;  %v5547_v10 = vld [vmem:[#allocation14 + $0x24] sm:$0xf0]  ;;  %v5150_v52 = vld [vmem:[#allocation14 + $0x170] sm:$0xf] }
 0x1c3   :  { %v6652_v43 = vpack.c.b16 %v2060_v24, %v2059_v23  ;;  %v1873_v9 = vmul.f32 1.6732632, %v4513_v25  ;;  %v4878_v23 = vld [vmem:[#allocation13 + $0x248] sm:$0xf]  ;;  %v4899_v24 = vor.u32 %v5523_v12, %v4896_v17  ;;  %v5521_v25 = vld [vmem:[#allocation13 + $0x254] sm:$0xf0] }
 0x1c4   :  { %v4800_v17 = vld [vmem:[#allocation13 + $0x1b8] sm:$0xf0] }
 0x1c5   :  { %v1875_v32 = vsel %vm1863_vm15, %v6641_v51, %v1873_v9  ;;  %2663 = vmatmul.bf16.vlgmr.msra.gmra.mxu2 %v6652_v43  ;;  %2705 = vmatmul.bf16.vlgmr.msrb.gmra.mxu1 %v6652_v43  ;;  %v2020_v51 = vpop.f32.mrf.mxu0  ;;  %v4879_v9 = vor.u32 %v5521_v25, %v4878_v23  ;;  %v4768_v23 = vld [vmem:[#allocation13 + $0x178] sm:$0xf0]  ;;  %v5487_v25 = vld [vmem:[#allocation13 + $0x14c] sm:$0xf] }
 0x1c6   :  { %v1877_v34 = vmul.f32 1.050701, %v1875_v32  ;;  %2767 = vmatpush.bf16.msra.mxu2 %v4959_v57  ;;  %2809 = vmatpush.bf16.msrb.mxu1 %v4963_v37  ;;  %v2021_v39 = vadd.f32 %v2020_v51, %v1912_v45  ;;  %v4880_v57 = vld [vmem:[#allocation13 + $0x258] sm:$0xf0]  ;;  %v4675_v37 = vor.u32 %v5467_v35, %v4672_v16  ;;  %v5511_v51 = vld [vmem:[#allocation13 + $0x20c] sm:$0xf] }
 0x1c7   :  { %v2032_v28 = vpop.f32.mrf.mxu1  ;;  %v4883_v31 = vor.u32 %v5519_v33, %v4880_v57  ;;  %v4864_v32 = vld [vmem:[#allocation13 + $0x238] sm:$0xf0] }
 0x1c8   :  { %v6656_v22 = vadd.f32 %v2032_v28, %v2019_v58  ;;  %v2054_v44 = vpack.c.bf16 %v1877_v34, %v1877_v34  ;;  %v4656_v58 = vld [vmem:[#allocation13 + $0x98] sm:$0xf0]  ;;  %v5515_v28 = vld [vmem:[#allocation13 + $0x22c] sm:$0xf] }
 0x1c9   :  { %v4659_v30 = vor.u32 %v5463_v21, %v4656_v58  ;;  %v4640_v34 = vld [vmem:[#allocation13 + $0x78] sm:$0xf0]  ;;  %v4867_v5 = vor.u32 %v5515_v28, %v4864_v32  ;;  %v5479_v58 = vld [vmem:[#allocation13 + $0x10c] sm:$0xf] }
 0x1ca   :  { %v2039_v55 = vmin.f32 %v6656_v22, 0.0  ;;  %v2066_v38 = vunpack.c.l.b16 %v2054_v44  ;;  %2768 = vmatpush.bf16.msra.mxu2 %v4943_v29  ;;  %2810 = vmatpush.bf16.msrb.mxu1 %v4947_v2  ;;  %vm2037_vm0 = vcmp.gt.f32.partialorder %v6656_v22, 0.0  ;;  %v4848_v44 = vld [vmem:[#allocation13 + $0x218] sm:$0xf0]  ;;  %v4643_v3 = vor.u32 %v5459_v26, %v4640_v34  ;;  %v5086_v26 = vld [vmem:[#allocation14 + $0xf0] sm:$0xf] }
 0x1cb   :  { %v4752_v33 = vld [vmem:[#allocation13 + $0x158] sm:$0xf0]  ;;  %v5573_v34 = vld [vmem:[#allocation14 + $0xf4] sm:$0xf0] }
 0x1cc   :  { %v2041_v41 = vmul.f32 1.442695, %v2039_v55  ;;  %v6661_v7 = vpack.c.b16 %v2066_v38, %v2065_v63  ;;  %v4846_v55 = vld [vmem:[#allocation13 + $0x208] sm:$0xf]  ;;  %v4755_v57 = vor.u32 %v5487_v25, %v4752_v33  ;;  %v5585_v33 = vld [vmem:[#allocation14 + $0x154] sm:$0xf0] }
 0x1cd   :  { %v4847_v63 = vor.u32 %v5513_v61, %v4846_v55  ;;  %v5078_v61 = vld [vmem:[#allocation14 + $0xe0] sm:$0xf] }
 0x1ce   :  { %5730 = vpow2.f32 %v2041_v41  ;;  %2677 = vmatmul.bf16.vlgmr.msra.gmra.mxu3 %v6661_v7  ;;  %2769 = vmatpush.bf16.msra.mxu2 %v4927_v6  ;;  %v4624_v41 = vld [vmem:[#allocation13 + $0x58] sm:$0xf0] }
 0x1cf   :  { %v2034_v27 = vpop.f32.mrf.mxu1  ;;  %2811 = vmatpush.bf16.msrb.mxu1 %v4931_v8  ;;  %2781 = vmatpush.bf16.msra.mxu3 %v4707_v48  ;;  %v4627_v8 = vor.u32 %v5455_v53, %v4624_v41  ;;  %v5451_v48 = vld [vmem:[#allocation13 + $0x2c] sm:$0xf]  ;;  %v5569_v53 = vld [vmem:[#allocation14 + $0xd4] sm:$0xf0] }
 0x1d0   :  { %v6663_v60 = vadd.f32 %v2034_v27, %v2021_v39  ;;  %v4851_v39 = vor.u32 %v5511_v51, %v4848_v44  ;;  %v4608_v27 = vld [vmem:[#allocation13 + $0x38] sm:$0xf0]  ;;  %v5551_v51 = vld [vmem:[#allocation14 + $0x44] sm:$0xf0] }
 0x1d2   :  { %v2040_v45 = vmin.f32 %v6663_v60, 0.0  ;;  %2770 = vmatpush.bf16.msra.mxu2 %v4911_v18  ;;  %vm2038_vm1 = vcmp.gt.f32.partialorder %v6663_v60, 0.0  ;;  %v5503_v18 = vld [vmem:[#allocation13 + $0x1cc] sm:$0xf] }
 0x1d3   :  { %2812 = vmatpush.bf16.msrb.mxu1 %v4915_v47  ;;  %2782 = vmatpush.bf16.msra.mxu3 %v4691_v49  ;;  %v5447_v47 = vld [vmem:[#allocation13 + $0xc] sm:$0xf]  ;;  %v4819_v12 = vor.u32 %v5503_v18, %v4816_v59 }
 0x1d4   :  { %v5731_v19 = vpop.eup %5730  ;;  %v2043_v20 = vmul.f32 1.442695, %v2040_v45  ;;  %v4611_v45 = vor.u32 %v5451_v48, %v4608_v27  ;;  %v5499_v49 = vld [vmem:[#allocation13 + $0x1ac] sm:$0xf]  ;;  %v4595_v35 = vor.u32 %v5447_v47, %v4592_v42  ;;  %v5589_v27 = vld [vmem:[#allocation14 + $0x174] sm:$0xf0] }
 0x1d5   :  { %v4578_v13 = vadd.f32 -1.0, %v5731_v19  ;;  %2719 = vmatmul.bf16.vlgmr.msrb.gmra.mxu2 %v6661_v7  ;;  %2761 = vmatmul.bf16.vlgmr.msra.gmra.mxu1 %v6661_v7  ;;  %v4803_v16 = vor.u32 %v5499_v49, %v4800_v17  ;;  %v5495_v19 = vld [vmem:[#allocation13 + $0x18c] sm:$0xf]  ;;  %v5545_v47 = vld [vmem:[#allocation14 + $0x14] sm:$0xf0] }
 0x1d6   :  { %5732 = vpow2.f32 %v2043_v20  ;;  %2771 = vmatpush.bf16.msra.mxu2 %v4895_v14  ;;  %v4784_v20 = vld [vmem:[#allocation13 + $0x198] sm:$0xf0]  ;;  %v5491_v14 = vld [vmem:[#allocation13 + $0x16c] sm:$0xf]  ;;  %v5587_v49 = vld [vmem:[#allocation14 + $0x164] sm:$0xf0] }
 0x1d7   :  { %v2047_v15 = vmul.f32 1.6732632, %v4578_v13  ;;  %2813 = vmatpush.bf16.msrb.mxu1 %v4899_v24  ;;  %2783 = vmatpush.bf16.msra.mxu3 %v4675_v37  ;;  %v4787_v13 = vor.u32 %v5495_v19, %v4784_v20  ;;  %v4771_v24 = vor.u32 %v5491_v14, %v4768_v23  ;;  %v5483_v37 = vld [vmem:[#allocation13 + $0x12c] sm:$0xf]  ;;  %v5806_v19 = vld [vmem:[#allocation17] sm:$0xff] }
 0x1d8   :  { %v2171_v20 = vperm.slane %v5806_v19, 3  ;;  %v4966_v14 = vld [vmem:[#allocation14] sm:$0xf]  ;;  %v5543_v23 = vld [vmem:[#allocation14 + $0x4] sm:$0xf0] }
 0x1d9   :  { %v2049_v36 = vsel %vm2037_vm0, %v6656_v22, %v2047_v15  ;;  %v4736_v15 = vld [vmem:[#allocation13 + $0x138] sm:$0xf0]  ;;  %v4967_v25 = vor.u32 %v5543_v23, %v4966_v14 }
 0x1da   :  { %2772 = vmatpush.bf16.msra.mxu2 %v4879_v9  ;;  %v2051_v50 = vmul.f32 1.050701, %v2049_v36  ;;  %v4739_v21 = vor.u32 %v5483_v37, %v4736_v15  ;;  %v4720_v9 = vld [vmem:[#allocation13 + $0x118] sm:$0xf0]  ;;  %v5555_v36 = vld [vmem:[#allocation14 + $0x64] sm:$0xf0] }
 0x1db   :  { %2814 = vmatpush.bf16.msrb.mxu1 %v4883_v31  ;;  %2784 = vmatpush.bf16.msra.mxu3 %v4659_v30  ;;  %v4723_v11 = vor.u32 %v5479_v58, %v4720_v9  ;;  %v5022_v31 = vld [vmem:[#allocation14 + $0x70] sm:$0xf]  ;;  %v5014_v30 = vld [vmem:[#allocation14 + $0x60] sm:$0xf]  ;;  %v5024_v37 = vld [vmem:[#allocation14 + $0x78] sm:$0xf0] }
 0x1dc   :  { %v5733_v29 = vpop.eup %5732  ;;  %v2055_v38 = vpack.c.bf16 %v2051_v50, %v2051_v50  ;;  %v5023_v28 = vor.u32 %v5557_v0, %v5022_v31  ;;  %v5015_v32 = vor.u32 %v5555_v36, %v5014_v30  ;;  %v5571_v50 = vld [vmem:[#allocation14 + $0xe4] sm:$0xf0]  ;;  %v5561_v31 = vld [vmem:[#allocation14 + $0x94] sm:$0xf0]  ;;  %v5126_v36 = vld [vmem:[#allocation14 + $0x140] sm:$0xf] }
 0x1dd   :  { %v4579_v2 = vadd.f32 -1.0, %v5733_v29  ;;  %v5087_v29 = vor.u32 %v5573_v34, %v5086_v26  ;;  %v6678_v15 = vld [vmem:[#allocation17 + $0x8] sm:$0xff] }
 0x1de   :  { %2773 = vmatpush.bf16.msra.mxu2 %v4863_v1  ;;  %v2071_v46 = vunpack.c.l.b16 %v2055_v38  ;;  %v5553_v1 = vld [vmem:[#allocation14 + $0x54] sm:$0xf0]  ;;  %v2172_v26 = vperm.slane %v6678_v15, 3 }
 0x1df   :  { %v2048_v40 = vmul.f32 1.6732632, %v4579_v2  ;;  %2815 = vmatpush.bf16.msrb.mxu1 %v4867_v5  ;;  %2785 = vmatpush.bf16.msra.mxu3 %v4643_v3  ;;  %v5006_v2 = vld [vmem:[#allocation14 + $0x50] sm:$0xf]  ;;  %v5079_v5 = vor.u32 %v5571_v50, %v5078_v61  ;;  %v5554_v61 = vld [vmem:[#allocation14 + $0x64] sm:$0xf] }
 0x1e0   :  { %v5007_v55 = vor.u32 %v5553_v1, %v5006_v2  ;;  %v5016_v50 = vld [vmem:[#allocation14 + $0x68] sm:$0xf0] }
 0x1e1   :  { %v2050_v22 = vsel %vm2038_vm1, %v6663_v60, %v2048_v40  ;;  %v5070_v40 = vld [vmem:[#allocation14 + $0xd0] sm:$0xf] }
 0x1e2   :  { %v2052_v6 = vmul.f32 1.050701, %v2050_v22  ;;  %2774 = vmatpush.bf16.msra.mxu2 %v4847_v63  ;;  %v5071_v41 = vor.u32 %v5569_v53, %v5070_v40  ;;  %v4990_v22 = vld [vmem:[#allocation14 + $0x30] sm:$0xf]  ;;  %v5549_v63 = vld [vmem:[#allocation14 + $0x34] sm:$0xf0] }
 0x1e3   :  { %2816 = vmatpush.bf16.msrb.mxu1 %v4851_v39  ;;  %2786 = vmatpush.bf16.msra.mxu3 %v4627_v8  ;;  %v4991_v38 = vor.u32 %v5549_v63, %v4990_v22  ;;  %v5567_v39 = vld [vmem:[#allocation14 + $0xc4] sm:$0xf0]  ;;  %v5572_v40 = vld [vmem:[#allocation14 + $0xf4] sm:$0xf]  ;;  %v5088_v53 = vld [vmem:[#allocation14 + $0xf8] sm:$0xf0] }
 0x1e4   :  { %v2056_v4 = vpack.c.bf16 %v2052_v6, %v2052_v6  ;;  %v5062_v6 = vld [vmem:[#allocation14 + $0xc0] sm:$0xf] }
 0x1e5   :  { %v5063_v8 = vor.u32 %v5567_v39, %v5062_v6  ;;  %v5118_v6 = vld [vmem:[#allocation14 + $0x130] sm:$0xf] }
 0x1e6   :  { %v2072_v54 = vunpack.c.l.b16 %v2056_v4  ;;  %3421 = vmatpush.bf16.msrb.mxu2 %v5023_v28  ;;  %v4982_v4 = vld [vmem:[#allocation14 + $0x20] sm:$0xf] }
 0x1e7   :  { %2787 = vmatpush.bf16.msra.mxu3 %v4611_v45  ;;  %v4983_v48 = vor.u32 %v5547_v10, %v4982_v4  ;;  %v4974_v45 = vld [vmem:[#allocation14 + $0x10] sm:$0xf]  ;;  %v5581_v10 = vld [vmem:[#allocation14 + $0x134] sm:$0xf0] }
 0x1e8   :  { %v2073_v60 = vpack.c.b16 %v2072_v54, %v2071_v46  ;;  %v5151_v54 = vor.u32 %v5589_v27, %v5150_v52  ;;  %v4975_v42 = vor.u32 %v5545_v47, %v4974_v45  ;;  %v5552_v52 = vld [vmem:[#allocation14 + $0x54] sm:$0xf]  ;;  %v6684_v45 = vld [vmem:[#allocation17 + $0x18] sm:$0xff] }
 0x1ea   :  { %2691 = vmatmul.bf16.vlgmr.msrb.gmra.mxu0 %v2073_v60  ;;  %2733 = vmatmul.bf16.vlgmr.msrb.gmra.mxu3 %v2073_v60 }
 0x1eb   :  { %2795 = vmatpush.bf16.msrb.mxu0 %v4835_v56  ;;  %2775 = vmatmul.bf16.vlgmr.msra.gmra.mxu2 %v2073_v60  ;;  %v5054_v56 = vld [vmem:[#allocation14 + $0xb0] sm:$0xf] }
 0x1ec   :  { %2817 = vmatmul.bf16.vlgmr.msrb.gmra.mxu1 %v2073_v60  ;;  %2788 = vmatpush.bf16.msra.mxu3 %v4595_v35  ;;  %v5565_v60 = vld [vmem:[#allocation14 + $0xb4] sm:$0xf0]  ;;  %v5046_v35 = vld [vmem:[#allocation14 + $0xa0] sm:$0xf] }
 0x1ed   :  { %3422 = vmatpush.bf16.msrb.mxu2 %v5015_v32  ;;  %v5055_v59 = vor.u32 %v5565_v60, %v5054_v56  ;;  %v5583_v32 = vld [vmem:[#allocation14 + $0x144] sm:$0xf0]  ;;  %v5008_v56 = vld [vmem:[#allocation14 + $0x58] sm:$0xf0] }
 0x1ee   :  { %v5127_v2 = vor.u32 %v5583_v32, %v5126_v36  ;;  %v5011_v47 = vor.u32 %v5552_v52, %v5008_v56  ;;  %v5568_v32 = vld [vmem:[#allocation14 + $0xd4] sm:$0xf]  ;;  %v4992_v52 = vld [vmem:[#allocation14 + $0x38] sm:$0xf0] }
 0x1ef   :  { %2796 = vmatpush.bf16.msrb.mxu0 %v4819_v12  ;;  %v5142_v12 = vld [vmem:[#allocation14 + $0x160] sm:$0xf] }
 0x1f0   :  { %3435 = vmatpush.bf16.msrb.mxu3 %v5087_v29  ;;  %v5143_v17 = vor.u32 %v5587_v49, %v5142_v12  ;;  %v5080_v12 = vld [vmem:[#allocation14 + $0xe8] sm:$0xf0] }
 0x1f1   :  { %3423 = vmatpush.bf16.msrb.mxu2 %v5007_v55 }
 0x1f3   :  { %2797 = vmatpush.bf16.msrb.mxu0 %v4803_v16  ;;  %v5563_v16 = vld [vmem:[#allocation14 + $0xa4] sm:$0xf0] }
 0x1f4   :  { %3436 = vmatpush.bf16.msrb.mxu3 %v5079_v5 }
 0x1f7   :  { %2798 = vmatpush.bf16.msrb.mxu0 %v4787_v13  ;;  %v5047_v13 = vor.u32 %v5563_v16, %v5046_v35  ;;  %v5110_v16 = vld [vmem:[#allocation14 + $0x120] sm:$0xf] }
 0x1f8   :  { %3437 = vmatpush.bf16.msrb.mxu3 %v5071_v41 }
 0x1fa   :  { %2747 = vmatmul.bf16.vlgmr.msra.gmra.mxu0 %v6652_v43  ;;  %2789 = vmatmul.bf16.vlgmr.msra.gmra.mxu3 %v6652_v43 }
 0x1fb   :  { %2799 = vmatpush.bf16.msrb.mxu0 %v4771_v24  ;;  %v5134_v24 = vld [vmem:[#allocation14 + $0x150] sm:$0xf] }
 0x1fc   :  { %3438 = vmatpush.bf16.msrb.mxu3 %v5063_v8  ;;  %v5135_v58 = vor.u32 %v5585_v33, %v5134_v24  ;;  %v2174_v33 = vperm.slane %v6684_v45, 3 }
 0x1ff   :  { %2800 = vmatpush.bf16.msrb.mxu0 %v4755_v57  ;;  %v5556_v57 = vld [vmem:[#allocation14 + $0x74] sm:$0xf] }
 0x200   :  { %3439 = vmatpush.bf16.msrb.mxu3 %v5055_v59  ;;  %v5027_v9 = vor.u32 %v5556_v57, %v5024_v37  ;;  %v5550_v37 = vld [vmem:[#allocation14 + $0x44] sm:$0xf] }
 0x203   :  { %2801 = vmatpush.bf16.msrb.mxu0 %v4739_v21 }
 0x204   :  { %3440 = vmatpush.bf16.msrb.mxu3 %v5047_v13  ;;  %v5579_v13 = vld [vmem:[#allocation14 + $0x124] sm:$0xf0] }
 0x205   :  { %v5111_v57 = vor.u32 %v5579_v13, %v5110_v16  ;;  %v5094_v13 = vld [vmem:[#allocation14 + $0x100] sm:$0xf] }
 0x207   :  { %2802 = vmatpush.bf16.msrb.mxu0 %v4723_v11  ;;  %v5038_v11 = vld [vmem:[#allocation14 + $0x90] sm:$0xf] }
 0x208   :  { %v5039_v28 = vor.u32 %v5561_v31, %v5038_v11  ;;  %v5000_v11 = vld [vmem:[#allocation14 + $0x48] sm:$0xf0] }
 0x209   :  { %v5003_v36 = vor.u32 %v5550_v37, %v5000_v11 }
 0x20a   :  { %2803 = vmatmul.bf16.vlgmr.msrb.gmra.mxu0 %v6661_v7  ;;  %v4998_v7 = vld [vmem:[#allocation14 + $0x40] sm:$0xf]  ;;  %3441 = vmatpush.bf16.msrb.mxu3 %v5039_v28 }
 0x20b   :  { %v4999_v44 = vor.u32 %v5551_v51, %v4998_v7  ;;  %3449 = vmatpush.bf16.msra.mxu0 %v5151_v54  ;;  %v5019_v51 = vor.u32 %v5554_v61, %v5016_v50  ;;  %v5119_v54 = vor.u32 %v5581_v10, %v5118_v6 }
 0x20d   :  { %3424 = vmatpush.bf16.msrb.mxu2 %v4999_v44  ;;  %v5030_v44 = vld [vmem:[#allocation14 + $0x80] sm:$0xf] }
 0x20f   :  { %3450 = vmatpush.bf16.msra.mxu0 %v5143_v17 }
 0x211   :  { %3425 = vmatpush.bf16.msrb.mxu2 %v4991_v38  ;;  %v5091_v38 = vor.u32 %v5572_v40, %v5088_v53 }
 0x213   :  { %3451 = vmatpush.bf16.msra.mxu0 %v5135_v58 }
 0x215   :  { %3426 = vmatpush.bf16.msrb.mxu2 %v4983_v48 }
 0x217   :  { %3452 = vmatpush.bf16.msra.mxu0 %v5127_v2 }
 0x219   :  { %3427 = vmatpush.bf16.msrb.mxu2 %v4975_v42  ;;  %v5570_v42 = vld [vmem:[#allocation14 + $0xe4] sm:$0xf] }
 0x21b   :  { %3453 = vmatpush.bf16.msra.mxu0 %v5119_v54 }
 0x21d   :  { %3428 = vmatpush.bf16.msrb.mxu2 %v4967_v25 }
 0x21f   :  { %3454 = vmatpush.bf16.msra.mxu0 %v5111_v57 }
 0x221   :  { %3477 = vmatpush.bf16.msra.mxu2 %v5027_v9 }
 0x225   :  { %3478 = vmatpush.bf16.msra.mxu2 %v5019_v51 }
 0x229   :  { %3479 = vmatpush.bf16.msra.mxu2 %v5011_v47 }
 0x22d   :  { %3480 = vmatpush.bf16.msra.mxu2 %v5003_v36 }
 0x242   :  { %v2706_v21 = vpop.f32.mrf.mxu1 }
 0x243   :  { %v2707_v5 = vadd.f32 %v2706_v21, %v2172_v26 }
 0x248   :  { %v2664_v3 = vpop.f32.mrf.mxu2 }
 0x249   :  { %v2665_v0 = vadd.f32 %v2664_v3, %v2171_v20  ;;  %v5559_v3 = vld [vmem:[#allocation14 + $0x84] sm:$0xf0] }
 0x24a   :  { %v5031_v63 = vor.u32 %v5559_v3, %v5030_v44  ;;  %v2708_v39 = vpop.f32.mrf.mxu1 }
 0x24b   :  { %v2709_v14 = vadd.f32 %v2708_v39, %v2172_v26 }
 0x24c   :  { %3442 = vmatpush.bf16.msrb.mxu3 %v5031_v63 }
 0x250   :  { %v6676_v18 = vpop.f32.mrf.mxu2  ;;  %3491 = vmatpush.bf16.msra.mxu3 %v5091_v38  ;;  %v5548_v38 = vld [vmem:[#allocation14 + $0x34] sm:$0xf] }
 0x251   :  { %v2678_v46 = vpop.f32.mrf.mxu3  ;;  %v2667_v8 = vadd.f32 %v6676_v18, %v2171_v20  ;;  %v5083_v20 = vor.u32 %v5570_v42, %v5080_v12  ;;  %v4995_v47 = vor.u32 %v5548_v38, %v4992_v52  ;;  %v5214_v42 = vld [vmem:[#allocation14 + $0x1f0] sm:$0xf] }
 0x252   :  { %v2679_v34 = vadd.f32 %v2678_v46, %v2665_v0  ;;  %v6682_v46 = vld [vmem:[#allocation17 + $0x10] sm:$0xff]  ;;  %v2762_v2 = vpop.f32.mrf.mxu1 }
 0x253   :  { %v2173_v25 = vperm.slane %v6682_v46, 3  ;;  %3481 = vmatpush.bf16.msra.mxu2 %v4995_v47  ;;  %v5152_v46 = vld [vmem:[#allocation14 + $0x178] sm:$0xf0] }
 0x254   :  { %3492 = vmatpush.bf16.msra.mxu3 %v5083_v20 }
 0x258   :  { %v2720_v29 = vpop.f32.mrf.mxu2 }
 0x259   :  { %v2680_v30 = vpop.f32.mrf.mxu3  ;;  %v2721_v41 = vadd.f32 %v2720_v29, %v2707_v5  ;;  %v5072_v29 = vld [vmem:[#allocation14 + $0xd8] sm:$0xf0]  ;;  %v5102_v5 = vld [vmem:[#allocation14 + $0x110] sm:$0xf] }
 0x25a   :  { %v2681_v60 = vadd.f32 %v2680_v30, %v2667_v8  ;;  %v2764_v11 = vpop.f32.mrf.mxu1 }
 0x260   :  { %v2722_v17 = vpop.f32.mrf.mxu2 }
 0x261   :  { %v2723_v21 = vadd.f32 %v2722_v17, %v2709_v14  ;;  %v5064_v17 = vld [vmem:[#allocation14 + $0xc8] sm:$0xf0]  ;;  %v5575_v14 = vld [vmem:[#allocation14 + $0x104] sm:$0xf0] }
 0x267   :  { %v2692_v1 = vpop.f32.mrf.mxu0 }
 0x268   :  { %v2693_v55 = vadd.f32 %v2692_v1, %v2679_v34 }
 0x26a   :  { %v2831_v7 = vmul.f32 0.70710677, %v2693_v55  ;;  %v6688_v31 = vmul.f32 0.5, %v2693_v55  ;;  %v5075_v55 = vor.u32 %v5568_v32, %v5072_v29  ;;  %v4984_v29 = vld [vmem:[#allocation14 + $0x28] sm:$0xf0] }
 0x26c   :  { %v2855_v22 = vand.u32 2147483647, %v2831_v7  ;;  %vm2839_vm2 = vcmp.ge.f32.partialorder %v2831_v7, 0.0  ;;  %v5577_v7 = vld [vmem:[#allocation14 + $0x114] sm:$0xf0]  ;;  %3493 = vmatpush.bf16.msra.mxu3 %v5075_v55 }
 0x26d   :  { %v2734_v4 = vpop.f32.mrf.mxu3  ;;  %v6691_v0 = vsel %vm2839_vm2, 1.0, %v6109_v62  ;;  %v5103_v10 = vor.u32 %v5577_v7, %v5102_v5 }
 0x26e   :  { %v2863_v48 = vmul.f32 0.3275911, %v2855_v22  ;;  %v2735_v27 = vadd.f32 %v2734_v4, %v2721_v41  ;;  %v2959_v18 = vsub.f32 0.0, %v2855_v22  ;;  %v2776_v8 = vpop.f32.mrf.mxu2 }
 0x26f   :  { %v2694_v59 = vpop.f32.mrf.mxu0  ;;  %3455 = vmatpush.bf16.msra.mxu0 %v5103_v10 }
 0x270   :  { %v2871_v49 = vadd.f32 1.0, %v2863_v48  ;;  %v2832_v35 = vmul.f32 0.70710677, %v2735_v27  ;;  %v2695_v19 = vadd.f32 %v2694_v59, %v2681_v60  ;;  %v2967_v15 = vmul.f32 %v2959_v18, %v2855_v22  ;;  %v5566_v18 = vld [vmem:[#allocation14 + $0xc4] sm:$0xf] }
 0x271   :  { %v6695_v3 = vmul.f32 0.5, %v2735_v27 }
 0x272   :  { %5734 = vrcp.f32 %v2871_v49  ;;  %v2856_v23 = vand.u32 2147483647, %v2832_v35  ;;  %v2835_v24 = vmul.f32 0.70710677, %v2695_v19  ;;  %vm2840_vm3 = vcmp.ge.f32.partialorder %v2832_v35, 0.0 }
 0x273   :  { %v2975_v44 = vmul.f32 1.442695, %v2967_v15  ;;  %v6702_v41 = vsel %vm2840_vm3, 1.0, %v6109_v62  ;;  %v6706_v6 = vmul.f32 0.5, %v2695_v19  ;;  %v5605_v49 = vld [vmem:[#allocation14 + $0x1f4] sm:$0xf0]  ;;  %v5067_v15 = vor.u32 %v5566_v18, %v5064_v17 }
 0x274   :  { %v2864_v58 = vmul.f32 0.3275911, %v2856_v23  ;;  %v2960_v9 = vsub.f32 0.0, %v2856_v23  ;;  %v2859_v28 = vand.u32 2147483647, %v2835_v24  ;;  %vm2843_vm4 = vcmp.ge.f32.partialorder %v2835_v24, 0.0 }
 0x275   :  { %v2736_v30 = vpop.f32.mrf.mxu3  ;;  %v6710_v39 = vsel %vm2843_vm4, 1.0, %v6109_v62  ;;  %v5215_v37 = vor.u32 %v5605_v49, %v5214_v42  ;;  %3494 = vmatpush.bf16.msra.mxu3 %v5067_v15  ;;  %v5206_v15 = vld [vmem:[#allocation14 + $0x1e0] sm:$0xf] }
 0x276   :  { %v2872_v26 = vadd.f32 1.0, %v2864_v58  ;;  %v2737_v34 = vadd.f32 %v2736_v30, %v2723_v21  ;;  %v2968_v1 = vmul.f32 %v2960_v9, %v2856_v23  ;;  %v2867_v61 = vmul.f32 0.3275911, %v2859_v28 }
 0x277   :  { %v2748_v50 = vpop.f32.mrf.mxu0  ;;  %v2963_v54 = vsub.f32 0.0, %v2859_v28  ;;  %3463 = vmatpush.bf16.msra.mxu1 %v5215_v37 }
 0x278   :  { %v6693_v51 = vpop.eup %5734  ;;  %5736 = vrcp.f32 %v2872_v26  ;;  %v6697_v40 = vmul.f32 0.70710677, %v2737_v34  ;;  %v2875_v22 = vadd.f32 1.0, %v2867_v61  ;;  %v2749_v63 = vadd.f32 %v2748_v50, %v2173_v25 }
 0x279   :  { %v2887_v53 = vmul.f32 1.0614054, %v6693_v51  ;;  %v2977_v27 = vmul.f32 1.442695, %v2968_v1  ;;  %v6713_v56 = vmul.f32 0.5, %v2737_v34  ;;  %v2971_v21 = vmul.f32 %v2963_v54, %v2859_v28 }
 0x27a   :  { %v2860_v4 = vand.u32 2147483647, %v6697_v40  ;;  %5738 = vrcp.f32 %v2875_v22  ;;  %v2763_v59 = vadd.f32 %v2762_v2, %v2749_v63  ;;  %vm2844_vm5 = vcmp.ge.f32.partialorder %v6697_v40, 0.0  ;;  %v5546_v34 = vld [vmem:[#allocation14 + $0x24] sm:$0xf]  ;;  %v2778_v63 = vpop.f32.mrf.mxu2 }
 0x27b   :  { %v2895_v48 = vadd.f32 -1.4531521, %v2887_v53  ;;  %5740 = vpow2.f32 %v2975_v44  ;;  %v5095_v26 = vor.u32 %v5575_v14, %v5094_v13  ;;  %v5588_v1 = vld [vmem:[#allocation14 + $0x174] sm:$0xf]  ;;  %v2983_v53 = vmul.f32 1.442695, %v2971_v21 }
 0x27c   :  { %v2868_v60 = vmul.f32 0.3275911, %v2860_v4  ;;  %v2964_v19 = vsub.f32 0.0, %v2860_v4  ;;  %v2777_v20 = vadd.f32 %v2776_v8, %v2763_v59  ;;  %v4987_v38 = vor.u32 %v5546_v34, %v4984_v29  ;;  %v5603_v21 = vld [vmem:[#allocation14 + $0x1e4] sm:$0xf0] }
 0x27d   :  { %v2903_v12 = vmul.f32 %v6693_v51, %v2895_v48  ;;  %v2790_v5 = vpop.f32.mrf.mxu3  ;;  %3456 = vmatpush.bf16.msra.mxu0 %v5095_v26  ;;  %v5155_v48 = vor.u32 %v5588_v1, %v5152_v46  ;;  %v6742_v54 = vsel %vm2844_vm5, 1.0, %v6109_v62 }
 0x27e   :  { %v6716_v35 = vpop.eup %5736  ;;  %v2876_v16 = vadd.f32 1.0, %v2868_v60  ;;  %v6720_v58 = vmul.f32 0.70710677, %v2777_v20  ;;  %v2972_v55 = vmul.f32 %v2964_v19, %v2860_v4  ;;  %v2791_v59 = vadd.f32 %v2790_v5, %v2174_v33  ;;  %3482 = vmatpush.bf16.msra.mxu2 %v4987_v38 }
 0x27f   :  { %v2911_v23 = vadd.f32 1.4214138, %v2903_v12  ;;  %v2888_v24 = vmul.f32 1.0614054, %v6716_v35  ;;  %v2750_v57 = vpop.f32.mrf.mxu0  ;;  %v6748_v19 = vmul.f32 0.5, %v2777_v20 }
 0x280   :  { %5742 = vrcp.f32 %v2876_v16  ;;  %v6722_v9 = vpop.eup %5738  ;;  %v2751_v32 = vadd.f32 %v2750_v57, %v2173_v25  ;;  %v6729_v2 = vand.u32 2147483647, %v6720_v58  ;;  %v2985_v49 = vmul.f32 1.442695, %v2972_v55 }
 0x281   :  { %v2919_v30 = vmul.f32 %v6693_v51, %v2911_v23  ;;  %v2896_v36 = vadd.f32 -1.4531521, %v2888_v24  ;;  %5744 = vpow2.f32 %v2977_v27  ;;  %v2891_v28 = vmul.f32 1.0614054, %v6722_v9  ;;  %v5741_v25 = vpop.eup %5740  ;;  %3505 = vmatpush.bf16.msrb.mxu0 %v5155_v48 }
 0x282   :  { %v2765_v7 = vadd.f32 %v2764_v11, %v2751_v32  ;;  %v2865_v22 = vmul.f32 0.3275911, %v6729_v2  ;;  %v2961_v32 = vsub.f32 0.0, %v6729_v2  ;;  %vm2841_vm6 = vcmp.ge.f32.partialorder %v6720_v58, 0.0 }
 0x283   :  { %v2927_v61 = vadd.f32 -0.28449672, %v2919_v30  ;;  %v2904_v50 = vmul.f32 %v6716_v35, %v2896_v36  ;;  %v2899_v44 = vadd.f32 -1.4531521, %v2891_v28  ;;  %v2818_v30 = vpop.f32.mrf.mxu1 }
 0x284   :  { %v6734_v52 = vadd.f32 %v2778_v63, %v2765_v7  ;;  %v2873_v60 = vadd.f32 1.0, %v2865_v22 }
 0x285   :  { %v2935_v8 = vmul.f32 %v6693_v51, %v2927_v61  ;;  %v2912_v10 = vadd.f32 1.4214138, %v2904_v50  ;;  %v2907_v4 = vmul.f32 %v6722_v9, %v2899_v44  ;;  %v5207_v61 = vor.u32 %v5603_v21, %v5206_v15  ;;  %v2792_v22 = vpop.f32.mrf.mxu3 }
 0x286   :  { %v6736_v27 = vpop.eup %5742  ;;  %5746 = vrcp.f32 %v2873_v60  ;;  %v6751_v40 = vmul.f32 0.70710677, %v6734_v52 }
 0x287   :  { %v2943_v47 = vadd.f32 0.2548296, %v2935_v8  ;;  %v2920_v42 = vmul.f32 %v6716_v35, %v2912_v10  ;;  %v2892_v12 = vmul.f32 1.0614054, %v6736_v27  ;;  %v2804_v18 = vpop.f32.mrf.mxu0  ;;  %v5745_v17 = vpop.eup %5744  ;;  %v2915_v16 = vadd.f32 1.4214138, %v2907_v4  ;;  %3464 = vmatpush.bf16.msra.mxu1 %v5207_v61 }
 0x288   :  { %v2805_v24 = vadd.f32 %v2804_v18, %v2791_v59  ;;  %5748 = vpow2.f32 %v2983_v53  ;;  %v2861_v37 = vand.u32 2147483647, %v6751_v40  ;;  %v2969_v53 = vmul.f32 %v2961_v32, %v6729_v2  ;;  %v4976_v61 = vld [vmem:[#allocation14 + $0x18] sm:$0xf0] }
 0x289   :  { %v2951_v13 = vmul.f32 %v6693_v51, %v2943_v47  ;;  %v2928_v14 = vadd.f32 -0.28449672, %v2920_v42  ;;  %v2900_v23 = vadd.f32 -1.4531521, %v2892_v12  ;;  %v2923_v57 = vmul.f32 %v6722_v9, %v2915_v16  ;;  %v5564_v12 = vld [vmem:[#allocation14 + $0xb4] sm:$0xf] }
 0x28a   :  { %v2869_v51 = vmul.f32 0.3275911, %v2861_v37  ;;  %v2965_v34 = vsub.f32 0.0, %v2861_v37  ;;  %v6759_v29 = vadd.f32 %v2818_v30, %v2805_v24  ;;  %5750 = vpow2.f32 %v2985_v49 }
 0x28b   :  { %v2991_v11 = vmul.f32 %v5741_v25, %v2951_v13  ;;  %v2936_v20 = vmul.f32 %v6716_v35, %v2928_v14  ;;  %v2908_v36 = vmul.f32 %v6736_v27, %v2900_v23  ;;  %v2931_v26 = vadd.f32 -0.28449672, %v2923_v57  ;;  %v5056_v14 = vld [vmem:[#allocation14 + $0xb8] sm:$0xf0] }
 0x28c   :  { %v6761_v50 = vpop.eup %5746  ;;  %v2877_v7 = vadd.f32 1.0, %v2869_v51  ;;  %v2973_v8 = vmul.f32 %v2965_v34, %v2861_v37  ;;  %v6770_v10 = vmul.f32 0.70710677, %v6759_v29  ;;  %v6773_v4 = vsel %vm2841_vm6, 1.0, %v6109_v62  ;;  %v5544_v51 = vld [vmem:[#allocation14 + $0x14] sm:$0xf] }
 0x28d   :  { %v2944_v28 = vadd.f32 0.2548296, %v2936_v20  ;;  %v2916_v1 = vadd.f32 1.4214138, %v2908_v36  ;;  %v2999_v55 = vsub.f32 1.0, %v2991_v11  ;;  %v2939_v5 = vmul.f32 %v6722_v9, %v2931_v26  ;;  %v2820_v36 = vpop.f32.mrf.mxu1 }
 0x28e   :  { %v2889_v44 = vmul.f32 1.0614054, %v6761_v50  ;;  %v5749_v63 = vpop.eup %5748  ;;  %5752 = vrcp.f32 %v2877_v7  ;;  %v2793_v2 = vadd.f32 %v2792_v22, %v2174_v33  ;;  %v2858_v47 = vand.u32 2147483647, %v6770_v10 }
 0x28f   :  { %v2952_v46 = vmul.f32 %v6716_v35, %v2944_v28  ;;  %v2924_v25 = vmul.f32 %v6736_v27, %v2916_v1  ;;  %v2947_v38 = vadd.f32 0.2548296, %v2939_v5  ;;  %v3007_v60 = vmul.f32 %v2999_v55, %v6691_v0  ;;  %v2806_v42 = vpop.f32.mrf.mxu0  ;;  %v5586_v55 = vld [vmem:[#allocation14 + $0x164] sm:$0xf]  ;;  %v5144_v5 = vld [vmem:[#allocation14 + $0x168] sm:$0xf0] }
 0x290   :  { %v2897_v35 = vadd.f32 -1.4531521, %v2889_v44  ;;  %v5751_v49 = vpop.eup %5750  ;;  %v2979_v16 = vmul.f32 1.442695, %v2969_v53  ;;  %v6783_v13 = vmul.f32 0.5, %v6734_v52  ;;  %v2962_v57 = vsub.f32 0.0, %v2858_v47 }
 0x291   :  { %v2992_v48 = vmul.f32 %v5745_v17, %v2952_v46  ;;  %v2932_v58 = vadd.f32 -0.28449672, %v2924_v25  ;;  %v2955_v59 = vmul.f32 %v6722_v9, %v2947_v38  ;;  %v2987_v9 = vmul.f32 1.442695, %v2973_v8  ;;  %v5198_v44 = vld [vmem:[#allocation14 + $0x1d0] sm:$0xf] }
 0x292   :  { %v2905_v17 = vmul.f32 %v6761_v50, %v2897_v35  ;;  %v2866_v24 = vmul.f32 0.3275911, %v2858_v47  ;;  %v2807_v37 = vadd.f32 %v2806_v42, %v2793_v2  ;;  %v3015_v21 = vadd.f32 1.0, %v3007_v60  ;;  %v5048_v35 = vld [vmem:[#allocation14 + $0xa8] sm:$0xf0] }
 0x293   :  { %v2940_v18 = vmul.f32 %v6736_v27, %v2932_v58  ;;  %v3000_v0 = vsub.f32 1.0, %v2992_v48  ;;  %v2995_v23 = vmul.f32 %v5749_v63, %v2955_v59  ;;  %v5059_v20 = vor.u32 %v5564_v12, %v5056_v14  ;;  %v5562_v58 = vld [vmem:[#allocation14 + $0xa4] sm:$0xf]  ;;  %v4968_v42 = vld [vmem:[#allocation14 + $0x8] sm:$0xf0] }
 0x294   :  { %v2913_v33 = vadd.f32 1.4214138, %v2905_v17  ;;  %v6785_v15 = vpop.eup %5752  ;;  %v2874_v30 = vadd.f32 1.0, %v2866_v24  ;;  %5754 = vpow2.f32 %v2979_v16  ;;  %v6792_v1 = vadd.f32 %v2820_v36, %v2807_v37  ;;  %v5542_v60 = vld [vmem:[#allocation14 + $0x4] sm:$0xf] }
 0x295   :  { %v2948_v45 = vadd.f32 0.2548296, %v2940_v18  ;;  %v3003_v11 = vsub.f32 1.0, %v2995_v23  ;;  %v2893_v26 = vmul.f32 1.0614054, %v6785_v15  ;;  %v3008_v34 = vmul.f32 %v3000_v0, %v6702_v41  ;;  %3495 = vmatpush.bf16.msra.mxu3 %v5059_v20 }
 0x296   :  { %v2921_v52 = vmul.f32 %v6761_v50, %v2913_v33  ;;  %5756 = vrcp.f32 %v2874_v30  ;;  %v2970_v25 = vmul.f32 %v2962_v57, %v2858_v47  ;;  %v3023_v53 = vmul.f32 %v3015_v21, %v6688_v31  ;;  %v5584_v14 = vld [vmem:[#allocation14 + $0x154] sm:$0xf]  ;;  %v5136_v0 = vld [vmem:[#allocation14 + $0x158] sm:$0xf0]  ;;  %v5306_v23 = vld [vmem:[#allocation16 + $0xa8] sm:$0xf] }
 0x297   :  { %v2956_v32 = vmul.f32 %v6736_v27, %v2948_v45  ;;  %v3011_v28 = vmul.f32 %v3003_v11, %v6710_v39  ;;  %v2901_v27 = vadd.f32 -1.4531521, %v2893_v26  ;;  %5758 = vpow2.f32 %v2987_v9  ;;  %v5601_v39 = vld [vmem:[#allocation14 + $0x1d4] sm:$0xf0]  ;;  %v5628_v57 = vld [vmem:[#allocation16 + $0xb0] sm:$0xf0] }
 0x298   :  { %v2929_v46 = vadd.f32 -0.28449672, %v2921_v52  ;;  %v6796_v41 = vmul.f32 0.70710677, %v6792_v1  ;;  %v4979_v48 = vor.u32 %v5544_v51, %v4976_v61  ;;  %v3016_v59 = vadd.f32 1.0, %v3008_v34 }
 0x299   :  { %v2996_v7 = vmul.f32 %v5751_v49, %v2956_v32  ;;  %v3019_v22 = vadd.f32 1.0, %v3011_v28  ;;  %v2909_v8 = vmul.f32 %v6785_v15, %v2901_v27  ;;  %v5147_v47 = vor.u32 %v5586_v55, %v5144_v5  ;;  %v5190_v30 = vld [vmem:[#allocation14 + $0x1c0] sm:$0xf]  ;;  %v5599_v20 = vld [vmem:[#allocation14 + $0x1c4] sm:$0xf0] }
 0x29a   :  { %v2937_v38 = vmul.f32 %v6761_v50, %v2929_v46  ;;  %v2862_v31 = vand.u32 2147483647, %v6796_v41  ;;  %v5755_v12 = vpop.eup %5754  ;;  %v6803_v16 = vmul.f32 1.442695, %v2970_v25  ;;  %3483 = vmatpush.bf16.msra.mxu2 %v4979_v48  ;;  %v5199_v33 = vor.u32 %v5601_v39, %v5198_v44  ;;  %v5560_v36 = vld [vmem:[#allocation14 + $0x94] sm:$0xf] }
 0x29b   :  { %v3004_v63 = vsub.f32 1.0, %v2996_v7  ;;  %v3027_v2 = vmul.f32 %v3019_v22, %v6706_v6  ;;  %v2917_v17 = vadd.f32 1.4214138, %v2909_v8  ;;  %3506 = vmatpush.bf16.msrb.mxu0 %v5147_v47  ;;  %vm2845_vm7 = vcmp.ge.f32.partialorder %v6751_v40, 0.0  ;;  %v5040_v32 = vld [vmem:[#allocation14 + $0x98] sm:$0xf0] }
 0x29c   :  { %v2945_v18 = vadd.f32 0.2548296, %v2937_v38  ;;  %v6805_v9 = vpop.eup %5756  ;;  %v2870_v6 = vmul.f32 0.3275911, %v2862_v31  ;;  %v2966_v45 = vsub.f32 0.0, %v2862_v31  ;;  %v3024_v34 = vmul.f32 %v3016_v59, %v6695_v3  ;;  %3465 = vmatpush.bf16.msra.mxu1 %v5199_v33 }
 0x29d   :  { %v3012_v49 = vmul.f32 %v3004_v63, %v6742_v54  ;;  %v6807_v24 = vpack.c.bf16 %v3027_v2, %v3023_v53  ;;  %v2925_v21 = vmul.f32 %v6785_v15, %v2917_v17  ;;  %v2890_v11 = vmul.f32 1.0614054, %v6805_v9  ;;  %v5582_v52 = vld [vmem:[#allocation14 + $0x144] sm:$0xf]  ;;  %v5128_v26 = vld [vmem:[#allocation14 + $0x148] sm:$0xf0]  ;;  %v6813_v51 = vpop.eup %5758 }
 0x29e   :  { %v2953_v54 = vmul.f32 %v6761_v50, %v2945_v18  ;;  %v2878_v28 = vadd.f32 1.0, %v2870_v6  ;;  %v5051_v61 = vor.u32 %v5562_v58, %v5048_v35  ;;  %v4971_v50 = vor.u32 %v5542_v60, %v4968_v42  ;;  %v5294_v55 = vld [vmem:[#allocation16 + $0x90] sm:$0xf]  ;;  %v5625_v5 = vld [vmem:[#allocation16 + $0x98] sm:$0xf0] }
 0x29f   :  { %v3020_v37 = vadd.f32 1.0, %v3012_v49  ;;  %3429 = vmatmul.bf16.vlgmr.msrb.gmra.mxu2 %v6807_v24  ;;  %v2933_v27 = vadd.f32 -0.28449672, %v2925_v21  ;;  %v2898_v25 = vadd.f32 -1.4531521, %v2890_v11  ;;  %v2974_v53 = vmul.f32 %v2966_v45, %v2862_v31 }
 0x2a0   :  { %v2993_v46 = vmul.f32 %v5755_v12, %v2953_v54  ;;  %v5182_v44 = vld [vmem:[#allocation14 + $0x1b0] sm:$0xf]  ;;  %5760 = vrcp.f32 %v2878_v28  ;;  %3496 = vmatpush.bf16.msra.mxu3 %v5051_v61  ;;  %3484 = vmatpush.bf16.msra.mxu2 %v4971_v50  ;;  %v5139_v22 = vor.u32 %v5584_v14, %v5136_v0  ;;  %v5307_v3 = vor.u32 %v5628_v57, %v5306_v23  ;;  %v5597_v39 = vld [vmem:[#allocation14 + $0x1b4] sm:$0xf0]  ;;  %v5558_v63 = vld [vmem:[#allocation14 + $0x84] sm:$0xf] }
 0x2a1   :  { %v3028_v7 = vmul.f32 %v3020_v37, %v6713_v56  ;;  %v5032_v38 = vld [vmem:[#allocation14 + $0x88] sm:$0xf0]  ;;  %v2941_v58 = vmul.f32 %v6785_v15, %v2933_v27  ;;  %v2906_v56 = vmul.f32 %v6805_v9, %v2898_v25  ;;  %v5308_v60 = vld [vmem:[#allocation16 + $0xb4] sm:$0xf0]  ;;  %v5191_v59 = vor.u32 %v5599_v20, %v5190_v30  ;;  %v5580_v47 = vld [vmem:[#allocation14 + $0x134] sm:$0xf] }
 0x2a2   :  { %v3001_v48 = vsub.f32 1.0, %v2993_v46  ;;  %v5627_v35 = vld [vmem:[#allocation16 + $0xac] sm:$0xf]  ;;  %3507 = vmatpush.bf16.msrb.mxu0 %v5139_v22  ;;  %v5043_v2 = vor.u32 %v5560_v36, %v5040_v32  ;;  %v5131_v31 = vor.u32 %v5582_v52, %v5128_v26  ;;  %v5120_v42 = vld [vmem:[#allocation14 + $0x138] sm:$0xf0]  ;;  %v5295_v17 = vor.u32 %v5625_v5, %v5294_v55 }
 0x2a3   :  { %v6818_v8 = vpack.c.bf16 %v3028_v7, %v3024_v34  ;;  %v5282_v12 = vld [vmem:[#allocation16 + $0x78] sm:$0xf]  ;;  %v2949_v49 = vadd.f32 0.2548296, %v2941_v58  ;;  %v2914_v18 = vadd.f32 1.4214138, %v2906_v56  ;;  %3466 = vmatpush.bf16.msra.mxu1 %v5191_v59  ;;  %v5183_v6 = vor.u32 %v5597_v39, %v5182_v44 }
 0x2a4   :  { %3884 = vmatpush.bf16.msrb.mxu2 %v5307_v3  ;;  %v5622_v14 = vld [vmem:[#allocation16 + $0x80] sm:$0xf0]  ;;  %v3009_v0 = vmul.f32 %v3001_v48, %v6773_v4  ;;  %v6824_v23 = vmul.f32 1.442695, %v2974_v53  ;;  %3497 = vmatpush.bf16.msra.mxu3 %v5043_v2  ;;  %v5035_v45 = vor.u32 %v5558_v63, %v5032_v38  ;;  %v5174_v33 = vld [vmem:[#allocation14 + $0x1a0] sm:$0xf]  ;;  %v5311_v54 = vor.u32 %v5627_v35, %v5308_v60 }
 0x2a5   :  { %3443 = vmatmul.bf16.vlgmr.msrb.gmra.mxu3 %v6818_v8  ;;  %v2957_v57 = vmul.f32 %v6785_v15, %v2949_v49  ;;  %v2922_v37 = vmul.f32 %v6805_v9, %v2914_v18  ;;  %v5595_v21 = vld [vmem:[#allocation14 + $0x1a4] sm:$0xf0]  ;;  %v5624_v11 = vld [vmem:[#allocation16 + $0x94] sm:$0xf]  ;;  %v5296_v30 = vld [vmem:[#allocation16 + $0x9c] sm:$0xf0]  ;;  %v5123_v4 = vor.u32 %v5580_v47, %v5120_v42  ;;  %v5283_v36 = vor.u32 %v5622_v14, %v5282_v12 }
 0x2a6   :  { %v6828_v20 = vpop.eup %5760  ;;  %3508 = vmatpush.bf16.msrb.mxu0 %v5131_v31  ;;  %v5578_v32 = vld [vmem:[#allocation14 + $0x124] sm:$0xf]  ;;  %v5112_v52 = vld [vmem:[#allocation14 + $0x128] sm:$0xf0]  ;;  %v5270_v26 = vld [vmem:[#allocation16 + $0x60] sm:$0xf]  ;;  %5762 = vpow2.f32 %v6803_v16  ;;  %v5175_v5 = vor.u32 %v5595_v21, %v5174_v33  ;;  %v5299_v44 = vor.u32 %v5624_v11, %v5296_v30 }
 0x2a7   :  { %v2997_v34 = vmul.f32 %v6813_v51, %v2957_v57  ;;  %v2930_v28 = vadd.f32 -0.28449672, %v2922_v37  ;;  %v2894_v15 = vmul.f32 1.0614054, %v6828_v20  ;;  %v5619_v61 = vld [vmem:[#allocation16 + $0x68] sm:$0xf0]  ;;  %3467 = vmatpush.bf16.msra.mxu1 %v5183_v6  ;;  %v5115_v22 = vor.u32 %v5578_v32, %v5112_v52 }
 0x2a8   :  { %3885 = vmatpush.bf16.msrb.mxu2 %v5295_v17  ;;  %v3017_v50 = vadd.f32 1.0, %v3009_v0  ;;  %v2853_v55 = vsel %vm2845_vm7, 1.0, %v6109_v62  ;;  %3498 = vmatpush.bf16.msra.mxu3 %v5035_v45  ;;  %v5166_v7 = vld [vmem:[#allocation14 + $0x190] sm:$0xf]  ;;  %v5593_v46 = vld [vmem:[#allocation14 + $0x194] sm:$0xf0]  ;;  %v5271_v3 = vor.u32 %v5619_v61, %v5270_v26  ;;  %5764 = vpow2.f32 %v6824_v23 }
 0x2a9   :  { %v3005_v27 = vsub.f32 1.0, %v2997_v34  ;;  %v2938_v25 = vmul.f32 %v6805_v9, %v2930_v28  ;;  %v2902_v51 = vadd.f32 -1.4531521, %v2894_v15  ;;  %v5621_v53 = vld [vmem:[#allocation16 + $0x7c] sm:$0xf]  ;;  %v5167_v35 = vor.u32 %v5593_v46, %v5166_v7 }
 0x2aa   :  { %3509 = vmatpush.bf16.msrb.mxu0 %v5123_v4  ;;  %v5284_v40 = vld [vmem:[#allocation16 + $0x84] sm:$0xf0]  ;;  %v5576_v39 = vld [vmem:[#allocation14 + $0x114] sm:$0xf]  ;;  %v5104_v63 = vld [vmem:[#allocation14 + $0x118] sm:$0xf0]  ;;  %v3025_v33 = vmul.f32 %v3017_v50, %v6748_v19 }
 0x2ab   :  { %v3013_v16 = vmul.f32 %v3005_v27, %v2853_v55  ;;  %v2946_v38 = vadd.f32 0.2548296, %v2938_v25  ;;  %v2910_v48 = vmul.f32 %v6828_v20, %v2902_v51  ;;  %v5258_v58 = vld [vmem:[#allocation16 + $0x48] sm:$0xf]  ;;  %v5616_v56 = vld [vmem:[#allocation16 + $0x50] sm:$0xf0]  ;;  %3468 = vmatpush.bf16.msra.mxu1 %v5175_v5  ;;  %v5287_v12 = vor.u32 %v5621_v53, %v5284_v40 }
 0x2ac   :  { %3898 = vmatpush.bf16.msrb.mxu3 %v5311_v54  ;;  %3886 = vmatpush.bf16.msrb.mxu2 %v5283_v36  ;;  %v5158_v60 = vld [vmem:[#allocation14 + $0x180] sm:$0xf]  ;;  %v5591_v59 = vld [vmem:[#allocation14 + $0x184] sm:$0xf0]  ;;  %v5604_v2 = vld [vmem:[#allocation14 + $0x1f4] sm:$0xf]  ;;  %v5763_v18 = vpop.eup %5762  ;;  %v5107_v17 = vor.u32 %v5576_v39, %v5104_v63  ;;  %v5259_v14 = vor.u32 %v5616_v56, %v5258_v58 }
 0x2ad   :  { %v3021_v31 = vadd.f32 1.0, %v3013_v16  ;;  %v2954_v47 = vmul.f32 %v6805_v9, %v2946_v38  ;;  %v2918_v42 = vadd.f32 1.4214138, %v2910_v48  ;;  %v5216_v49 = vld [vmem:[#allocation14 + $0x1f8] sm:$0xf0]  ;;  %v5159_v30 = vor.u32 %v5591_v59, %v5158_v60 }
 0x2ae   :  { %3510 = vmatpush.bf16.msrb.mxu0 %v5115_v22  ;;  %v5618_v0 = vld [vmem:[#allocation16 + $0x64] sm:$0xf]  ;;  %v5272_v6 = vld [vmem:[#allocation16 + $0x6c] sm:$0xf0]  ;;  %v5096_v9 = vld [vmem:[#allocation14 + $0x108] sm:$0xf0]  ;;  %v5219_v52 = vor.u32 %v5604_v2, %v5216_v49  ;;  %v5765_v58 = vpop.eup %5764 }
 0x2af   :  { %v5574_v45 = vld [vmem:[#allocation14 + $0x104] sm:$0xf]  ;;  %v3029_v57 = vmul.f32 %v3021_v31, %v6783_v13  ;;  %v2926_v37 = vmul.f32 %v6828_v20, %v2918_v42  ;;  %3485 = vmatmul.bf16.vlgmr.msra.gmra.mxu2 %v6807_v24  ;;  %v5246_v54 = vld [vmem:[#allocation16 + $0x30] sm:$0xf]  ;;  %v5613_v21 = vld [vmem:[#allocation16 + $0x38] sm:$0xf0]  ;;  %v2994_v11 = vmul.f32 %v5763_v18, %v2954_v47  ;;  %3469 = vmatpush.bf16.msra.mxu1 %v5167_v35 }
 0x2b0   :  { %3899 = vmatpush.bf16.msrb.mxu3 %v5299_v44  ;;  %3887 = vmatpush.bf16.msrb.mxu2 %v5271_v3  ;;  %v5314_v4 = vld [vmem:[#allocation16 + $0xb0] sm:$0xf]  ;;  %v5629_v36 = vld [vmem:[#allocation16 + $0xb8] sm:$0xf0]  ;;  %v5275_v26 = vor.u32 %v5618_v0, %v5272_v6  ;;  %v5602_v19 = vld [vmem:[#allocation14 + $0x1e4] sm:$0xf]  ;;  %v5099_v13 = vor.u32 %v5574_v45, %v5096_v9  ;;  %v5247_v24 = vor.u32 %v5613_v21, %v5246_v54 }
 0x2b1   :  { %v2934_v32 = vadd.f32 -0.28449672, %v2926_v37  ;;  %v6843_v34 = vpack.c.bf16 %v3029_v57, %v3025_v33  ;;  %v5208_v28 = vld [vmem:[#allocation14 + $0x1e8] sm:$0xf0]  ;;  %v5260_v61 = vld [vmem:[#allocation16 + $0x54] sm:$0xf0]  ;;  %v5315_v55 = vor.u32 %v5629_v36, %v5314_v4 }
 0x2b2   :  { %3511 = vmatpush.bf16.msrb.mxu0 %v5107_v17  ;;  %v5615_v15 = vld [vmem:[#allocation16 + $0x4c] sm:$0xf]  ;;  %v5234_v5 = vld [vmem:[#allocation16 + $0x18] sm:$0xf]  ;;  %v5610_v7 = vld [vmem:[#allocation16 + $0x20] sm:$0xf0]  ;;  %v5211_v51 = vor.u32 %v5602_v19, %v5208_v28 }
 0x2b3   :  { %v2942_v50 = vmul.f32 %v6828_v20, %v2934_v32  ;;  %3457 = vmatmul.bf16.vlgmr.msra.gmra.mxu0 %v6843_v34  ;;  %vm2842_vm8 = vcmp.ge.f32.partialorder %v6770_v10, 0.0  ;;  %v3002_v46 = vsub.f32 1.0, %v2994_v11  ;;  %3470 = vmatpush.bf16.msra.mxu1 %v5159_v30  ;;  %v5302_v23 = vld [vmem:[#allocation16 + $0x98] sm:$0xf]  ;;  %v5626_v27 = vld [vmem:[#allocation16 + $0xa0] sm:$0xf0]  ;;  %v5263_v44 = vor.u32 %v5615_v15, %v5260_v61 }
 0x2b4   :  { %3900 = vmatpush.bf16.msrb.mxu3 %v5287_v12  ;;  %3888 = vmatpush.bf16.msrb.mxu2 %v5259_v14  ;;  %v5600_v53 = vld [vmem:[#allocation14 + $0x1d4] sm:$0xf]  ;;  %v5235_v22 = vor.u32 %v5610_v7, %v5234_v5  ;;  %v5200_v3 = vld [vmem:[#allocation14 + $0x1d8] sm:$0xf0]  ;;  %v2850_v39 = vsel %vm2842_vm8, 1.0, %v6109_v62  ;;  %v5303_v16 = vor.u32 %v5626_v27, %v5302_v23  ;;  %vm2846_vm9 = vcmp.ge.f32.partialorder %v6796_v41, 0.0 }
 0x2b5   :  { %3499 = vmatmul.bf16.vlgmr.msra.gmra.mxu3 %v6818_v8  ;;  %v2950_v25 = vadd.f32 0.2548296, %v2942_v50  ;;  %v5612_v40 = vld [vmem:[#allocation16 + $0x34] sm:$0xf]  ;;  %v5248_v8 = vld [vmem:[#allocation16 + $0x3c] sm:$0xf0]  ;;  %v3010_v56 = vmul.f32 %v3002_v46, %v2850_v39  ;;  %v5203_v2 = vor.u32 %v5600_v53, %v5200_v3 }
 0x2b6   :  { %3512 = vmatpush.bf16.msrb.mxu0 %v5099_v13  ;;  %v5222_v38 = vld [vmem:[#allocation16] sm:$0xf]  ;;  %v5607_v48 = vld [vmem:[#allocation16 + $0x8] sm:$0xf0]  ;;  %v5251_v31 = vor.u32 %v5612_v40, %v5248_v8  ;;  %v5598_v47 = vld [vmem:[#allocation14 + $0x1c4] sm:$0xf] }
 0x2b7   :  { %3519 = vmatpush.bf16.msrb.mxu1 %v5219_v52  ;;  %v2958_v63 = vmul.f32 %v6828_v20, %v2950_v25  ;;  %v5290_v35 = vld [vmem:[#allocation16 + $0x80] sm:$0xf]  ;;  %v5623_v60 = vld [vmem:[#allocation16 + $0x88] sm:$0xf0]  ;;  %v5223_v10 = vor.u32 %v5607_v48, %v5222_v38  ;;  %v5609_v20 = vld [vmem:[#allocation16 + $0x1c] sm:$0xf] }
 0x2b8   :  { %3901 = vmatpush.bf16.msrb.mxu3 %v5275_v26  ;;  %3889 = vmatpush.bf16.msrb.mxu2 %v5247_v24  ;;  %v5192_v42 = vld [vmem:[#allocation14 + $0x1c8] sm:$0xf0]  ;;  %v5236_v12 = vld [vmem:[#allocation16 + $0x24] sm:$0xf0]  ;;  %v5291_v18 = vor.u32 %v5623_v60, %v5290_v35  ;;  %v2854_v17 = vsel %vm2846_vm9, 1.0, %v6109_v62  ;;  %v3018_v6 = vadd.f32 1.0, %v3010_v56 }
 0x2b9   :  { %v2998_v59 = vmul.f32 %v5765_v58, %v2958_v63  ;;  %v5278_v14 = vld [vmem:[#allocation16 + $0x68] sm:$0xf]  ;;  %v5620_v0 = vld [vmem:[#allocation16 + $0x70] sm:$0xf0]  ;;  %v5195_v45 = vor.u32 %v5598_v47, %v5192_v42  ;;  %v5239_v33 = vor.u32 %v5609_v20, %v5236_v12  ;;  %v2826_v57 = vmul.f32 0.5, %v6759_v29  ;;  %v6862_v63 = vld [vmem:[#allocation17] sm:$0xff] }
 0x2ba   :  { %3912 = vmatpush.bf16.msra.mxu0 %v5315_v55  ;;  %v5606_v37 = vld [vmem:[#allocation16 + $0x4] sm:$0xf]  ;;  %v5224_v9 = vld [vmem:[#allocation16 + $0xc] sm:$0xf0]  ;;  %v2830_v54 = vmul.f32 0.5, %v6792_v1  ;;  %v5279_v11 = vor.u32 %v5620_v0, %v5278_v14  ;;  %v6871_v20 = vld [vmem:[#allocation17 + $0x8] sm:$0xff] }
 0x2bb   :  { %3520 = vmatpush.bf16.msrb.mxu1 %v5211_v51  ;;  %v3006_v49 = vsub.f32 1.0, %v2998_v59  ;;  %v5596_v30 = vld [vmem:[#allocation14 + $0x1b4] sm:$0xf]  ;;  %v5184_v4 = vld [vmem:[#allocation14 + $0x1b8] sm:$0xf0]  ;;  %v3026_v52 = vmul.f32 %v3018_v6, %v2826_v57  ;;  %v5227_v19 = vor.u32 %v5606_v37, %v5224_v9  ;;  %v3100_v12 = vperm.slane %v6871_v20, 4 }
 0x2bc   :  { %3902 = vmatpush.bf16.msrb.mxu3 %v5263_v44  ;;  %3890 = vmatpush.bf16.msrb.mxu2 %v5235_v22  ;;  %v5266_v36 = vld [vmem:[#allocation16 + $0x50] sm:$0xf]  ;;  %v5617_v32 = vld [vmem:[#allocation16 + $0x58] sm:$0xf0]  ;;  %v5187_v29 = vor.u32 %v5596_v30, %v5184_v4  ;;  %v5594_v28 = vld [vmem:[#allocation14 + $0x1a4] sm:$0xf] }
 0x2bd   :  { %v3014_v41 = vmul.f32 %v3006_v49, %v2854_v17  ;;  %v5267_v24 = vor.u32 %v5617_v32, %v5266_v36  ;;  %v5176_v1 = vld [vmem:[#allocation14 + $0x1a8] sm:$0xf0]  ;;  %v5254_v15 = vld [vmem:[#allocation16 + $0x38] sm:$0xf]  ;;  %v5614_v61 = vld [vmem:[#allocation16 + $0x40] sm:$0xf0] }
 0x2be   :  { %3913 = vmatpush.bf16.msra.mxu0 %v5303_v16  ;;  %v5179_v50 = vor.u32 %v5594_v28, %v5176_v1  ;;  %v5255_v55 = vor.u32 %v5614_v61, %v5254_v15  ;;  %v5592_v5 = vld [vmem:[#allocation14 + $0x194] sm:$0xf]  ;;  %v5168_v7 = vld [vmem:[#allocation14 + $0x198] sm:$0xf0]  ;;  %v5242_v46 = vld [vmem:[#allocation16 + $0x20] sm:$0xf] }
 0x2bf   :  { %3521 = vmatpush.bf16.msrb.mxu1 %v5203_v2  ;;  %v3022_v21 = vadd.f32 1.0, %v3014_v41  ;;  %v5611_v23 = vld [vmem:[#allocation16 + $0x28] sm:$0xf0]  ;;  %v5171_v27 = vor.u32 %v5592_v5, %v5168_v7  ;;  %v5590_v51 = vld [vmem:[#allocation14 + $0x184] sm:$0xf]  ;;  %v3099_v16 = vperm.slane %v6862_v63, 4 }
 0x2c0   :  { %3903 = vmatpush.bf16.msrb.mxu3 %v5251_v31  ;;  %3891 = vmatpush.bf16.msrb.mxu2 %v5223_v10  ;;  %v5243_v25 = vor.u32 %v5611_v23, %v5242_v46  ;;  %v5230_v44 = vld [vmem:[#allocation16 + $0x8] sm:$0xf]  ;;  %v5608_v53 = vld [vmem:[#allocation16 + $0x10] sm:$0xf0] }
 0x2c1   :  { %v3030_v26 = vmul.f32 %v3022_v21, %v2830_v54  ;;  %v5231_v3 = vor.u32 %v5608_v53, %v5230_v44 }
 0x2c2   :  { %3914 = vmatpush.bf16.msra.mxu0 %v5291_v18 }
 0x2c3   :  { %3522 = vmatpush.bf16.msrb.mxu1 %v5195_v45  ;;  %3892 = vmatmul.bf16.vlgmr.msrb.gmra.mxu2 %v6652_v43  ;;  %v3034_v13 = vpack.c.bf16 %v3030_v26, %v3026_v52 }
 0x2c4   :  { %3904 = vmatpush.bf16.msrb.mxu3 %v5239_v33  ;;  %3513 = vmatmul.bf16.vlgmr.msrb.gmra.mxu0 %v6843_v34  ;;  %v5160_v34 = vld [vmem:[#allocation14 + $0x188] sm:$0xf0] }
 0x2c5   :  { %3471 = vmatmul.bf16.vlgmr.msra.gmra.mxu1 %v3034_v13  ;;  %v5163_v22 = vor.u32 %v5590_v51, %v5160_v34 }
 0x2c6   :  { %3915 = vmatpush.bf16.msra.mxu0 %v5279_v11 }
 0x2c7   :  { %3523 = vmatpush.bf16.msrb.mxu1 %v5187_v29 }
 0x2c8   :  { %3905 = vmatpush.bf16.msrb.mxu3 %v5227_v19 }
 0x2ca   :  { %3916 = vmatpush.bf16.msra.mxu0 %v5267_v24 }
 0x2cb   :  { %3906 = vmatmul.bf16.vlgmr.msrb.gmra.mxu3 %v6652_v43  ;;  %3524 = vmatpush.bf16.msrb.mxu1 %v5179_v50 }
 0x2ce   :  { %3917 = vmatpush.bf16.msra.mxu0 %v5255_v55 }
 0x2cf   :  { %3525 = vmatpush.bf16.msrb.mxu1 %v5171_v27 }
 0x2d2   :  { %3918 = vmatpush.bf16.msra.mxu0 %v5243_v25 }
 0x2d3   :  { %3526 = vmatpush.bf16.msrb.mxu1 %v5163_v22 }
 0x2d6   :  { %3919 = vmatpush.bf16.msra.mxu0 %v5231_v3  ;;  %3527 = vmatmul.bf16.vlgmr.msrb.gmra.mxu1 %v3034_v13 }
 0x2d9   :  { %3920 = vmatmul.bf16.vlgmr.msra.gmra.mxu0 %v6652_v43 }
 0x322   :  { %v3430_v40 = vpop.f32.mrf.mxu2 }
 0x323   :  { %v3431_v38 = vadd.f32 %v3430_v40, %v3099_v16 }
 0x328   :  { %v3444_v8 = vpop.f32.mrf.mxu3 }
 0x329   :  { %v3445_v58 = vadd.f32 %v3444_v8, %v3431_v38 }
 0x32a   :  { %v3432_v48 = vpop.f32.mrf.mxu2 }
 0x32b   :  { %v3433_v31 = vadd.f32 %v3432_v48, %v3099_v16 }
 0x330   :  { %v3458_v39 = vpop.f32.mrf.mxu0  ;;  %v3446_v56 = vpop.f32.mrf.mxu3 }
 0x331   :  { %v3459_v35 = vadd.f32 %v3458_v39, %v3445_v58  ;;  %v3447_v43 = vadd.f32 %v3446_v56, %v3433_v31 }
 0x332   :  { %v3486_v42 = vpop.f32.mrf.mxu2 }
 0x333   :  { %v3487_v45 = vadd.f32 %v3486_v42, %v3100_v12 }
 0x338   :  { %v3460_v60 = vpop.f32.mrf.mxu0  ;;  %v3500_v17 = vpop.f32.mrf.mxu3 }
 0x339   :  { %v3461_v49 = vadd.f32 %v3460_v60, %v3447_v43  ;;  %v3501_v57 = vadd.f32 %v3500_v17, %v3487_v45 }
 0x33a   :  { %v3488_v21 = vpop.f32.mrf.mxu2 }
 0x33b   :  { %v3489_v19 = vadd.f32 %v3488_v21, %v3100_v12 }
 0x340   :  { %v3502_v26 = vpop.f32.mrf.mxu3 }
 0x341   :  { %v3514_v41 = vpop.f32.mrf.mxu0  ;;  %v3503_v1 = vadd.f32 %v3502_v26, %v3489_v19 }
 0x342   :  { %v3472_v59 = vpop.f32.mrf.mxu1  ;;  %v3515_v9 = vadd.f32 %v3514_v41, %v3501_v57  ;;  %v3649_v57 = vlaneseq }
 0x343   :  { %v6865_v2 = vadd.f32 %v3472_v59, %v3459_v35 }
 0x345   :  { %v6868_v47 = vmul.f32 0.70710677, %v6865_v2 }
 0x347   :  { %v3549_v10 = vand.u32 2147483647, %v6868_v47  ;;  %vm3541_vm10 = vcmp.ge.f32.partialorder %v6868_v47, 0.0 }
 0x348   :  { %v3545_v45 = vsel %vm3541_vm10, 1.0, %v6109_v62 }
 0x349   :  { %v3553_v18 = vmul.f32 0.3275911, %v3549_v10  ;;  %v3601_v4 = vsub.f32 0.0, %v3549_v10  ;;  %v3516_v24 = vpop.f32.mrf.mxu0 }
 0x34a   :  { %v3474_v14 = vpop.f32.mrf.mxu1  ;;  %v3517_v50 = vadd.f32 %v3516_v24, %v3503_v1  ;;  %v3643_v24 = vperm.slane %v6862_v63, 6 }
 0x34b   :  { %v3557_v0 = vadd.f32 1.0, %v3553_v18  ;;  %v6874_v6 = vadd.f32 %v3474_v14, %v3461_v49  ;;  %v3605_v28 = vmul.f32 %v3601_v4, %v3549_v10 }
 0x34d   :  { %5766 = vrcp.f32 %v3557_v0  ;;  %v6877_v33 = vmul.f32 0.70710677, %v6874_v6  ;;  %v3609_v23 = vmul.f32 1.442695, %v3605_v28  ;;  %v6898_v28 = vand.u32 127, %v3649_v57 }
 0x34e   :  { %v3691_v57 = vperm.slane %v6862_v63, 7 }
 0x34f   :  { %v3551_v37 = vand.u32 2147483647, %v6877_v33  ;;  %vm3543_vm11 = vcmp.ge.f32.partialorder %v6877_v33, 0.0  ;;  %vm3651_vm12 = vcmp.lt.s32.totalorder %v6898_v28, 4 }
 0x351   :  { %v3555_v54 = vmul.f32 0.3275911, %v3551_v37  ;;  %v3603_v27 = vsub.f32 0.0, %v3551_v37 }
 0x353   :  { %v3528_v11 = vpop.f32.mrf.mxu1  ;;  %v5767_v30 = vpop.eup %5766  ;;  %v3559_v36 = vadd.f32 1.0, %v3555_v54  ;;  %v3607_v40 = vmul.f32 %v3603_v27, %v3551_v37 }
 0x354   :  { %v6880_v32 = vadd.f32 %v3528_v11, %v3515_v9  ;;  %v3565_v52 = vmul.f32 1.0614054, %v5767_v30  ;;  %v3533_v11 = vmul.f32 0.5, %v6865_v2 }
 0x355   :  { %5768 = vrcp.f32 %v3559_v36  ;;  %v3613_v35 = vmul.f32 1.442695, %v3607_v40 }
 0x356   :  { %v6883_v29 = vmul.f32 0.70710677, %v6880_v32  ;;  %v3569_v13 = vadd.f32 -1.4531521, %v3565_v52 }
 0x358   :  { %v3550_v15 = vand.u32 2147483647, %v6883_v29  ;;  %v3573_v61 = vmul.f32 %v5767_v30, %v3569_v13  ;;  %vm3542_vm13 = vcmp.ge.f32.partialorder %v6883_v29, 0.0 }
 0x35a   :  { %v3554_v55 = vmul.f32 0.3275911, %v3550_v15  ;;  %v3577_v5 = vadd.f32 1.4214138, %v3573_v61  ;;  %v3602_v60 = vsub.f32 0.0, %v3550_v15 }
 0x35b   :  { %v3530_v7 = vpop.f32.mrf.mxu1  ;;  %v5769_v46 = vpop.eup %5768 }
 0x35c   :  { %v3558_v25 = vadd.f32 1.0, %v3554_v55  ;;  %v6886_v51 = vadd.f32 %v3530_v7, %v3517_v50  ;;  %v3581_v34 = vmul.f32 %v5767_v30, %v3577_v5  ;;  %v3567_v44 = vmul.f32 1.0614054, %v5769_v46 }
 0x35d   :  { %v3606_v17 = vmul.f32 %v3602_v60, %v3550_v15 }
 0x35e   :  { %5770 = vrcp.f32 %v3558_v25  ;;  %v6889_v53 = vmul.f32 0.70710677, %v6886_v51  ;;  %v3585_v22 = vadd.f32 -0.28449672, %v3581_v34  ;;  %v3571_v3 = vadd.f32 -1.4531521, %v3567_v44 }
 0x35f   :  { %5772 = vpow2.f32 %v3609_v23  ;;  %v3611_v47 = vmul.f32 1.442695, %v3606_v17  ;;  %v3535_v44 = vmul.f32 0.5, %v6874_v6  ;;  %v3546_v6 = vsel %vm3542_vm13, 1.0, %v6109_v62 }
 0x360   :  { %v3552_v8 = vand.u32 2147483647, %v6889_v53  ;;  %v3589_v39 = vmul.f32 %v5767_v30, %v3585_v22  ;;  %v3575_v16 = vmul.f32 %v5769_v46, %v3571_v3  ;;  %vm3544_vm14 = vcmp.ge.f32.partialorder %v6889_v53, 0.0 }
 0x362   :  { %v3556_v38 = vmul.f32 0.3275911, %v3552_v8  ;;  %v3593_v48 = vadd.f32 0.2548296, %v3589_v39  ;;  %v3579_v58 = vadd.f32 1.4214138, %v3575_v16 }
 0x363   :  { %v3604_v4 = vsub.f32 0.0, %v3552_v8 }
 0x364   :  { %v5771_v56 = vpop.eup %5770  ;;  %v3560_v59 = vadd.f32 1.0, %v3556_v38  ;;  %v3597_v31 = vmul.f32 %v5767_v30, %v3593_v48  ;;  %v3583_v43 = vmul.f32 %v5769_v46, %v3579_v58  ;;  %v3637_v30 = vperm.slane %v6862_v63, 5 }
 0x365   :  { %v3566_v10 = vmul.f32 1.0614054, %v5771_v56  ;;  %v5773_v42 = vpop.eup %5772  ;;  %v3608_v2 = vmul.f32 %v3604_v4, %v3552_v8 }
 0x366   :  { %5774 = vrcp.f32 %v3560_v59  ;;  %v3617_v12 = vmul.f32 %v5773_v42, %v3597_v31  ;;  %v3587_v49 = vadd.f32 -0.28449672, %v3583_v43 }
 0x367   :  { %v3570_v18 = vadd.f32 -1.4531521, %v3566_v10  ;;  %5776 = vpow2.f32 %v3613_v35  ;;  %v3615_v22 = vmul.f32 1.442695, %v3608_v2  ;;  %v3534_v10 = vmul.f32 0.5, %v6880_v32 }
 0x368   :  { %v3621_v14 = vsub.f32 1.0, %v3617_v12  ;;  %v3591_v0 = vmul.f32 %v5769_v46, %v3587_v49  ;;  %5778 = vpow2.f32 %v3611_v47  ;;  %v3638_v12 = vperm.slane %v6871_v20, 5 }
 0x369   :  { %v3574_v41 = vmul.f32 %v5771_v56, %v3570_v18  ;;  %5780 = vpow2.f32 %v3615_v22  ;;  %v3692_v32 = vperm.slane %v6871_v20, 7 }
 0x36a   :  { %v3625_v37 = vmul.f32 %v3621_v14, %v3545_v45  ;;  %v3595_v9 = vadd.f32 0.2548296, %v3591_v0  ;;  %v3644_v0 = vperm.slane %v6871_v20, 6 }
 0x36b   :  { %v3578_v54 = vadd.f32 1.4214138, %v3574_v41 }
 0x36c   :  { %v5775_v21 = vpop.eup %5774  ;;  %v3629_v36 = vadd.f32 1.0, %v3625_v37  ;;  %v3599_v52 = vmul.f32 %v5769_v46, %v3595_v9  ;;  %v3547_v46 = vsel %vm3543_vm11, 1.0, %v6109_v62  ;;  %v3548_v37 = vsel %vm3544_vm14, 1.0, %v6109_v62 }
 0x36d   :  { %v3582_v26 = vmul.f32 %v5771_v56, %v3578_v54  ;;  %v3568_v19 = vmul.f32 1.0614054, %v5775_v21  ;;  %v5777_v13 = vpop.eup %5776 }
 0x36e   :  { %v3633_v1 = vmul.f32 %v3629_v36, %v3533_v11  ;;  %v3619_v15 = vmul.f32 %v5777_v13, %v3599_v52  ;;  %v5779_v16 = vpop.eup %5778 }
 0x36f   :  { %v3586_v61 = vadd.f32 -0.28449672, %v3582_v26  ;;  %v3572_v50 = vadd.f32 -1.4531521, %v3568_v19  ;;  %v5781_v18 = vpop.eup %5780 }
 0x370   :  { %v3623_v55 = vsub.f32 1.0, %v3619_v15  ;;  %v3639_v23 = vmul.f32 %v3637_v30, %v3633_v1 }
 0x371   :  { %v3590_v5 = vmul.f32 %v5771_v56, %v3586_v61  ;;  %v3576_v7 = vmul.f32 %v5775_v21, %v3572_v50 }
 0x372   :  { %v3627_v27 = vmul.f32 %v3623_v55, %v3547_v46  ;;  %v3645_v34 = vadd.f32 %v3643_v24, %v3639_v23  ;;  %v6110_v46 = vmov 0  }
 0x373   :  { %v3594_v33 = vadd.f32 0.2548296, %v3590_v5  ;;  %v3580_v25 = vadd.f32 1.4214138, %v3576_v7  ;;  %5655 = vset.pattern.permute.xlu2 %v6110_v46  ;;  %5656 = vset.pattern.permute.xlu0 %v6110_v46 }
 0x374   :  { %v3631_v3 = vadd.f32 1.0, %v3627_v27  ;;  %v3652_v8 = vsel %vm3651_vm12, %v3645_v34, -1e+30  ;;  %5657 = vset.pattern.permute.xlu1 %v6110_v46 }
 0x375   :  { %v3598_v40 = vmul.f32 %v5771_v56, %v3594_v33  ;;  %v3584_v39 = vmul.f32 %v5775_v21, %v3580_v25  ;;  %3654 = vmax.xlane.f32.xlu0 %v3652_v8  ;;  %v6925_v33 = vld [vmem:[#allocation17 + $0x20] sm:$0xff] }
 0x376   :  { %v3635_v38 = vmul.f32 %v3631_v3, %v3535_v44  ;;  %v3688_v28 = vperm.slane %v6925_v33, 0 }
 0x377   :  { %v3618_v48 = vmul.f32 %v5779_v16, %v3598_v40  ;;  %v3588_v58 = vadd.f32 -0.28449672, %v3584_v39 }
 0x378   :  { %v3641_v35 = vmul.f32 %v3637_v30, %v3635_v38  ;;  %v3693_v30 = vmul.f32 %v3691_v57, %v3645_v34 }
 0x379   :  { %v3622_v60 = vsub.f32 1.0, %v3618_v48  ;;  %v3592_v59 = vmul.f32 %v5775_v21, %v3588_v58 }
 0x37a   :  { %v3647_v56 = vadd.f32 %v3643_v24, %v3641_v35 }
 0x37b   :  { %v3626_v31 = vmul.f32 %v3622_v60, %v3546_v6  ;;  %v3596_v43 = vadd.f32 0.2548296, %v3592_v59 }
 0x37c   :  { %v3653_v29 = vsel %vm3651_vm12, %v3647_v56, -1e+30  ;;  %v3695_v26 = vmul.f32 %v3691_v57, %v3647_v56 }
 0x37d   :  { %v3630_v42 = vadd.f32 1.0, %v3626_v31  ;;  %v3600_v49 = vmul.f32 %v5775_v21, %v3596_v43  ;;  %3656 = vmax.xlane.f32.xlu0 %v3653_v29  ;;  %v3536_v21 = vmul.f32 0.5, %v6886_v51 }
 0x37f   :  { %v3634_v17 = vmul.f32 %v3630_v42, %v3534_v10  ;;  %v3620_v14 = vmul.f32 %v5781_v18, %v3600_v49  ;;  %v6928_v10 = vld [vmem:[#allocation17 + $0x28] sm:$0xff]  ;;  %v6930_v42 = vld [vmem:[#allocation17 + $0x30] sm:$0xff]  ;;  %v3932_v18 = vperm.slane %v6925_v33, 1 }
 0x380   :  { %v3716_v49 = vperm.slane %v6928_v10, 2  ;;  %v3717_v29 = vperm.slane %v6930_v42, 2 }
 0x381   :  { %v3640_v41 = vmul.f32 %v3638_v12, %v3634_v17  ;;  %v3624_v45 = vsub.f32 1.0, %v3620_v14  ;;  %v3933_v17 = vperm.slane %v6928_v10, 1 }
 0x383   :  { %v3628_v9 = vmul.f32 %v3624_v45, %v3548_v37  ;;  %v3646_v54 = vadd.f32 %v3644_v0, %v3640_v41  ;;  %v3934_v41 = vperm.slane %v6930_v42, 1  ;;  %v3907_v37 = vpop.f32.mrf.mxu3 }
 0x385   :  { %v3632_v11 = vadd.f32 1.0, %v3628_v9  ;;  %v3694_v47 = vmul.f32 %v3692_v32, %v3646_v54  ;;  %v3921_v9 = vpop.f32.mrf.mxu0 }
 0x387   :  { %v3636_v4 = vmul.f32 %v3632_v11, %v3536_v21  ;;  %v3697_v53 = vadd.f32 %v3694_v47, %v3693_v30 }
 0x389   :  { %v3642_v36 = vmul.f32 %v3638_v12, %v3636_v4  ;;  %3698 = vadd.xlane.f32.xlu0 %v3697_v53  ;;  %v3715_v12 = vperm.slane %v6925_v33, 2 }
 0x38b   :  { %v3648_v52 = vadd.f32 %v3644_v0, %v3642_v36  ;;  %v3893_v0 = vpop.f32.mrf.mxu2 }
 0x38d   :  { %v3696_v19 = vmul.f32 %v3692_v32, %v3648_v52 }
 0x38f   :  { %v3700_v13 = vadd.f32 %v3696_v19, %v3695_v26 }
 0x3e8   :  { %v3655_v63 = vpop.xlane.xlu0 %3654 }
 0x3e9   :  { %v3658_v24 = vsub.f32 %v3645_v34, %v3655_v63  ;;  %v3965_v63 = vperm.slane %v6925_v33, 3 }
 0x3eb   :  { %v3660_v62 = vsel %vm3651_vm12, %v3658_v24, 0.0 }
 0x3ec   :  { %v3662_v20 = vmul.f32 1.442695, %v3660_v62 }
 0x3ee   :  { %5782 = vpow2.f32 %v3662_v20  ;;  %v3966_v20 = vperm.slane %v6928_v10, 3 }
 0x3f0   :  { %v3657_v1 = vpop.xlane.xlu0 %3656 }
 0x3f1   :  { %v3659_v51 = vsub.f32 %v3647_v56, %v3657_v1 }
 0x3f3   :  { %v3661_v15 = vsel %vm3651_vm12, %v3659_v51, 0.0 }
 0x3f4   :  { %v5783_v61 = vpop.eup %5782  ;;  %v3664_v50 = vmul.f32 1.442695, %v3661_v15 }
 0x3f5   :  { %v3666_v2 = vsel %vm3651_vm12, %v5783_v61, 0.0  ;;  %v3967_v61 = vperm.slane %v6930_v42, 3 }
 0x3f6   :  { %5784 = vpow2.f32 %v3664_v50  ;;  %3668 = vadd.xlane.f32.xlu1 %v3666_v2  ;;  %v3672_v55 = vmul.f32 %v3666_v2, %v3660_v62 }
 0x3f8   :  { %3674 = vadd.xlane.f32.xlu2 %v3672_v55 }
 0x3fc   :  { %v5785_v5 = vpop.eup %5784  ;;  %v3699_v16 = vpop.xlane.xlu0 %3698 }
 0x3fd   :  { %v3667_v7 = vsel %vm3651_vm12, %v5785_v5, 0.0 }
 0x3fe   :  { %3670 = vadd.xlane.f32.xlu1 %v3667_v7  ;;  %v3673_v23 = vmul.f32 %v3667_v7, %v3661_v15 }
 0x400   :  { %3676 = vadd.xlane.f32.xlu2 %v3673_v23 }
 0x406   :  { %3701 = vadd.xlane.f32.xlu1 %v3700_v13 }
 0x469   :  { %v3669_v27 = vpop.xlane.xlu1 %3668 }
 0x46a   :  { %5786 = vlog2.f32 %v3669_v27 }
 0x46b   :  { %5788 = vrcp.f32 %v3669_v27  ;;  %v3675_v25 = vpop.xlane.xlu2 %3674  ;;  %v3895_v27 = vpop.f32.mrf.mxu2 }
 0x470   :  { %v5787_v34 = vpop.eup %5786 }
 0x471   :  { %v5789_v44 = vpop.eup %5788  ;;  %v3679_v22 = vmul.f32 0.6931472, %v5787_v34  ;;  %v3671_v3 = vpop.xlane.xlu1 %3670 }
 0x472   :  { %v3684_v40 = vmul.f32 %v5789_v44, %v3675_v25  ;;  %5790 = vlog2.f32 %v3671_v3 }
 0x473   :  { %5792 = vrcp.f32 %v3671_v3  ;;  %v3677_v60 = vpop.xlane.xlu2 %3676  ;;  %v3923_v3 = vpop.f32.mrf.mxu0 }
 0x474   :  { %v3686_v39 = vsub.f32 %v3679_v22, %v3684_v40  ;;  %v3909_v22 = vpop.f32.mrf.mxu3 }
 0x476   :  { %v3689_v8 = vmul.f32 %v3688_v28, %v3686_v39 }
 0x478   :  { %v5791_v38 = vpop.eup %5790  ;;  %v3703_v48 = vadd.f32 %v3699_v16, %v3689_v8 }
 0x479   :  { %v5793_v58 = vpop.eup %5792  ;;  %v3681_v35 = vmul.f32 0.6931472, %v5791_v38  ;;  %v3702_v43 = vpop.xlane.xlu1 %3701 }
 0x47a   :  { %v3685_v59 = vmul.f32 %v5793_v58, %v3677_v60  ;;  %3707 = vperm.xlu2 %5655, %v3703_v48  }
 0x47c   :  { %v3687_v6 = vsub.f32 %v3681_v35, %v3685_v59 }
 0x47e   :  { %v3690_v31 = vmul.f32 %v3688_v28, %v3687_v6 }
 0x480   :  { %v3704_v56 = vadd.f32 %v3702_v43, %v3690_v31 }
 0x482   :  { %3712 = vperm.xlu0 %5656, %v3704_v56  }
 0x4d4   :  { %v3708_v14 = vpop.permute.xlu2 %3707 }
 0x4d5   :  { %v3718_v45 = vmul.f32 %v3715_v12, %v3708_v14  ;;  %v3719_v57 = vmul.f32 %v3716_v49, %v3708_v14  ;;  %v3720_v32 = vmul.f32 %v3717_v29, %v3708_v14 }
 0x4d7   :  { %v3926_v54 = vadd.f32 %v3893_v0, %v3718_v45  ;;  %v3927_v21 = vadd.f32 %v3907_v37, %v3719_v57  ;;  %v3928_v11 = vadd.f32 %v3921_v9, %v3720_v32  ;;  %v3982_v0 = vperm.slane %v6925_v33, 4 }
 0x4d9   :  { %v3935_v30 = vadd.f32 %v3932_v18, %v3926_v54  ;;  %v3936_v47 = vadd.f32 %v3933_v17, %v3927_v21  ;;  %v3937_v4 = vadd.f32 %v3934_v41, %v3928_v11 }
 0x4db   :  { %v3941_v53 = vmul.f32 0.5, %v3935_v30  ;;  %v3942_v36 = vmul.f32 0.5, %v3936_v47  ;;  %v3943_v52 = vmul.f32 0.5, %v3937_v4 }
 0x4dd   :  { %5794 = vtanh.f32 %v3941_v53 }
 0x4de   :  { %5796 = vtanh.f32 %v3942_v36 }
 0x4df   :  { %5798 = vtanh.f32 %v3943_v52 }
 0x4e3   :  { %v5795_v26 = vpop.eup %5794 }
 0x4e4   :  { %v5797_v19 = vpop.eup %5796  ;;  %v3953_v13 = vadd.f32 1.0, %v5795_v26 }
 0x4e5   :  { %v5799_v24 = vpop.eup %5798  ;;  %v3954_v62 = vadd.f32 1.0, %v5797_v19 }
 0x4e6   :  { %v3955_v1 = vadd.f32 1.0, %v5799_v24  ;;  %v3959_v51 = vmul.f32 0.5, %v3953_v13 }
 0x4e7   :  { %v3960_v15 = vmul.f32 0.5, %v3954_v62 }
 0x4e8   :  { %v3961_v50 = vmul.f32 0.5, %v3955_v1  ;;  %v3968_v2 = vmul.f32 %v3965_v63, %v3959_v51 }
 0x4e9   :  { %v3969_v55 = vmul.f32 %v3966_v20, %v3960_v15 }
 0x4ea   :  { %v3970_v5 = vmul.f32 %v3967_v61, %v3961_v50 }
 0x4eb   :  { %v3974_v7 = vadd.f32 %v3969_v55, %v3968_v2 }
 0x4ed   :  { %v3975_v23 = vadd.f32 %v3974_v7, %v3970_v5 }
 0x4ef   :  { %3976 = vadd.xlane.f32.xlu1 %v3975_v23 }
 0x4f4   :  { %v3713_v46 = vpop.permute.xlu0 %3712 }
 0x4f5   :  { %v3721_v25 = vmul.f32 %v3715_v12, %v3713_v46  ;;  %v3722_v34 = vmul.f32 %v3716_v49, %v3713_v46  ;;  %v3723_v44 = vmul.f32 %v3717_v29, %v3713_v46 }
 0x4f7   :  { %v3929_v28 = vadd.f32 %v3895_v27, %v3721_v25  ;;  %v3930_v40 = vadd.f32 %v3909_v22, %v3722_v34  ;;  %v3931_v39 = vadd.f32 %v3923_v3, %v3723_v44 }
 0x4f9   :  { %v3938_v8 = vadd.f32 %v3932_v18, %v3929_v28  ;;  %v3939_v16 = vadd.f32 %v3933_v17, %v3930_v40  ;;  %v3940_v38 = vadd.f32 %v3934_v41, %v3931_v39 }
 0x4fb   :  { %v3944_v48 = vmul.f32 0.5, %v3938_v8  ;;  %v3945_v58 = vmul.f32 0.5, %v3939_v16  ;;  %v3946_v35 = vmul.f32 0.5, %v3940_v38 }
 0x4fd   :  { %5800 = vtanh.f32 %v3944_v48 }
 0x4fe   :  { %5802 = vtanh.f32 %v3945_v58 }
 0x4ff   :  { %5804 = vtanh.f32 %v3946_v35 }
 0x503   :  { %v5801_v60 = vpop.eup %5800 }
 0x504   :  { %v5803_v59 = vpop.eup %5802  ;;  %v3956_v6 = vadd.f32 1.0, %v5801_v60 }
 0x505   :  { %v5805_v31 = vpop.eup %5804  ;;  %v3957_v43 = vadd.f32 1.0, %v5803_v59 }
 0x506   :  { %v3958_v56 = vadd.f32 1.0, %v5805_v31  ;;  %v3962_v10 = vmul.f32 0.5, %v3956_v6 }
 0x507   :  { %v3963_v42 = vmul.f32 0.5, %v3957_v43 }
 0x508   :  { %v3964_v12 = vmul.f32 0.5, %v3958_v56  ;;  %v3971_v49 = vmul.f32 %v3965_v63, %v3962_v10 }
 0x509   :  { %v3972_v29 = vmul.f32 %v3966_v20, %v3963_v42 }
 0x50a   :  { %v3973_v18 = vmul.f32 %v3967_v61, %v3964_v12 }
 0x50b   :  { %v3978_v17 = vadd.f32 %v3972_v29, %v3971_v49 }
 0x50d   :  { %v3979_v14 = vadd.f32 %v3978_v17, %v3973_v18 }
 0x50f   :  { %3980 = vadd.xlane.f32.xlu1 %v3979_v14 }
 0x562   :  { %v3977_v41 = vpop.xlane.xlu1 %3976 }
 0x563   :  { %v3983_v45 = vadd.f32 %v3982_v0, %v3977_v41 }
 0x565   :  { %3987 = vperm.xlu1 %5657, %v3983_v45  }
 0x582   :  { %v3981_v57 = vpop.xlane.xlu1 %3980 }
 0x583   :  { %v3984_v32 = vadd.f32 %v3982_v0, %v3981_v57 }
 0x585   :  { %3992 = vperm.xlu2 %5655, %v3984_v32  }
 0x5d7   :  { %v3988_v37 = vpop.permute.xlu1 %3987 }
 0x5d8   :  { %3995 = vst [vmem:[#allocation19] sm:$0xff] %v3988_v37 }
 0x5df   :  { %v3993_v9 = vpop.permute.xlu2 %3992 }
 0x5e0   :  { %3996 = vst [vmem:[#allocation19 + $0x8] sm:$0xff] %v3993_v9 }
 0x5e1   :  { %4009 = dma.vmem_to_hbm [thread:$0]  %s4002_s9, 256, %s4004_s27, [#allocation4], %s6095_s5, %s6095_s5, %s6096_s18  }
 0x5e2   :  { %6085 = dma.done.wait [#allocation4], 256  }
 0x5e3   :  { %6086 = vsyncadd [#allocation4], 4294967040 }
 0x5e4   :  { %4014 = vsyncpa [#allocation3], 1 }
 0x5e5   :  { %4015 = vsyncpa [#allocation6], 1 }
 0x5e6   :  { %4016 = vsyncpa [#allocation9], 1 }
 0x5e7   :  { %4017 = vsyncpa [#allocation12], 1 }
 0x5e8   :  { %4018 = vsyncpa [#allocation15], 1 }
 0x5e9   :  { %4019 = vsyncpa [#allocation18], 1 }
 0x5ea   :  { %4020 = vsyncpa [#allocation4], 1 }

</bundles_post_ra>
